<compile_context>
chip_gen: v5e
topology: v5e:2x2
jax: 0.10.0
libtpu: 0.0.40
codegen_flags: <defaults>
</compile_context>

<pallas_src>
import jax
import jax.numpy as jnp
import numpy as np
from jax.experimental import pallas as pl
from jax.experimental.pallas import tpu as pltpu


def calc_out_size(w, h, kernel_size, padding=0, stride=1):
    width = (w - kernel_size + 2 * padding) // stride + 1
    height = (h - kernel_size + 2 * padding) // stride + 1
    return (width, height)


def _elu(x):
    # ELU(alpha=1).  The exp argument is clamped so the unselected branch never
    # evaluates exp(+large).  (Review suggested jnp.expm1; kept the exp form,
    # which is guaranteed to lower on Mosaic -- the cancellation it avoids is
    # <1e-7 absolute here, far below the check tolerance.)
    return jnp.where(x > 0, x, jnp.exp(jnp.minimum(x, 0.0)) - 1.0)


# --------------------- fused forward (single pallas_call) ---------------------

def _fused_kernel(x_ref, w1_ref, b1_ref, w2_ref, b2_ref,
                  d1_ref, bd1_ref, d2_ref, bd2_ref, o_ref):
    # fc -> ELU -> fc2 -> ELU  (small, f32)
    h = _elu(jnp.dot(x_ref[...], w1_ref[...],
                     preferred_element_type=jnp.float32) + b1_ref[...])
    s = _elu(jnp.dot(h, w2_ref[...],
                     preferred_element_type=jnp.float32) + b2_ref[...])
    # ConvTranspose2d(32,16,4,stride=2) folded to a dense bf16 matmul (+ ELU).
    a = _elu(jnp.dot(s.astype(d1_ref.dtype), d1_ref[...],
                     preferred_element_type=jnp.float32) + bd1_ref[...])
    # ConvTranspose2d(16,C,8,stride=4) folded to a dense bf16 matmul; columns
    # are NCHW-flat (co, oh, ow) -> lane-dense (B, C*H3*W3) output store.
    o_ref[...] = (jnp.dot(a.astype(d2_ref.dtype), d2_ref[...],
                          preferred_element_type=jnp.float32) + bd2_ref[...])


@jax.jit
def _decoder_forward(x, w1, b1, w2, b2, d1, bd1, d2, bd2):
    B = x.shape[0]
    n_out = d2.shape[1]

    # Fixed lane-multiple column tile: aim for a 2-step grid (one d2 block per
    # v7x TensorCore; fewest ~0.35us grid steps on v5e/v6e), capped at 2048
    # columns so the double-buffered bf16 d2 block stays well under the default
    # scoped-VMEM limits.  Ragged last block is handled by Pallas (out-of-range
    # output stores are masked; each d2 column only feeds its own output
    # column, so padded garbage columns are discarded).
    nt = min(2048, ((pl.cdiv(n_out, 2) + 127) // 128) * 128)
    grid = (pl.cdiv(n_out, nt),)

    def full(shape):
        nd = len(shape)
        return pl.BlockSpec(shape, lambda j, _nd=nd: (0,) * _nd)

    nbytes = lambda a: a.size * a.dtype.itemsize
    bytes_accessed = int(sum(nbytes(a) for a in
                             (x, w1, b1, w2, b2, d1, bd1, d2, bd2))
                         + B * n_out * 4)
    flops = int(2 * B * (w1.shape[0] * w1.shape[1] + w2.shape[0] * w2.shape[1]
                         + d1.shape[0] * d1.shape[1] + d2.shape[0] * d2.shape[1]))
    transcendentals = int(B * (w1.shape[1] + w2.shape[1] + d1.shape[1]))

    return pl.pallas_call(
        _fused_kernel,
        out_shape=jax.ShapeDtypeStruct((B, n_out), jnp.float32),
        grid=grid,
        in_specs=[full(x.shape),
                  full(w1.shape), full(b1.shape),
                  full(w2.shape), full(b2.shape),
                  full(d1.shape), full(bd1.shape),
                  pl.BlockSpec((d2.shape[0], nt), lambda j: (0, j)),
                  pl.BlockSpec((1, nt), lambda j: (0, j))],
        out_specs=pl.BlockSpec((B, nt), lambda j: (0, j)),
        compiler_params=pltpu.CompilerParams(
            dimension_semantics=("parallel",)),
        cost_estimate=pl.CostEstimate(flops=flops,
                                      transcendentals=transcendentals,
                                      bytes_accessed=bytes_accessed),
    )(x, w1, b1, w2, b2, d1, bd1, d2, bd2)


# ------------- fold ConvTranspose2d into a dense matrix (init-time) -------------

def _convT_dense(w_iokk, hin, win, stride, row_index, col_index, n_rows, n_cols):
    """Dense D s.t. flat_out = flat_in @ D equals ConvTranspose2d(padding=0).

    w_iokk: PyTorch weight (Cin, Cout, K, K).  row_index(ci, ih, iw) and
    col_index(co, oh, ow) define the flat input / output orderings.
    """
    w = np.asarray(w_iokk, np.float32)
    cin, cout, K, _ = w.shape
    ci, ih, iw, co, kh, kw = np.indices((cin, hin, win, cout, K, K))
    oh = ih * stride + kh
    ow = iw * stride + kw
    rows = row_index(ci, ih, iw).ravel()
    cols = col_index(co, oh, ow).ravel()
    vals = w[ci, co, kh, kw].ravel()
    D = np.zeros((n_rows, n_cols), np.float32)
    np.add.at(D, (rows, cols), vals)
    return D


# ------------------------------ module wrapper ------------------------------

class DecoderNetworkPallas:
    def __init__(self, channels, height, width, latent_dim, key):
        self.i_h, self.i_w = height, width
        self.channels = channels
        h, w = calc_out_size(height, width, 8, stride=4)
        self.h, self.w = calc_out_size(h, w, 4, stride=2)
        n2 = self.h * self.w * 32

        ks = jax.random.split(key, 8)
        sc = 0.1
        fc_w = (jax.random.normal(ks[0], (latent_dim, 128)) * sc).astype(jnp.float32)
        fc_b = (jax.random.normal(ks[1], (128,)) * sc).astype(jnp.float32)
        fc2_w = (jax.random.normal(ks[2], (128, n2)) * sc).astype(jnp.float32)
        fc2_b = (jax.random.normal(ks[3], (n2,)) * sc).astype(jnp.float32)
        # PyTorch ConvTranspose2d weight layout: (in_channels, out_channels, K, K)
        dc1_w = (jax.random.normal(ks[4], (32, 16, 4, 4)) * sc).astype(jnp.float32)
        dc1_b = (jax.random.normal(ks[5], (16,)) * sc).astype(jnp.float32)
        dc2_w = (jax.random.normal(ks[6], (16, channels, 8, 8)) * sc).astype(jnp.float32)
        dc2_b = (jax.random.normal(ks[7], (channels,)) * sc).astype(jnp.float32)
        self._raw = (fc_w, fc_b, fc2_w, fc2_b, dc1_w, dc1_b, dc2_w, dc2_b)

        # ---- fold both deconvs (+ layout changes) into dense matrices ----
        H1, W1 = self.h, self.w                          # 2 x 2
        H2, W2 = (H1 - 1) * 2 + 4, (W1 - 1) * 2 + 4      # 6 x 6   (dc1 out)
        H3, W3 = (H2 - 1) * 4 + 8, (W2 - 1) * 4 + 8      # 28 x 28 (dc2 out)
        self.H3, self.W3 = H3, W3
        c1o = dc1_w.shape[1]                             # 16

        # dc1: rows follow the fc2 output's .view(B,32,h,w) NCHW-flat order;
        # cols are NHWC-flat (oh,ow,co) -> the .view + NCHW->NHWC transpose
        # disappears into the matrix.
        d1 = _convT_dense(
            dc1_w, H1, W1, 2,
            row_index=lambda ci, ih, iw: (ci * H1 + ih) * W1 + iw,
            col_index=lambda co, oh, ow: (oh * W2 + ow) * c1o + co,
            n_rows=32 * H1 * W1, n_cols=H2 * W2 * c1o)
        bd1 = np.tile(np.asarray(dc1_b, np.float32), H2 * W2)

        # dc2: rows match d1's column order; cols directly in NCHW-flat
        # (co, oh, ow) order so the kernel output reshapes contiguously to
        # (B, C, H3, W3).  The nearest resize is deliberately NOT folded in
        # (review: it duplicated ~23% of the dominant HBM bytes); it is a
        # tiny post-kernel gather instead.
        d2 = _convT_dense(
            dc2_w, H2, W2, 4,
            row_index=lambda ci, ih, iw: (ih * W2 + iw) * c1o + ci,
            col_index=lambda co, oh, ow: (co * H3 + oh) * W3 + ow,
            n_rows=H2 * W2 * c1o, n_cols=channels * H3 * W3)
        bd2 = np.repeat(np.asarray(dc2_b, np.float32), H3 * W3)

        # Nearest-neighbor resize indices (matches F.interpolate default
        # mode='nearest': src = floor(dst * in / out)); applied post-kernel.
        self._idx_h = jnp.asarray(np.arange(self.i_h) * H3 // self.i_h)
        self._idx_w = jnp.asarray(np.arange(self.i_w) * W3 // self.i_w)

        # d1/d2 stored bf16 (halves dominant weight DMA); biases stay f32 and
        # are added to the f32 accumulators.
        self.params = (
            fc_w, fc_b.reshape(1, -1), fc2_w, fc2_b.reshape(1, -1),
            jnp.asarray(d1, jnp.bfloat16), jnp.asarray(bd1).reshape(1, -1),
            jnp.asarray(d2, jnp.bfloat16), jnp.asarray(bd2).reshape(1, -1),
        )

    def __call__(self, x):
        out_flat = _decoder_forward(x, *self.params)        # (B, C*H3*W3)
        y = out_flat.reshape(x.shape[0], self.channels, self.H3, self.W3)
        # 28 -> i_h/i_w nearest resize: ~100 KB gather, done outside the kernel.
        y = jnp.take(y, self._idx_h, axis=2)
        y = jnp.take(y, self._idx_w, axis=3)
        return y

    # Pure-JAX (XLA) reference of the original PyTorch op sequence, for checking.
    def reference(self, x):
        fc_w, fc_b, fc2_w, fc2_b, dc1_w, dc1_b, dc2_w, dc2_b = self._raw
        B = x.shape[0]
        a = jax.nn.elu(x @ fc_w + fc_b)
        s = jax.nn.elu(a @ fc2_w + fc2_b)
        s = s.reshape(B, 32, self.h, self.w)

        def convT(x_nchw, w_iokk, bias, stride):
            cout, K = w_iokk.shape[1], w_iokk.shape[2]
            wf = jnp.flip(w_iokk, (2, 3)).transpose(1, 0, 2, 3)   # (Cout,Cin,K,K)
            y = jax.lax.conv_general_dilated(
                x_nchw, wf, window_strides=(1, 1),
                padding=[(K - 1, K - 1), (K - 1, K - 1)],
                lhs_dilation=(stride, stride),
                dimension_numbers=("NCHW", "OIHW", "NCHW"))
            return y + bias.reshape(1, cout, 1, 1)

        s = jax.nn.elu(convT(s, dc1_w, dc1_b, 2))
        s = convT(s, dc2_w, dc2_b, 4)
        ih = (jnp.arange(self.i_h) * s.shape[2]) // self.i_h
        iw = (jnp.arange(self.i_w) * s.shape[3]) // self.i_w
        return jnp.take(jnp.take(s, ih, axis=2), iw, axis=3)


if __name__ == "__main__":
    key = jax.random.PRNGKey(0)
    k_param, k_x = jax.random.split(key)
    channels, height, width, latent_dim = 4, 32, 32, 8
    batch = 2
    net = DecoderNetworkPallas(channels, height, width, latent_dim, k_param)
    x = jax.random.normal(k_x, (batch, latent_dim), dtype=jnp.float32)

    out = jax.block_until_ready(net(x))
    assert out.shape == (batch, channels, height, width), out.shape
    assert bool(jnp.all(jnp.isfinite(out)))

    ref = jax.block_until_ready(net.reference(x))
    max_err = float(jnp.max(jnp.abs(out - ref)))
    # Tolerance re-derived for bf16 deconv weights/activations with f32
    # accumulation (review); structural errors would be >= 1e-1.
    assert max_err < 5e-3, max_err
    print("KERNEL_OK")
</pallas_src>

<mosaic_0001>
module attributes {stable_mosaic.version = 11 : i64} {
  func.func @_fused_kernel(%arg0: i32, %arg1: memref<2x8xf32, #tpu.memory_space<vmem>>, %arg2: memref<8x128xf32, #tpu.memory_space<vmem>>, %arg3: memref<1x128xf32, #tpu.memory_space<vmem>>, %arg4: memref<128x128xf32, #tpu.memory_space<vmem>>, %arg5: memref<1x128xf32, #tpu.memory_space<vmem>>, %arg6: memref<128x576xbf16, #tpu.memory_space<vmem>>, %arg7: memref<1x576xf32, #tpu.memory_space<vmem>>, %arg8: memref<576x1664xbf16, #tpu.memory_space<vmem>>, %arg9: memref<1x1664xf32, #tpu.memory_space<vmem>>, %arg10: memref<2x1664xf32, #tpu.memory_space<vmem>>) attributes {dimension_semantics = [#tpu.dimension_semantics<parallel>], iteration_bounds = array<i64: 2>, scalar_prefetch = 0 : i64, scratch_operands = 0 : i64, tpu.core_type = #tpu.core_type<tc>, window_params = [{pipeline_mode = #tpu.pipeline_mode<synchronous>, transform_indices = @transform_0, window_bounds = array<i64: 2, 8>}, {pipeline_mode = #tpu.pipeline_mode<synchronous>, transform_indices = @transform_1, window_bounds = array<i64: 8, 128>}, {pipeline_mode = #tpu.pipeline_mode<synchronous>, transform_indices = @transform_2, window_bounds = array<i64: 1, 128>}, {pipeline_mode = #tpu.pipeline_mode<synchronous>, transform_indices = @transform_3, window_bounds = array<i64: 128, 128>}, {pipeline_mode = #tpu.pipeline_mode<synchronous>, transform_indices = @transform_4, window_bounds = array<i64: 1, 128>}, {pipeline_mode = #tpu.pipeline_mode<synchronous>, transform_indices = @transform_5, window_bounds = array<i64: 128, 576>}, {pipeline_mode = #tpu.pipeline_mode<synchronous>, transform_indices = @transform_6, window_bounds = array<i64: 1, 576>}, {transform_indices = @transform_7, window_bounds = array<i64: 576, 1664>}, {transform_indices = @transform_8, window_bounds = array<i64: 1, 1664>}, {transform_indices = @transform_9, window_bounds = array<i64: 2, 1664>}]} {
    %c0 = arith.constant 0 : index
    %c0_0 = arith.constant 0 : index
    %0 = vector.load %arg1[%c0, %c0_0] : memref<2x8xf32, #tpu.memory_space<vmem>>, vector<2x8xf32>
    %c0_1 = arith.constant 0 : index
    %c0_2 = arith.constant 0 : index
    %1 = vector.load %arg2[%c0_1, %c0_2] : memref<8x128xf32, #tpu.memory_space<vmem>>, vector<8x128xf32>
    %cst = arith.constant dense<0.000000e+00> : vector<2x128xf32>
    %2 = tpu.matmul %0, %1, %cst {dimension_numbers = #tpu.dot_dimension_numbers<[1], [0], [0], [1], [0, 0, 1, 1], [], []>} : vector<2x8xf32>, vector<8x128xf32>, vector<2x128xf32> -> vector<2x128xf32>
    %c0_3 = arith.constant 0 : index
    %c0_4 = arith.constant 0 : index
    %3 = vector.load %arg3[%c0_3, %c0_4] : memref<1x128xf32, #tpu.memory_space<vmem>>, vector<1x128xf32>
    %4 = vector.broadcast %3 : vector<1x128xf32> to vector<2x128xf32>
    %5 = arith.addf %2, %4 : vector<2x128xf32>
    %cst_5 = arith.constant 0.000000e+00 : f32
    %6 = vector.broadcast %cst_5 : f32 to vector<2x128xf32>
    %7 = arith.cmpf ogt, %5, %6 : vector<2x128xf32>
    %cst_6 = arith.constant 0.000000e+00 : f32
    %8 = vector.broadcast %cst_6 : f32 to vector<2x128xf32>
    %9 = arith.minimumf %5, %8 : vector<2x128xf32>
    %10 = math.exp %9 : vector<2x128xf32>
    %cst_7 = arith.constant 1.000000e+00 : f32
    %11 = vector.broadcast %cst_7 : f32 to vector<2x128xf32>
    %12 = arith.subf %10, %11 : vector<2x128xf32>
    %13 = arith.select %7, %5, %12 : vector<2x128xi1>, vector<2x128xf32>
    %c0_8 = arith.constant 0 : index
    %c0_9 = arith.constant 0 : index
    %14 = vector.load %arg4[%c0_8, %c0_9] : memref<128x128xf32, #tpu.memory_space<vmem>>, vector<128x128xf32>
    %cst_10 = arith.constant dense<0.000000e+00> : vector<2x128xf32>
    %15 = tpu.matmul %13, %14, %cst_10 {dimension_numbers = #tpu.dot_dimension_numbers<[1], [0], [0], [1], [0, 0, 1, 1], [], []>} : vector<2x128xf32>, vector<128x128xf32>, vector<2x128xf32> -> vector<2x128xf32>
    %c0_11 = arith.constant 0 : index
    %c0_12 = arith.constant 0 : index
    %16 = vector.load %arg5[%c0_11, %c0_12] : memref<1x128xf32, #tpu.memory_space<vmem>>, vector<1x128xf32>
    %17 = vector.broadcast %16 : vector<1x128xf32> to vector<2x128xf32>
    %18 = arith.addf %15, %17 : vector<2x128xf32>
    %cst_13 = arith.constant 0.000000e+00 : f32
    %19 = vector.broadcast %cst_13 : f32 to vector<2x128xf32>
    %20 = arith.cmpf ogt, %18, %19 : vector<2x128xf32>
    %cst_14 = arith.constant 0.000000e+00 : f32
    %21 = vector.broadcast %cst_14 : f32 to vector<2x128xf32>
    %22 = arith.minimumf %18, %21 : vector<2x128xf32>
    %23 = math.exp %22 : vector<2x128xf32>
    %cst_15 = arith.constant 1.000000e+00 : f32
    %24 = vector.broadcast %cst_15 : f32 to vector<2x128xf32>
    %25 = arith.subf %23, %24 : vector<2x128xf32>
    %26 = arith.select %20, %18, %25 : vector<2x128xi1>, vector<2x128xf32>
    %27 = arith.truncf %26 : vector<2x128xf32> to vector<2x128xbf16>
    %c0_16 = arith.constant 0 : index
    %c0_17 = arith.constant 0 : index
    %28 = vector.load %arg6[%c0_16, %c0_17] : memref<128x576xbf16, #tpu.memory_space<vmem>>, vector<128x576xbf16>
    %cst_18 = arith.constant dense<0.000000e+00> : vector<2x576xf32>
    %29 = tpu.matmul %27, %28, %cst_18 {dimension_numbers = #tpu.dot_dimension_numbers<[1], [0], [0], [1], [0, 0, 1, 1], [], []>} : vector<2x128xbf16>, vector<128x576xbf16>, vector<2x576xf32> -> vector<2x576xf32>
    %c0_19 = arith.constant 0 : index
    %c0_20 = arith.constant 0 : index
    %30 = vector.load %arg7[%c0_19, %c0_20] : memref<1x576xf32, #tpu.memory_space<vmem>>, vector<1x576xf32>
    %31 = vector.broadcast %30 : vector<1x576xf32> to vector<2x576xf32>
    %32 = arith.addf %29, %31 : vector<2x576xf32>
    %cst_21 = arith.constant 0.000000e+00 : f32
    %33 = vector.broadcast %cst_21 : f32 to vector<2x576xf32>
    %34 = arith.cmpf ogt, %32, %33 : vector<2x576xf32>
    %cst_22 = arith.constant 0.000000e+00 : f32
    %35 = vector.broadcast %cst_22 : f32 to vector<2x576xf32>
    %36 = arith.minimumf %32, %35 : vector<2x576xf32>
    %37 = math.exp %36 : vector<2x576xf32>
    %cst_23 = arith.constant 1.000000e+00 : f32
    %38 = vector.broadcast %cst_23 : f32 to vector<2x576xf32>
    %39 = arith.subf %37, %38 : vector<2x576xf32>
    %40 = arith.select %34, %32, %39 : vector<2x576xi1>, vector<2x576xf32>
    %41 = arith.truncf %40 : vector<2x576xf32> to vector<2x576xbf16>
    %c0_24 = arith.constant 0 : index
    %c0_25 = arith.constant 0 : index
    %42 = vector.load %arg8[%c0_24, %c0_25] : memref<576x1664xbf16, #tpu.memory_space<vmem>>, vector<576x1664xbf16>
    %cst_26 = arith.constant dense<0.000000e+00> : vector<2x1664xf32>
    %43 = tpu.matmul %41, %42, %cst_26 {dimension_numbers = #tpu.dot_dimension_numbers<[1], [0], [0], [1], [0, 0, 1, 1], [], []>} : vector<2x576xbf16>, vector<576x1664xbf16>, vector<2x1664xf32> -> vector<2x1664xf32>
    %c0_27 = arith.constant 0 : index
    %c0_28 = arith.constant 0 : index
    %44 = vector.load %arg9[%c0_27, %c0_28] : memref<1x1664xf32, #tpu.memory_space<vmem>>, vector<1x1664xf32>
    %45 = vector.broadcast %44 : vector<1x1664xf32> to vector<2x1664xf32>
    %46 = arith.addf %43, %45 : vector<2x1664xf32>
    %c0_29 = arith.constant 0 : index
    %c0_30 = arith.constant 0 : index
    %47 = vector.load %arg10[%c0_29, %c0_30] : memref<2x1664xf32, #tpu.memory_space<vmem>>, vector<2x1664xf32>
    tpu.vector_store %arg10[%c0_29, %c0_30], %46 {strides = array<i32>} : memref<2x1664xf32, #tpu.memory_space<vmem>>, vector<2x1664xf32>,
    return
  }
  func.func @transform_0(%arg0: i32) -> (i32, i32) {
    %c0_i32 = arith.constant 0 : i32
    %c0_i32_0 = arith.constant 0 : i32
    %c0_i32_1 = arith.constant 0 : i32
    return %c0_i32, %c0_i32_0 : i32, i32
  }
  func.func @transform_1(%arg0: i32) -> (i32, i32) {
    %c0_i32 = arith.constant 0 : i32
    %c0_i32_0 = arith.constant 0 : i32
    %c0_i32_1 = arith.constant 0 : i32
    return %c0_i32, %c0_i32_0 : i32, i32
  }
  func.func @transform_2(%arg0: i32) -> (i32, i32) {
    %c0_i32 = arith.constant 0 : i32
    %c0_i32_0 = arith.constant 0 : i32
    %c0_i32_1 = arith.constant 0 : i32
    return %c0_i32, %c0_i32_0 : i32, i32
  }
  func.func @transform_3(%arg0: i32) -> (i32, i32) {
    %c0_i32 = arith.constant 0 : i32
    %c0_i32_0 = arith.constant 0 : i32
    %c0_i32_1 = arith.constant 0 : i32
    return %c0_i32, %c0_i32_0 : i32, i32
  }
  func.func @transform_4(%arg0: i32) -> (i32, i32) {
    %c0_i32 = arith.constant 0 : i32
    %c0_i32_0 = arith.constant 0 : i32
    %c0_i32_1 = arith.constant 0 : i32
    return %c0_i32, %c0_i32_0 : i32, i32
  }
  func.func @transform_5(%arg0: i32) -> (i32, i32) {
    %c0_i32 = arith.constant 0 : i32
    %c0_i32_0 = arith.constant 0 : i32
    %c0_i32_1 = arith.constant 0 : i32
    return %c0_i32, %c0_i32_0 : i32, i32
  }
  func.func @transform_6(%arg0: i32) -> (i32, i32) {
    %c0_i32 = arith.constant 0 : i32
    %c0_i32_0 = arith.constant 0 : i32
    %c0_i32_1 = arith.constant 0 : i32
    return %c0_i32, %c0_i32_0 : i32, i32
  }
  func.func @transform_7(%arg0: i32) -> (i32, i32) {
    %c0_i32 = arith.constant 0 : i32
    %c0_i32_0 = arith.constant 0 : i32
    return %c0_i32, %arg0 : i32, i32
  }
  func.func @transform_8(%arg0: i32) -> (i32, i32) {
    %c0_i32 = arith.constant 0 : i32
    %c0_i32_0 = arith.constant 0 : i32
    return %c0_i32, %arg0 : i32, i32
  }
  func.func @transform_9(%arg0: i32) -> (i32, i32) {
    %c0_i32 = arith.constant 0 : i32
    %c0_i32_0 = arith.constant 0 : i32
    return %c0_i32, %arg0 : i32, i32
  }
}

</mosaic_0001>

<bundles_post_ra>
// kernel: _decoder_forward.1
= control target key start
LH: loop header
LB: loop body
LE: loop exit
PB: predicated region body
PF: predicated region fallthrough
CT: control target
= control target key end

     0   :  { %s9775_s0 = inlined_call_operand.hbm [shape: f32[2,8], index: 0, kind: input, shape index: {}]   ;;  %s9776_s1 = inlined_call_operand.hbm [shape: f32[8,128], index: 1, kind: input, shape index: {}]   ;;  %s9777_s2 = inlined_call_operand.hbm [shape: f32[1,128], index: 2, kind: input, shape index: {}]   ;;  %s9778_s3 = inlined_call_operand.hbm [shape: f32[128,128], index: 3, kind: input, shape index: {}]   ;;  %s9779_s4 = inlined_call_operand.hbm [shape: f32[1,128], index: 4, kind: input, shape index: {}]   ;;  %s9780_s5 = inlined_call_operand.vmem [shape: bf16[128,576], index: 5, kind: input, shape index: {}]   ;;  %s9781_s6 = inlined_call_operand.hbm [shape: f32[1,576], index: 6, kind: input, shape index: {}]   ;;  %s9782_s7 = inlined_call_operand.hbm [shape: bf16[576,3136], index: 7, kind: input, shape index: {}]   ;;  %s9783_s8 = inlined_call_operand.hbm [shape: f32[1,3136], index: 8, kind: input, shape index: {}]   ;;  %s9784_s9 = inlined_call_operand.hbm [shape: f32[2,3136], index: 9, kind: output, shape index: {}]  }
   0x1   :  { %9791 = sst [smem:[#allocation26_spill]] %s9775_s0 }
   0x2   :  { %9792 = sst [smem:[#allocation27_spill]] %s9776_s1 }
   0x3   :  { %9793 = sst [smem:[#allocation28_spill]] %s9778_s3 }
   0x4   :  { %14 = vsyncpa [#allocation3], 0 }
   0x5   :  { %15 = vsyncpa [#allocation6], 0 }
   0x6   :  { %16 = vsyncpa [#allocation9], 0 }
   0x7   :  { %17 = vsyncpa [#allocation12], 0 }
   0x8   :  { %18 = vsyncpa [#allocation4], 0 }
   0x9   :  { %20 = vsyncpa [#allocation4 + $0x1], 0  ;;  %s8060_s30 = smov 0   ;;  %s8062_s10 = smov 0  }
   0xa   :  { %s8064_s11 = smov 0   ;;  %s8066_s12 = smov 0  }
   0xb LB: > { %9794 = sst [smem:[#allocation22_spill]] %s7983_s30  ;;  %s8081_s13 = sadd.s32 4294967295, %s7995_s12   ;;  %s7995_s12 = sphi %s8066_s12, %s9823_s12   ;;  %s7991_s11 = sphi %s8064_s11, %s9827_s11   ;;  %s7987_s10 = sphi %s8062_s10, %s9826_s10   ;;  %s7983_s30 = sphi %s8060_s30, %s9825_s30  }
   0xc   : > { %s4925_s14 = sadd.s32 4294967294, %s7995_s12   ;;  %s8085_s15 = sadd.s32 1, %s7995_s12  }
   0xd   : > { %9795 = sst [smem:[#allocation23_spill]] %s8085_s15  ;;  %s180_s16 = sadd.s32 1, %s7991_s11 }
   0xe   : > { %s177_s17 = ssub.s32 %s7995_s12, %s8085_s15  ;;  %p187_p0 = scmp.ne.s32.totalorder %s7991_s11, %s7987_s10 }
   0xf   : > { %p178_p1 = scmp.eq.s32.totalorder %s177_s17, 0  ;;  %p188_p2 = scmp.eq.s32.totalorder %s7995_s12, 0 }
  0x10   : > { %p193_p3 = scmp.ne.s32.totalorder %s7987_s10, %s7983_s30  ;;  %p9790_p4 = scmp.eq.s32.totalorder %s8081_s13, 0 }
  0x11   : > { %s8097_s18 = scalar_select %p178_p1, %s7991_s11, %s180_s16  }
  0x12   : > { %p8099_p5 = por %p188_p2, %p187_p0  ;;  %p8105_p6 = por %p9790_p4, %p193_p3 }
  0x13   : > { %9796 = sst [smem:[#allocation24_spill]] %s8097_s18  ;;  %p243_p7 = scmp.eq.s32.totalorder %s8081_s13, 1 }
  0x14   : > { %p249_p8 = scmp.eq.s32.totalorder %s4925_s14, 1  ;;  %p4926_p9 = scmp.ge.s32.totalorder %s7995_s12, 1 }
  0x15   : > { %p256_p10 = scmp.lt.s32.totalorder %s7995_s12, 3  ;;  %p8112_p11 = por %p243_p7, %p187_p0 }
  0x16   : > { %p8116_p12 = por %p249_p8, %p193_p3  ;;  %s9803_s1 = sld [smem:[#allocation27_spill]] }
  0x17   : > { %s9799_s21 = scalar_select %p8112_p11, 1, 0 }
  0x18   : > { %s9800_s22 = scalar_select %p8116_p12, 1, 0 }
  0x19   : > { %p8120_p13 = pnand %p4926_p9, %p256_p10  ;;  %s7997_s27 = smov [#allocation5]  }
  0x1a   : > { %9801 = sst [smem:[#allocation25_spill]] %s9800_s22  ;;  %s282_s28 = sshll.u32 %s7997_s27, 4  ;;  %s283_s28 = int_to_ptr.vmem [resolvable:$true] %s282_s28 }
  0x1b   : > { %p7549_p1 = pneg %p8120_p13  ;;  %s9804_s3 = sld [smem:[#allocation28_spill]] }
  0x1c   : > { %s280_s26 = sshll.u32 %s9803_s1, 4  ;;  %s7998_s24 = smov [#allocation8]   ;;  %s281_s26 = int_to_ptr.hbm [resolvable:$true] %s280_s26 }
  0x1d   : > { %p8134_p0 = pnand %p7549_p1, %p9790_p4  ;;  %s305_s25 = sshll.u32 %s7998_s24, 4  ;;  %s306_s25 = int_to_ptr.vmem [resolvable:$true] %s305_s25 }
  0x1e   : > { %s9806_s0 = sld [smem:[#allocation26_spill]]  ;;  %s7999_s14 = smov 128  }
  0x1f   : > { %7555 = dma.hbm_to_vmem [thread:$0]  (!%p8134_p0), %s281_s26, 128, %s283_s28, [#allocation6]  }
  0x20   : > { %s8001_s18 = smov [#allocation2]   ;;  %s292_s24 = sshll.u32 %s9777_s2, 4  ;;  %s293_s24 = int_to_ptr.hbm [resolvable:$true] %s292_s24 }
  0x21   : > { %s303_s16 = sshll.u32 %s9804_s3, 4  ;;  %s8000_s3 = smov 8   ;;  %s304_s16 = int_to_ptr.hbm [resolvable:$true] %s303_s16 }
  0x22   : > { %7561 = dma.hbm_to_vmem [thread:$0]  (!%p8134_p0), %s304_s16, 2048, %s306_s25, [#allocation9], %s7999_s14, %s7999_s14, %s8000_s3  }
  0x23   : > { %s270_s15 = sshll.u32 %s8001_s18, 4  ;;  %s318_s28 = sshll.u32 %s9779_s4, 4  ;;  %s271_s15 = int_to_ptr.vmem [resolvable:$true] %s270_s15  ;;  %s319_s28 = int_to_ptr.hbm [resolvable:$true] %s318_s28 }
  0x24   : > { %s268_s29 = sshll.u32 %s9806_s0, 4  ;;  %s8002_s27 = smov [#allocation7]   ;;  %s269_s29 = int_to_ptr.hbm [resolvable:$true] %s268_s29 }
  0x25   : > { %7552 = dma.hbm_to_vmem [thread:$0]  (!%p8134_p0), %s269_s29, 32, %s271_s15, [#allocation3]  }
  0x26   : > { %s294_s0 = sshll.u32 %s8002_s27, 4  ;;  %s8003_s3 = smov [#allocation10]   ;;  %s295_s0 = int_to_ptr.vmem [resolvable:$true] %s294_s0 }
  0x27   : > { %7558 = dma.hbm_to_vmem [thread:$0]  (!%p8134_p0), %s293_s24, 16, %s295_s0, [#allocation6]  }
  0x28   : > { %s320_s18 = sshll.u32 %s8003_s3, 4  ;;  %s333_s22 = sshll.u32 %s9781_s6, 4  ;;  %s321_s18 = int_to_ptr.vmem [resolvable:$true] %s320_s18  ;;  %s334_s22 = int_to_ptr.hbm [resolvable:$true] %s333_s22 }
  0x29   : > { %7564 = dma.hbm_to_vmem [thread:$0]  (!%p8134_p0), %s319_s28, 16, %s321_s18, [#allocation9]  }
  0x2a   : > { %s8004_s15 = smov [#allocation11]   ;;  %p9789_p2 = scmp.ge.s32.totalorder %s7995_s12, 2 }
  0x2b   : > { %s335_s25 = sshll.u32 %s8004_s15, 4  ;;  %s336_s25 = int_to_ptr.vmem [resolvable:$true] %s335_s25 }
  0x2c   : > { %7567 = dma.hbm_to_vmem [thread:$0]  (!%p8134_p0), %s334_s22, 80, %s336_s25, [#allocation12]  }
  0x2d   : > { %342 = sbr.rel (%p9789_p2) target bundleno = 128 (0x80), region = 44 }
  0x32   : > { %345 = sbr.rel (!%p8099_p5) target bundleno = 93 (0x5d), region = 48  ;;  %s346_s0 = sand.u32 (%p8099_p5), 1, %s7995_s12  }
  0x33   : > { %s348_s29 = sand.u32 (%p8099_p5), 1, %s7991_s11   ;;  %s351_s24 = smul.u32 (%p8099_p5), 13, %s7995_s12 }
  0x34   : > { %s7517_s14 = smul.u32 (%p8099_p5), 3744, %s348_s29  ;;  %s8173_s27 = scalar_lea.sflag (%p8099_p5), [#allocation3], %s346_s0 }
  0x35   : > { %s352_s26 = ssub.s32 (%p8099_p5), 25, %s351_s24 }
  0x36   : > { %p353_p3 = scmp.lt.s32.totalorder (%p8099_p5), %s352_s26, 13  ;;  %s350_s3 = scalar_lea.vmem (%p8099_p5), [#allocation13], %s7517_s14 }
  0x38   : > { %s9829_s26 = smov (!%p353_p3, %s352_s26), 13 }
  0x39   : > { %s355_s17 = smul.u32 288, %s9829_s26 }
  0x3b   : > { %s356_s1 = ssub.s32 3744, %s355_s17 }
  0x3c   : > { %s357_s28 = sshll.u32 %s356_s1, 4 }
  0x3d   : > { %358 = vsyncadd %s8173_s27, %s357_s28  ;;  %p8176_p7 = scmp.ne.s32.totalorder %s355_s17, 0  ;;  %s7007_s16 = smul.u32 52, %s7995_s12 }
  0x3e   : > { %s8182_s22 = sshll.u32 %s350_s3, 4  ;;  %s8189_s14 = smul.u32 4608, %s9829_s26  ;;  %s367_s22 = int_to_ptr.vmem [resolvable:$true] %s8182_s22 }
  0x3f   : > { %s361_s0 = scalar_lea.hbm %s9782_s7, %s7007_s16  ;;  %s7835_s25 = scalar_lea.hbm %s9782_s7, 7200 }
  0x40   : > { %s364_s29 = sshll.u32 %s361_s0, 4  ;;  %s7826_s17 = sshrl.u32 %s8189_s14, 4  ;;  %s8191_s29 = int_to_ptr.hbm [resolvable:$true] %s364_s29 }
  0x41   : > { %s7824_s24 = sshra.s32 %s8191_s29, 4  ;;  %s7862_s1 = sshll.u32 %s7826_s17, 4  ;;  %s7825_s24 = int_to_ptr.hbm [resolvable:$true] %s7824_s24 }
  0x42   : > { %p7828_p8 = scmp.ne.s32.totalorder %s7862_s1, %s8189_s14  ;;  %s7829_s28 = sadd.s32 1, %s7826_s17 }
  0x43   : > { %p7836_p0 = scmp.lt.s32.totalorder %s7825_s24, %s9782_s7 }
  0x44   : > { %s9831_s28 = smov (!%p7828_p8, %s7829_s28), %s7826_s17 }
  0x45   : > { %s7831_s3 = scalar_lea.hbm %s7825_s24, %s9831_s28 }
  0x46   : > { %p7832_p9 = scmp.ne.s32.totalorder %s7825_s24, %s7831_s3  ;;  %p7837_p3 = scmp.lt.s32.totalorder %s7835_s25, %s7831_s3 }
  0x48   : > { %p7833_p10 = pnand %p7832_p9, %p8176_p7  ;;  %p7838_p2 = por %p7837_p3, %p7836_p0 }
  0x4a   : > { %p7834_p1 = pneg %p7833_p10 }
  0x4c   : > { %p7839_p4 = pnand %p7838_p2, %p7834_p1 }
  0x4e   : > { %7842 = shalt.err (!%p7839_p4)
}
  0x4f   : > { %s7843_s17 = sshra.s32 %s367_s22, 4  ;;  %s8005_s16 = smov [#allocation13]   ;;  %s7844_s17 = int_to_ptr.vmem [resolvable:$true] %s7843_s17 }
  0x50   : > { %s7850_s1 = scalar_lea.vmem %s7844_s17, %s9831_s28  ;;  %s7854_s15 = scalar_lea.vmem %s8005_s16, 7488 }
  0x51   : > { %p7851_p8 = scmp.ne.s32.totalorder %s7844_s17, %s7850_s1  ;;  %p7856_p12 = scmp.lt.s32.totalorder %s7854_s15, %s7850_s1 }
  0x53   : > { %p7852_p9 = pnand %p7851_p8, %p8176_p7 }
  0x55   : > { %p7853_p10 = pneg %p7852_p9 }
  0x57   : > { %p7858_p11 = pnand %p7856_p12, %p7853_p10 }
  0x59   : > { %7861 = shalt.err (!%p7858_p11)
}
  0x5a   : > { %s8006_s30 = smov 1600   ;;  %s8007_s24 = smov 832  }
  0x5b   : > { %s9808_s3 = sshll.u32 %s9829_s26, 2 }
  0x5c   : > { %372 = dma.hbm_to_vmem [thread:$0]  (%p8176_p7), %s8191_s29, %s8189_s14, %s367_s22, %s8173_s27, %s8006_s30, %s8007_s24, %s9808_s3  }
  0x5d PF: > { %375 = sbr.rel (!%p8099_p5) target bundleno = 128 (0x80), region = 52  ;;  %s376_s28 = sand.u32 (%p8099_p5), 1, %s7995_s12  }
  0x5e   : > { %s378_s25 = sand.u32 (%p8099_p5), 1, %s7991_s11   ;;  %s381_s17 = smul.u32 (%p8099_p5), 13, %s7995_s12 }
  0x5f   : > { %s7518_s0 = smul.u32 (%p8099_p5), 13, %s378_s25  ;;  %s8225_s16 = scalar_lea.sflag (%p8099_p5), [#allocation3], %s376_s28 }
  0x60   : > { %s382_s1 = ssub.s32 (%p8099_p5), 25, %s381_s17 }
  0x61   : > { %p383_p4 = scmp.lt.s32.totalorder (%p8099_p5), %s382_s1, 13  ;;  %s380_s27 = scalar_lea.vmem (%p8099_p5), [#allocation14], %s7518_s0 }
  0x63   : > { %s9833_s1 = smov (!%p383_p4, %s382_s1), 13 }
  0x64   : > { %s385_s18 = ssub.s32 13, %s9833_s1 }
  0x65   : > { %s386_s26 = sshll.u32 %s385_s18, 4 }
  0x66   : > { %387 = vsyncadd %s8225_s16, %s386_s26  ;;  %p4939_p5 = scmp.ne.s32.totalorder %s9833_s1, 0  ;;  %s389_s29 = scalar_lea.hbm %s9783_s8, %s381_s17 }
  0x67   : > { %s390_s14 = sshll.u32 %s9833_s1, 4  ;;  %s391_s15 = sshll.u32 %s389_s29, 4  ;;  %s8233_s15 = int_to_ptr.hbm [resolvable:$true] %s391_s15 }
  0x68   : > { %s8235_s30 = sshll.u32 %s380_s27, 4  ;;  %s7863_s24 = sshra.s32 %s8233_s15, 4  ;;  %s394_s30 = int_to_ptr.vmem [resolvable:$true] %s8235_s30  ;;  %s7864_s24 = int_to_ptr.hbm [resolvable:$true] %s7863_s24 }
  0x69   : > { %s7865_s3 = sshrl.u32 %s390_s14, 4  ;;  %s7874_s17 = scalar_lea.hbm %s9783_s8, 25 }
  0x6a   : > { %s7870_s28 = scalar_lea.hbm %s7864_s24, %s7865_s3  ;;  %p7875_p7 = scmp.lt.s32.totalorder %s7864_s24, %s9783_s8 }
  0x6b   : > { %p7871_p11 = scmp.ne.s32.totalorder %s7864_s24, %s7870_s28  ;;  %p7876_p1 = scmp.lt.s32.totalorder %s7874_s17, %s7870_s28 }
  0x6d   : > { %p7872_p12 = pnand %p7871_p11, %p4939_p5  ;;  %p7877_p0 = por %p7876_p1, %p7875_p7 }
  0x6f   : > { %p7873_p2 = pneg %p7872_p12 }
  0x71   : > { %p7878_p3 = pnand %p7877_p0, %p7873_p2 }
  0x73   : > { %7881 = shalt.err (!%p7878_p3)
}
  0x74   : > { %s7882_s27 = sshra.s32 %s394_s30, 4  ;;  %s8008_s22 = smov [#allocation14]   ;;  %s7883_s27 = int_to_ptr.vmem [resolvable:$true] %s7882_s27 }
  0x75   : > { %s7889_s19 = scalar_lea.vmem %s7883_s27, %s7865_s3  ;;  %s7893_s29 = scalar_lea.vmem %s8008_s22, 26 }
  0x76   : > { %p7890_p8 = scmp.ne.s32.totalorder %s7883_s27, %s7889_s19  ;;  %p7895_p4 = scmp.lt.s32.totalorder %s7893_s29, %s7889_s19 }
  0x78   : > { %p7891_p9 = pnand %p7890_p8, %p4939_p5 }
  0x7a   : > { %p7892_p10 = pneg %p7891_p9 }
  0x7c   : > { %p7897_p11 = pnand %p7895_p4, %p7892_p10 }
  0x7e   : > { %7900 = shalt.err (!%p7897_p11)
}
  0x7f   : > { %396 = dma.hbm_to_vmem [thread:$0]  (%p4939_p5), %s8233_s15, %s390_s14, %s394_s30, %s8225_s16  }
  0x80 PF: > { %402 = sbr.rel (%p8120_p13) target bundleno = 1190 (0x4a6), region = 56  ;;  %p9809_p12 = scmp.eq.s32.totalorder (!%p8120_p13), %s8081_s13, 0 }
  0x85   : > { %7958 = dma.done.wait (%p9809_p12), [#allocation3], 32   ;;  %p9810_p2 = pmov %p9809_p12 }
  0x87   : > { %7960 = vsyncadd (%p9810_p2), [#allocation3], 4294967264  ;;  %p9811_p7 = pmov %p9810_p2 }
  0x88   : > { %p9812_p1 = pmov %p9810_p2 }
  0x89   : > { %7962 = dma.done.wait (%p9811_p7), [#allocation6], 144  }
  0x8a   : > { %7964 = vsyncadd (%p9812_p1), [#allocation6], 4294967152  ;;  %p9813_p0 = pmov %p9812_p1 }
  0x8c   : > { %7966 = dma.done.wait (%p9813_p0), [#allocation9], 2064   ;;  %p9814_p5 = pmov %p9813_p0 }
  0x8d   : > { %p9815_p13 = pmov %p9813_p0 }
  0x8e   : > { %7968 = vsyncadd (%p9814_p5), [#allocation9], 4294965232 }
  0x8f   : > { %7970 = dma.done.wait (%p9815_p13), [#allocation12], 80   ;;  %p9816_p3 = pmov %p9813_p0 }
  0x90   : > { %s434_s23 = sand.u32 1, %s8081_s13   ;;  %s8277_s1 = sand.u32 1, %s7987_s10  }
  0x91   : > { %7972 = vsyncadd (%p9816_p3), [#allocation12], 4294967216  ;;  %s7519_s16 = smul.u32 3744, %s8277_s1  ;;  %s435_s14 = scalar_lea.sflag [#allocation3], %s434_s23 }
  0x93   : > { %s8280_s15 = scalar_lea.vmem [#allocation13], %s7519_s16 }
  0x94   : > { %7974 = dma.done.wait (%p8105_p6), %s435_s14, 60112  }
  0x95   : > { %7976 = vsyncadd (%p8105_p6), %s435_s14, 4294907184  ;;  %vm510_vm0 = vcmask 64512   ;;  %v505_v0 = vld [vmem:[#allocation5] sm:$0xff]  ;;  %v504_v1 = vld [vmem:[#allocation2] sm:$0x3]  ;;  %vm3865_vm8 = vcmask 523264  }
  0x96   : > { %v555_v2 = vld [vmem:[#allocation8 + $0x78] sm:$0xff]  ;;  %529 = vmatpush.msra.mxu0 %v505_v0  ;;  %v554_v3 = vld [vmem:[#allocation8 + $0x70] sm:$0xff]  ;;  %v553_v4 = vld [vmem:[#allocation8 + $0x68] sm:$0xff]  ;;  %s7520_s17 = smul.u32 13, %s8277_s1  ;;  %vm4735_vm9 = vcmask 1041408   ;;  %vm4737_vm10 = vcmask 1045508  }
  0x97   : > { %560 = vmatpush.msra.mxu1 %v555_v2  ;;  %4947 = vmatmul.msk.f32.vlgmr.msra.gmra.mxu0 %vm510_vm0, %v504_v1  ;;  %v552_v5 = vld [vmem:[#allocation8 + $0x60] sm:$0xff]  ;;  %v551_v6 = vld [vmem:[#allocation8 + $0x58] sm:$0xff]  ;;  %v550_v7 = vld [vmem:[#allocation8 + $0x50] sm:$0xff]  ;;  %s7521_s26 = smul.u32 26, %s8277_s1  ;;  %vm4739_vm11 = vcmask 1043456   ;;  %p9817_p6 = scmp.ne.s32.totalorder %s9799_s21, 0 }
  0x98   : > { %v549_v8 = vld [vmem:[#allocation8 + $0x48] sm:$0xff]  ;;  %v548_v9 = vld [vmem:[#allocation8 + $0x40] sm:$0xff]  ;;  %v547_v10 = vld [vmem:[#allocation8 + $0x38] sm:$0xff]  ;;  %s9006_s18 = scalar_lea.vmem [#allocation14], %s7520_s17  ;;  %s4762_s19 = smul.u32 (%p9817_p6), 13, %s8081_s13 }
  0x99   : > { %561 = vmatpush.msra.mxu1 %v554_v3  ;;  %v546_v11 = vld [vmem:[#allocation8 + $0x30] sm:$0xff]  ;;  %v545_v12 = vld [vmem:[#allocation8 + $0x28] sm:$0xff]  ;;  %v544_v13 = vld [vmem:[#allocation8 + $0x20] sm:$0xff]  ;;  %s9353_s27 = scalar_lea.vmem [#allocation15], %s7521_s26 }
  0x9a   : > { %v543_v14 = vld [vmem:[#allocation8 + $0x18] sm:$0xff]  ;;  %v542_v15 = vld [vmem:[#allocation8 + $0x10] sm:$0xff]  ;;  %v541_v16 = vld [vmem:[#allocation8 + $0x8] sm:$0xff]  ;;  %s4763_s22 = ssub.s32 (%p9817_p6), 25, %s4762_s19 }
  0x9b   : > { %562 = vmatpush.msra.mxu1 %v553_v4  ;;  %v540_v17 = vld [vmem:[#allocation8] sm:$0xff]  ;;  %v5092_v18 = vld [vmem:[%s9780_s5 + $0x118] sm:$0xf]  ;;  %v7040_v22 = vld [vmem:[%s9780_s5 + $0x100] sm:$0xf0]  ;;  %p4764_p8 = scmp.lt.s32.totalorder (%p9817_p6), %s4763_s22, 13 }
  0x9c   : > { %v7045_v19 = vld [vmem:[%s9780_s5 + $0x128] sm:$0xf0]  ;;  %v5072_v20 = vld [vmem:[%s9780_s5 + $0xf0] sm:$0xf]  ;;  %v5052_v23 = vld [vmem:[%s9780_s5 + $0xc8] sm:$0xf] }
  0x9d   : > { %563 = vmatpush.msra.mxu1 %v552_v5  ;;  %v5093_v21 = vor.u32 %v7045_v19, %v5092_v18  ;;  %v7043_v24 = vld [vmem:[%s9780_s5 + $0x11c] sm:$0xf]  ;;  %v5073_v25 = vor.u32 %v7040_v22, %v5072_v20  ;;  %v5094_v26 = vld [vmem:[%s9780_s5 + $0x12c] sm:$0xf0]  ;;  %v5100_v27 = vld [vmem:[%s9780_s5 + $0x120] sm:$0xf] }
  0x9e   : > { %v7046_v28 = vld [vmem:[%s9780_s5 + $0x130] sm:$0xf0]  ;;  %v7035_v29 = vld [vmem:[%s9780_s5 + $0xd8] sm:$0xf0]  ;;  %v5097_v30 = vor.u32 %v7043_v24, %v5094_v26  ;;  %v7044_v32 = vld [vmem:[%s9780_s5 + $0x124] sm:$0xf] }
  0x9f   : > { %564 = vmatpush.msra.mxu1 %v551_v6  ;;  %855 = vmatpush.bf16.msra.mxu2 %v5093_v21  ;;  %v5101_v31 = vor.u32 %v7046_v28, %v5100_v27  ;;  %v5102_v33 = vld [vmem:[%s9780_s5 + $0x134] sm:$0xf0]  ;;  %v7038_v35 = vld [vmem:[%s9780_s5 + $0xf4] sm:$0xf]  ;;  %v5074_v36 = vld [vmem:[%s9780_s5 + $0x104] sm:$0xf0]  ;;  %v5053_v41 = vor.u32 %v7035_v29, %v5052_v23 }
  0xa0   : > { %v5105_v34 = vor.u32 %v7044_v32, %v5102_v33  ;;  %868 = vmatpush.bf16.msra.mxu3 %v5097_v30  ;;  %v5077_v37 = vor.u32 %v7038_v35, %v5074_v36  ;;  %v5080_v38 = vld [vmem:[%s9780_s5 + $0xf8] sm:$0xf]  ;;  %v7041_v39 = vld [vmem:[%s9780_s5 + $0x108] sm:$0xf0]  ;;  %v7039_v40 = vld [vmem:[%s9780_s5 + $0xfc] sm:$0xf] }
  0xa1   : > { %565 = vmatpush.msra.mxu1 %v550_v7  ;;  %881 = vmatpush.bf16.msrb.mxu0 %v5101_v31  ;;  %v5032_v42 = vld [vmem:[%s9780_s5 + $0xa0] sm:$0xf]  ;;  %v7030_v43 = vld [vmem:[%s9780_s5 + $0xb0] sm:$0xf0]  ;;  %v5081_v44 = vor.u32 %v7041_v39, %v5080_v38  ;;  %v5082_v45 = vld [vmem:[%s9780_s5 + $0x10c] sm:$0xf0] }
  0xa2   : > { %v5085_v46 = vor.u32 %v7039_v40, %v5082_v45  ;;  %v7033_v47 = vld [vmem:[%s9780_s5 + $0xcc] sm:$0xf]  ;;  %v5054_v48 = vld [vmem:[%s9780_s5 + $0xdc] sm:$0xf0]  ;;  %v5060_v49 = vld [vmem:[%s9780_s5 + $0xd0] sm:$0xf]  ;;  %v5033_v55 = vor.u32 %v7030_v43, %v5032_v42 }
  0xa3   : > { %566 = vmatpush.msra.mxu1 %v549_v8  ;;  %856 = vmatpush.bf16.msra.mxu2 %v5073_v25  ;;  %v7036_v50 = vld [vmem:[%s9780_s5 + $0xe0] sm:$0xf0]  ;;  %v7034_v51 = vld [vmem:[%s9780_s5 + $0xd4] sm:$0xf]  ;;  %v5062_v52 = vld [vmem:[%s9780_s5 + $0xe4] sm:$0xf0]  ;;  %v5057_v53 = vor.u32 %v7033_v47, %v5054_v48 }
  0xa4   : > { %869 = vmatpush.bf16.msra.mxu3 %v5077_v37  ;;  %v5061_v54 = vor.u32 %v7036_v50, %v5060_v49  ;;  %v5065_v56 = vor.u32 %v7034_v51, %v5062_v52  ;;  %v7627_v57 = vld [vmem:[#allocation7] ss:$0 sm:$0xff]  ;;  %v5012_v58 = vld [vmem:[%s9780_s5 + $0x78] sm:$0xf]  ;;  %v7025_v59 = vld [vmem:[%s9780_s5 + $0x88] sm:$0xf0] }
  0xa5   : > { %567 = vmatpush.msra.mxu1 %v548_v9  ;;  %882 = vmatpush.bf16.msrb.mxu0 %v5081_v44  ;;  %v5013_v61 = vor.u32 %v7025_v59, %v5012_v58  ;;  %v4992_v63 = vld [vmem:[%s9780_s5 + $0x50] sm:$0xf]  ;;  %v7020_v0 = vld [vmem:[%s9780_s5 + $0x60] sm:$0xf0]  ;;  %v4972_v4 = vld [vmem:[%s9780_s5 + $0x28] sm:$0xf] }
  0xa6   : > { %v4993_v2 = vor.u32 %v7020_v0, %v4992_v63  ;;  %v7015_v5 = vld [vmem:[%s9780_s5 + $0x38] sm:$0xf0]  ;;  %v4952_v19 = vld [vmem:[%s9780_s5] sm:$0xf]  ;;  %v7010_v20 = vld [vmem:[%s9780_s5 + $0x10] sm:$0xf0] }
  0xa7   : > { %568 = vmatpush.msra.mxu1 %v547_v10  ;;  %857 = vmatpush.bf16.msra.mxu2 %v5053_v41  ;;  %v4973_v6 = vor.u32 %v7015_v5, %v4972_v4  ;;  %v7028_v10 = vld [vmem:[%s9780_s5 + $0xa4] sm:$0xf]  ;;  %v4953_v21 = vor.u32 %v7010_v20, %v4952_v19  ;;  %v7023_v22 = vld [vmem:[%s9780_s5 + $0x7c] sm:$0xf]  ;;  %v5014_v23 = vld [vmem:[%s9780_s5 + $0x8c] sm:$0xf0] }
  0xa8   : > { %870 = vmatpush.bf16.msra.mxu3 %v5057_v53  ;;  %v5020_v24 = vld [vmem:[%s9780_s5 + $0x80] sm:$0xf]  ;;  %v5017_v25 = vor.u32 %v7023_v22, %v5014_v23  ;;  %v7026_v26 = vld [vmem:[%s9780_s5 + $0x90] sm:$0xf0]  ;;  %v7024_v27 = vld [vmem:[%s9780_s5 + $0x84] sm:$0xf] }
  0xa9   : > { %569 = vmatpush.msra.mxu1 %v546_v11  ;;  %883 = vmatpush.bf16.msrb.mxu0 %v5061_v54  ;;  %v5034_v11 = vld [vmem:[%s9780_s5 + $0xb4] sm:$0xf0]  ;;  %v5021_v29 = vor.u32 %v7026_v26, %v5020_v24  ;;  %v5108_v31 = vld [vmem:[%s9780_s5 + $0x128] sm:$0xf]  ;;  %v7047_v32 = vld [vmem:[%s9780_s5 + $0x138] sm:$0xf0] }
  0xaa   : > { %v5022_v28 = vld [vmem:[%s9780_s5 + $0x94] sm:$0xf0]  ;;  %v5109_v33 = vor.u32 %v7047_v32, %v5108_v31  ;;  %v4994_v35 = vld [vmem:[%s9780_s5 + $0x64] sm:$0xf0]  ;;  %v7021_v38 = vld [vmem:[%s9780_s5 + $0x68] sm:$0xf0] }
  0xab   : > { %570 = vmatpush.msra.mxu1 %v545_v12  ;;  %858 = vmatpush.bf16.msra.mxu2 %v5033_v55  ;;  %v5040_v12 = vld [vmem:[%s9780_s5 + $0xa8] sm:$0xf]  ;;  %v5025_v30 = vor.u32 %v7024_v27, %v5022_v28  ;;  %v5000_v36 = vld [vmem:[%s9780_s5 + $0x58] sm:$0xf]  ;;  %v7019_v39 = vld [vmem:[%s9780_s5 + $0x5c] sm:$0xf] }
  0xac   : > { %v5002_v40 = vld [vmem:[%s9780_s5 + $0x6c] sm:$0xf0]  ;;  %v5001_v41 = vor.u32 %v7021_v38, %v5000_v36  ;;  %v5088_v43 = vld [vmem:[%s9780_s5 + $0x100] sm:$0xf]  ;;  %v7042_v44 = vld [vmem:[%s9780_s5 + $0x110] sm:$0xf0] }
  0xad   : > { %571 = vmatpush.msra.mxu1 %v544_v13  ;;  %v5037_v13 = vor.u32 %v7028_v10, %v5034_v11  ;;  %v5005_v42 = vor.u32 %v7019_v39, %v5002_v40  ;;  %v5089_v45 = vor.u32 %v7042_v44, %v5088_v43  ;;  %v4974_v47 = vld [vmem:[%s9780_s5 + $0x3c] sm:$0xf0]  ;;  %v4980_v48 = vld [vmem:[%s9780_s5 + $0x30] sm:$0xf]  ;;  %v7016_v50 = vld [vmem:[%s9780_s5 + $0x40] sm:$0xf0] }
  0xae   : > { %v7014_v51 = vld [vmem:[%s9780_s5 + $0x34] sm:$0xf]  ;;  %v4982_v52 = vld [vmem:[%s9780_s5 + $0x44] sm:$0xf0]  ;;  %v4981_v53 = vor.u32 %v7016_v50, %v4980_v48  ;;  %v5068_v55 = vld [vmem:[%s9780_s5 + $0xd8] sm:$0xf] }
  0xaf   : > { %572 = vmatpush.msra.mxu1 %v543_v14  ;;  %859 = vmatpush.bf16.msra.mxu2 %v5013_v61  ;;  %v7031_v14 = vld [vmem:[%s9780_s5 + $0xb8] sm:$0xf0]  ;;  %v4985_v54 = vor.u32 %v7014_v51, %v4982_v52  ;;  %v7008_v58 = vld [vmem:[%s9780_s5 + $0x4] sm:$0xf]  ;;  %v4954_v59 = vld [vmem:[%s9780_s5 + $0x14] sm:$0xf0] }
  0xb0   : > { %871 = vmatpush.bf16.msra.mxu3 %v5037_v13  ;;  %v4957_v61 = vor.u32 %v7008_v58, %v4954_v59  ;;  %v7009_v63 = vld [vmem:[%s9780_s5 + $0xc] sm:$0xf]  ;;  %v4962_v0 = vld [vmem:[%s9780_s5 + $0x1c] sm:$0xf0]  ;;  %v7032_v4 = vld [vmem:[%s9780_s5 + $0xc0] sm:$0xf0] }
  0xb1   : > { %573 = vmatpush.msra.mxu1 %v542_v15  ;;  %v7029_v15 = vld [vmem:[%s9780_s5 + $0xac] sm:$0xf]  ;;  %v7022_v10 = vld [vmem:[%s9780_s5 + $0x70] sm:$0xf0]  ;;  %v7353_v23 = vld [vmem:[%s8280_s15 + $0x988] sm:$0xf0] }
  0xb2   : > { %v7017_v13 = vld [vmem:[%s9780_s5 + $0x48] sm:$0xf0]  ;;  %v7340_v27 = vld [vmem:[%s8280_s15 + $0x920] sm:$0xf0]  ;;  %v7249_v32 = vld [vmem:[%s8280_s15 + $0x648] sm:$0xf0] }
  0xb3   : > { %574 = vmatpush.msra.mxu1 %v541_v16  ;;  %860 = vmatpush.bf16.msra.mxu2 %v4993_v2  ;;  %v5042_v16 = vld [vmem:[%s9780_s5 + $0xbc] sm:$0xf0]  ;;  %v4965_v2 = vor.u32 %v7009_v63, %v4962_v0  ;;  %v6313_v22 = vld [vmem:[%s8280_s15 + $0x958] sm:$0xf]  ;;  %v7236_v36 = vld [vmem:[%s8280_s15 + $0x5e0] sm:$0xf0] }
  0xb4   : > { %v5045_v18 = vor.u32 %v7029_v15, %v5042_v16  ;;  %872 = vmatpush.bf16.msra.mxu3 %v5017_v25  ;;  %v4968_v15 = vld [vmem:[%s9780_s5 + $0x10] sm:$0xf]  ;;  %v7012_v16 = vld [vmem:[%s9780_s5 + $0x20] sm:$0xf0]  ;;  %v6314_v24 = vor.u32 %v7353_v23, %v6313_v22  ;;  %v5897_v31 = vld [vmem:[%s8280_s15 + $0x618] sm:$0xf] }
  0xb5   : > { %575 = vmatpush.msra.mxu1 %v540_v17  ;;  %v5041_v17 = vor.u32 %v7031_v14, %v5040_v12  ;;  %v4988_v12 = vld [vmem:[%s9780_s5 + $0x38] sm:$0xf]  ;;  %v6261_v25 = vld [vmem:[%s8280_s15 + $0x8f0] sm:$0xf]  ;;  %v7314_v38 = vld [vmem:[%s8280_s15 + $0x850] sm:$0xf0] }
  0xb6   : > { %v4989_v14 = vor.u32 %v7017_v13, %v4988_v12  ;;  %v6262_v28 = vor.u32 %v7340_v27, %v6261_v25  ;;  %v5793_v43 = vld [vmem:[%s8280_s15 + $0x548] sm:$0xf]  ;;  %v6105_v48 = vld [vmem:[%s8280_s15 + $0x7b8] sm:$0xf]  ;;  %v7145_v50 = vld [vmem:[%s8280_s15 + $0x308] sm:$0xf0] }
  0xb7   : > { %894 = vmatpush.bf16.msrb.mxu1 %v5105_v34  ;;  %861 = vmatpush.bf16.msra.mxu2 %v4973_v6  ;;  %v7018_v34 = vld [vmem:[%s9780_s5 + $0x54] sm:$0xf]  ;;  %v5028_v6 = vld [vmem:[%s9780_s5 + $0x88] sm:$0xf]  ;;  %v7132_v58 = vld [vmem:[%s8280_s15 + $0x2a0] sm:$0xf0] }
  0xb8   : > { %884 = vmatpush.bf16.msrb.mxu0 %v5041_v17  ;;  %v4997_v37 = vor.u32 %v7018_v34, %v4994_v35  ;;  %v7628_v17 = vld [vmem:[#allocation10] ss:$0 sm:$0xff]  ;;  %v5845_v34 = vld [vmem:[%s8280_s15 + $0x5b0] sm:$0xf]  ;;  %v7444_v59 = vld [vmem:[%s8280_s15 + $0xc60] sm:$0xf0] }
  0xb9   : > { %v5846_v39 = vor.u32 %v7236_v36, %v5845_v34  ;;  %v6053_v0 = vld [vmem:[%s8280_s15 + $0x750] sm:$0xf]  ;;  %v6001_v12 = vld [vmem:[%s8280_s15 + $0x6e8] sm:$0xf]  ;;  %v7275_v13 = vld [vmem:[%s8280_s15 + $0x718] sm:$0xf0] }
  0xba   : > { %873 = vmatpush.bf16.msra.mxu3 %v4997_v37  ;;  %v6157_v37 = vld [vmem:[%s8280_s15 + $0x820] sm:$0xf]  ;;  %v5637_v22 = vld [vmem:[%s8280_s15 + $0x410] sm:$0xf]  ;;  %v7184_v23 = vld [vmem:[%s8280_s15 + $0x440] sm:$0xf0] }
  0xbb   : > { %895 = vmatpush.bf16.msrb.mxu1 %v5085_v46  ;;  %862 = vmatpush.bf16.msra.mxu2 %v4953_v21  ;;  %v7013_v46 = vld [vmem:[%s9780_s5 + $0x2c] sm:$0xf]  ;;  %v7262_v25 = vld [vmem:[%s8280_s15 + $0x6b0] sm:$0xf0]  ;;  %v7093_v27 = vld [vmem:[%s8280_s15 + $0x168] sm:$0xf0] }
  0xbc   : > { %885 = vmatpush.bf16.msrb.mxu0 %v5021_v29  ;;  %v4977_v49 = vor.u32 %v7013_v46, %v4974_v47  ;;  %v6209_v29 = vld [vmem:[%s8280_s15 + $0x888] sm:$0xf]  ;;  %v7223_v46 = vld [vmem:[%s8280_s15 + $0x578] sm:$0xf0]  ;;  %v5481_v47 = vld [vmem:[%s8280_s15 + $0x2d8] sm:$0xf] }
  0xbd   : > { %v5482_v52 = vor.u32 %v7145_v50, %v5481_v47  ;;  %v7171_v36 = vld [vmem:[%s8280_s15 + $0x3d8] sm:$0xf0]  ;;  %v7321_v50 = vld [vmem:[%s8280_s15 + $0x88c] sm:$0xf] }
  0xbe   : > { %874 = vmatpush.bf16.msra.mxu3 %v4977_v49  ;;  %v7301_v49 = vld [vmem:[%s8280_s15 + $0x7e8] sm:$0xf0] }
  0xbf   : > { %896 = vmatpush.bf16.msrb.mxu1 %v5065_v56  ;;  %907 = vmatpush.bf16.msrb.mxu2 %v5109_v33  ;;  %v7037_v56 = vld [vmem:[%s9780_s5 + $0xe8] sm:$0xf0]  ;;  %v5898_v33 = vor.u32 %v7249_v32, %v5897_v31  ;;  %v5638_v32 = vor.u32 %v7184_v23, %v5637_v22  ;;  %v6523_v23 = vld [vmem:[%s8280_s15 + $0xb2c] sm:$0xf0] }
  0xc0   : > { %886 = vmatpush.bf16.msrb.mxu0 %v5001_v41  ;;  %v6729_v41 = vld [vmem:[%s8280_s15 + $0xc98] sm:$0xf] }
  0xc1   : > { %v6521_v31 = vld [vmem:[%s8280_s15 + $0xaf8] sm:$0xf] }
  0xc2   : > { %875 = vmatpush.bf16.msra.mxu3 %v4957_v61  ;;  %v5741_v61 = vld [vmem:[%s8280_s15 + $0x4e0] sm:$0xf] }
  0xc3   : > { %897 = vmatpush.bf16.msrb.mxu1 %v5045_v18  ;;  %908 = vmatpush.bf16.msrb.mxu2 %v5089_v45  ;;  %v4969_v18 = vor.u32 %v7012_v16, %v4968_v15  ;;  %v6158_v45 = vor.u32 %v7314_v38, %v6157_v37  ;;  %v7106_v15 = vld [vmem:[%s8280_s15 + $0x1d0] sm:$0xf0] }
  0xc4   : > { %887 = vmatpush.bf16.msrb.mxu0 %v4981_v53 }
  0xc6   : > { %3869 = vmatpush.bf16.msrb.mxu3 %v5482_v52 }
  0xc7   : > { %898 = vmatpush.bf16.msrb.mxu1 %v5025_v30  ;;  %v7327_v30 = vld [vmem:[%s8280_s15 + $0x8b8] sm:$0xf0] }
  0xc8   : > { %v6210_v35 = vor.u32 %v7327_v30, %v6209_v29  ;;  %v6315_v29 = vld [vmem:[%s8280_s15 + $0x98c] sm:$0xf0] }
  0xcb   : > { %899 = vmatpush.bf16.msrb.mxu1 %v5005_v42  ;;  %v7457_v42 = vld [vmem:[%s8280_s15 + $0xcc8] sm:$0xf0] }
  0xcf   : > { %900 = vmatpush.bf16.msrb.mxu1 %v4985_v54  ;;  %v6730_v54 = vor.u32 %v7457_v42, %v6729_v41  ;;  %v6469_v42 = vld [vmem:[%s8280_s15 + $0xa90] sm:$0xf] }
  0xd3   : > { %901 = vmatpush.bf16.msrb.mxu1 %v4965_v2 }
 0x114   : > { %v531_v60 = vpop.f32.mrf.mxu0 }
 0x115   : > { %v532_v62 = vadd.f32 %v7627_v57, %v531_v60  ;;  %v5069_v57 = vor.u32 %v7037_v56, %v5068_v55  ;;  %v4960_v60 = vld [vmem:[%s9780_s5 + $0x8] sm:$0xf]  ;;  %v6677_v55 = vld [vmem:[%s8280_s15 + $0xc30] sm:$0xf]  ;;  %v5794_v56 = vor.u32 %v7223_v46, %v5793_v43 }
 0x116   : > { %v6678_v2 = vor.u32 %v7444_v59, %v6677_v55  ;;  %v7158_v46 = vld [vmem:[%s8280_s15 + $0x370] sm:$0xf0]  ;;  %v6417_v55 = vld [vmem:[%s8280_s15 + $0xa28] sm:$0xf]  ;;  %v6365_v59 = vld [vmem:[%s8280_s15 + $0x9c0] sm:$0xf] }
 0x117   : > { %v535_v1 = vmin.f32 %v532_v62, 0.0  ;;  %vm534_vm1 = vcmp.gt.f32.partialorder %v532_v62, 0.0  ;;  %909 = vmatpush.bf16.msrb.mxu2 %v5069_v57  ;;  %v5429_v57 = vld [vmem:[%s8280_s15 + $0x270] sm:$0xf] }
 0x118   : > { %v5430_v63 = vor.u32 %v7132_v58, %v5429_v57 }
 0x119   : > { %v536_v3 = vmul.f32 1.442695, %v535_v1 }
 0x11a   : > { %3870 = vmatpush.bf16.msrb.mxu3 %v5430_v63 }
 0x11b   : > { %7629 = vpow2.f32 %v536_v3  ;;  %v5048_v3 = vld [vmem:[%s9780_s5 + $0xb0] sm:$0xf] }
 0x11c   : > { %v5049_v5 = vor.u32 %v7032_v4, %v5048_v3  ;;  %v6625_v3 = vld [vmem:[%s8280_s15 + $0xbc8] sm:$0xf] }
 0x11e   : > { %910 = vmatpush.bf16.msrb.mxu2 %v5049_v5  ;;  %v5377_v5 = vld [vmem:[%s8280_s15 + $0x208] sm:$0xf] }
 0x121   : > { %v7630_v7 = vpop.eup %7629 }
 0x122   : > { %v4948_v8 = vadd.f32 -1.0, %v7630_v7  ;;  %v7027_v7 = vld [vmem:[%s9780_s5 + $0x98] sm:$0xf0] }
 0x124   : > { %v539_v9 = vsel %vm534_vm1, %v532_v62, %v4948_v8  ;;  %v7011_v62 = vld [vmem:[%s9780_s5 + $0x18] sm:$0xf0]  ;;  %v5029_v8 = vor.u32 %v7027_v7, %v5028_v6  ;;  %v7119_v6 = vld [vmem:[%s8280_s15 + $0x238] sm:$0xf0] }
 0x125   : > { %576 = vmatmul.f32.vlgmr.msra.gmra.mxu1 %v539_v9  ;;  %v4961_v1 = vor.u32 %v7011_v62, %v4960_v60  ;;  %v5008_v9 = vld [vmem:[%s9780_s5 + $0x60] sm:$0xf]  ;;  %v6106_v60 = vor.u32 %v7301_v49, %v6105_v48  ;;  %v7210_v62 = vld [vmem:[%s8280_s15 + $0x510] sm:$0xf0]  ;;  %v7431_v7 = vld [vmem:[%s8280_s15 + $0xbf8] sm:$0xf0] }
 0x126   : > { %911 = vmatpush.bf16.msrb.mxu2 %v5029_v8  ;;  %v5009_v11 = vor.u32 %v7022_v10, %v5008_v9  ;;  %3895 = vmatpush.bf16.msra.mxu1 %v6314_v24  ;;  %v5742_v4 = vor.u32 %v7210_v62, %v5741_v61  ;;  %v5689_v9 = vld [vmem:[%s8280_s15 + $0x478] sm:$0xf]  ;;  %v7197_v10 = vld [vmem:[%s8280_s15 + $0x4a8] sm:$0xf0]  ;;  %v6626_v16 = vor.u32 %v7431_v7, %v6625_v3  ;;  %v7139_v48 = vld [vmem:[%s8280_s15 + $0x2dc] sm:$0xf] }
 0x127   : > { %888 = vmatpush.bf16.msrb.mxu0 %v4961_v1  ;;  %v7288_v1 = vld [vmem:[%s8280_s15 + $0x780] sm:$0xf0]  ;;  %v5483_v49 = vld [vmem:[%s8280_s15 + $0x30c] sm:$0xf0]  ;;  %v7451_v61 = vld [vmem:[%s8280_s15 + $0xc9c] sm:$0xf] }
 0x128   : > { %v6054_v8 = vor.u32 %v7288_v1, %v6053_v0  ;;  %v5486_v57 = vor.u32 %v7139_v48, %v5483_v49  ;;  %v6731_v62 = vld [vmem:[%s8280_s15 + $0xccc] sm:$0xf0]  ;;  %v7438_v1 = vld [vmem:[%s8280_s15 + $0xc34] sm:$0xf]  ;;  %v7308_v7 = vld [vmem:[%s8280_s15 + $0x824] sm:$0xf] }
 0x129   : > { %v6734_v0 = vor.u32 %v7451_v61, %v6731_v62  ;;  %v7373_v48 = vld [vmem:[%s8280_s15 + $0xa2c] sm:$0xf]  ;;  %v6367_v62 = vld [vmem:[%s8280_s15 + $0x9f4] sm:$0xf0] }
 0x12a   : > { %912 = vmatpush.bf16.msrb.mxu2 %v5009_v11  ;;  %3896 = vmatpush.bf16.msra.mxu1 %v6262_v28  ;;  %v5378_v11 = vor.u32 %v7119_v6, %v5377_v5  ;;  %v7347_v28 = vld [vmem:[%s8280_s15 + $0x95c] sm:$0xf]  ;;  %v6627_v5 = vld [vmem:[%s8280_s15 + $0xbfc] sm:$0xf0] }
 0x12b   : > { %3882 = vmatpush.bf16.msra.mxu0 %v5898_v33  ;;  %v7405_v33 = vld [vmem:[%s8280_s15 + $0xb28] sm:$0xf0]  ;;  %v6318_v38 = vor.u32 %v7347_v28, %v6315_v29  ;;  %v5379_v29 = vld [vmem:[%s8280_s15 + $0x23c] sm:$0xf0] }
 0x12c   : > { %3871 = vmatpush.bf16.msrb.mxu3 %v5378_v11  ;;  %v6522_v41 = vor.u32 %v7405_v33, %v6521_v31  ;;  %v6575_v11 = vld [vmem:[%s8280_s15 + $0xb94] sm:$0xf0]  ;;  %v7113_v28 = vld [vmem:[%s8280_s15 + $0x20c] sm:$0xf]  ;;  %v7282_v31 = vld [vmem:[%s8280_s15 + $0x754] sm:$0xf] }
 0x12d   : > { %v7386_v33 = vld [vmem:[%s8280_s15 + $0xa94] sm:$0xf] }
 0x12e   : > { %913 = vmatpush.bf16.msrb.mxu2 %v4989_v14  ;;  %3897 = vmatpush.bf16.msra.mxu1 %v6210_v35  ;;  %v5325_v14 = vld [vmem:[%s8280_s15 + $0x1a0] sm:$0xf]  ;;  %v5585_v35 = vld [vmem:[%s8280_s15 + $0x3a8] sm:$0xf] }
 0x12f   : > { %3883 = vmatpush.bf16.msra.mxu0 %v5846_v39  ;;  %v5326_v24 = vor.u32 %v7106_v15, %v5325_v14  ;;  %v7334_v39 = vld [vmem:[%s8280_s15 + $0x8f4] sm:$0xf]  ;;  %v5586_v43 = vor.u32 %v7171_v36, %v5585_v35  ;;  %v6471_v35 = vld [vmem:[%s8280_s15 + $0xac4] sm:$0xf0]  ;;  %v5117_v36 = vld [vmem:[%s8280_s15] sm:$0xf] }
 0x131   : > { %3872 = vmatpush.bf16.msrb.mxu3 %v5326_v24  ;;  %v5169_v24 = vld [vmem:[%s8280_s15 + $0x68] sm:$0xf] }
 0x132   : > { %914 = vmatpush.bf16.msrb.mxu2 %v4969_v18  ;;  %3898 = vmatpush.bf16.msra.mxu1 %v6158_v45  ;;  %v7418_v18 = vld [vmem:[%s8280_s15 + $0xb90] sm:$0xf0]  ;;  %v5533_v45 = vld [vmem:[%s8280_s15 + $0x340] sm:$0xf] }
 0x133   : > { %3884 = vmatpush.bf16.msra.mxu0 %v5794_v56  ;;  %v7379_v56 = vld [vmem:[%s8280_s15 + $0xa58] sm:$0xf0] }
 0x134   : > { %v6418_v58 = vor.u32 %v7379_v56, %v6417_v55  ;;  %v6885_v56 = vld [vmem:[%s8280_s15 + $0xdd0] sm:$0xf] }
 0x136   : > { %3899 = vmatpush.bf16.msra.mxu1 %v6106_v60  ;;  %v7366_v60 = vld [vmem:[%s8280_s15 + $0x9f0] sm:$0xf0] }
 0x137   : > { %3885 = vmatpush.bf16.msra.mxu0 %v5742_v4  ;;  %v6366_v63 = vor.u32 %v7366_v60, %v6365_v59  ;;  %v7425_v4 = vld [vmem:[%s8280_s15 + $0xbcc] sm:$0xf]  ;;  %v5951_v59 = vld [vmem:[%s8280_s15 + $0x6b4] sm:$0xf0]  ;;  %v7360_v60 = vld [vmem:[%s8280_s15 + $0x9c4] sm:$0xf] }
 0x138   : > { %v6630_v6 = vor.u32 %v7425_v4, %v6627_v5  ;;  %v7483_v4 = vld [vmem:[%s8280_s15 + $0xd98] sm:$0xf0] }
 0x13a   : > { %3900 = vmatpush.bf16.msra.mxu1 %v6054_v8  ;;  %v6159_v8 = vld [vmem:[%s8280_s15 + $0x854] sm:$0xf0] }
 0x1a2   : > { %v577_v19 = vpop.f32.mrf.mxu1 }
 0x1a3   : > { %v578_v20 = vadd.f32 %v7628_v17, %v577_v19  ;;  %v6573_v17 = vld [vmem:[%s8280_s15 + $0xb60] sm:$0xf]  ;;  %v5690_v19 = vor.u32 %v7197_v10, %v5689_v9  ;;  %v7412_v9 = vld [vmem:[%s8280_s15 + $0xb64] sm:$0xf]  ;;  %v6162_v10 = vor.u32 %v7308_v7, %v6159_v8 }
 0x1a4   : > { %v6574_v30 = vor.u32 %v7418_v18, %v6573_v17  ;;  %v6578_v14 = vor.u32 %v7412_v9, %v6575_v11  ;;  %v5431_v17 = vld [vmem:[%s8280_s15 + $0x2a4] sm:$0xf0]  ;;  %v5171_v7 = vld [vmem:[%s8280_s15 + $0x9c] sm:$0xf0] }
 0x1a5   : > { %v581_v21 = vmin.f32 %v578_v20, 0.0  ;;  %vm580_vm2 = vcmp.gt.f32.partialorder %v578_v20, 0.0  ;;  %3886 = vmatpush.bf16.msra.mxu0 %v5690_v19  ;;  %v7295_v19 = vld [vmem:[%s8280_s15 + $0x7bc] sm:$0xf]  ;;  %v6781_v9 = vld [vmem:[%s8280_s15 + $0xd00] sm:$0xf] }
 0x1a7   : > { %v582_v26 = vmul.f32 1.442695, %v581_v21  ;;  %v5949_v21 = vld [vmem:[%s8280_s15 + $0x680] sm:$0xf] }
 0x1a8   : > { %v5950_v34 = vor.u32 %v7262_v25, %v5949_v21  ;;  %v7399_v21 = vld [vmem:[%s8280_s15 + $0xafc] sm:$0xf] }
 0x1a9   : > { %7631 = vpow2.f32 %v582_v26  ;;  %v5273_v26 = vld [vmem:[%s8280_s15 + $0x138] sm:$0xf]  ;;  %3887 = vmatpush.bf16.msra.mxu0 %v5638_v32  ;;  %v7067_v25 = vld [vmem:[%s8280_s15 + $0x98] sm:$0xf0]  ;;  %v6055_v32 = vld [vmem:[%s8280_s15 + $0x784] sm:$0xf0] }
 0x1aa   : > { %v5274_v37 = vor.u32 %v7093_v27, %v5273_v26  ;;  %v6526_v26 = vor.u32 %v7399_v21, %v6523_v23  ;;  %v5170_v27 = vor.u32 %v7067_v25, %v5169_v24 }
 0x1ac   : > { %3873 = vmatpush.bf16.msrb.mxu3 %v5274_v37  ;;  %v7054_v37 = vld [vmem:[%s8280_s15 + $0x30] sm:$0xf0] }
 0x1ad   : > { %3888 = vmatpush.bf16.msra.mxu0 %v5586_v43 }
 0x1af   : > { %v7632_v40 = vpop.eup %7631 }
 0x1b0   : > { %v4949_v44 = vadd.f32 -1.0, %v7632_v40  ;;  %v6263_v40 = vld [vmem:[%s8280_s15 + $0x924] sm:$0xf0] }
 0x1b1   : > { %v6266_v47 = vor.u32 %v7334_v39, %v6263_v40  ;;  %v5118_v39 = vor.u32 %v7054_v37, %v5117_v36  ;;  %v7100_v40 = vld [vmem:[%s8280_s15 + $0x1a4] sm:$0xf] }
 0x1b2   : > { %v585_v51 = vsel %vm580_vm2, %v578_v20, %v4949_v44  ;;  %v6002_v20 = vor.u32 %v7275_v13, %v6001_v12  ;;  %v7392_v44 = vld [vmem:[%s8280_s15 + $0xac0] sm:$0xf0]  ;;  %v5221_v12 = vld [vmem:[%s8280_s15 + $0xd0] sm:$0xf] }
 0x1b3   : > { %v8546_v53 = vpack.c.bf16 %v585_v51, %v585_v51  ;;  %v6211_v51 = vld [vmem:[%s8280_s15 + $0x8bc] sm:$0xf0]  ;;  %v6470_v52 = vor.u32 %v7392_v44, %v6469_v42  ;;  %v7080_v13 = vld [vmem:[%s8280_s15 + $0x100] sm:$0xf0]  ;;  %v6937_v42 = vld [vmem:[%s8280_s15 + $0xe38] sm:$0xf] }
 0x1b4   : > { %3901 = vmatpush.bf16.msra.mxu1 %v6002_v20  ;;  %v5222_v15 = vor.u32 %v7080_v13, %v5221_v12  ;;  %v6107_v20 = vld [vmem:[%s8280_s15 + $0x7ec] sm:$0xf0]  ;;  %v7509_v44 = vld [vmem:[%s8280_s15 + $0xe68] sm:$0xf0]  ;;  %v8651_v12 = vld [vmem:[#allocation11] sm:$0x1f] }
 0x1b5   : > { %863 = vmatmul.bf16.vlgmr.msra.gmra.mxu2 %v8546_v53  ;;  %876 = vmatmul.bf16.vlgmr.msra.gmra.mxu3 %v8546_v53  ;;  %v6110_v22 = vor.u32 %v7295_v19, %v6107_v20  ;;  %v7048_v13 = vld [vmem:[%s8280_s15 + $0x4] sm:$0xf]  ;;  %v638_v23 = vperm.slane %v8651_v12, 1 }
 0x1b6   : > { %889 = vmatmul.bf16.vlgmr.msrb.gmra.mxu0 %v8546_v53  ;;  %902 = vmatmul.bf16.vlgmr.msrb.gmra.mxu1 %v8546_v53 }
 0x1b7   : > { %3908 = vmatpush.bf16.msra.mxu2 %v6730_v54  ;;  %v5534_v54 = vor.u32 %v7158_v46, %v5533_v45  ;;  %3874 = vmatpush.bf16.msrb.mxu3 %v5222_v15  ;;  %v6938_v45 = vor.u32 %v7509_v44, %v6937_v42  ;;  %v7269_v46 = vld [vmem:[%s8280_s15 + $0x6ec] sm:$0xf]  ;;  %v7354_v42 = vld [vmem:[%s8280_s15 + $0x990] sm:$0xf0] }
 0x1b8   : > { %3902 = vmatpush.bf16.msra.mxu1 %v5950_v34  ;;  %v6058_v34 = vor.u32 %v7282_v31, %v6055_v32 }
 0x1b9   : > { %3889 = vmatpush.bf16.msra.mxu0 %v5534_v54 }
 0x1bb   : > { %3909 = vmatpush.bf16.msra.mxu2 %v6678_v2  ;;  %v6679_v2 = vld [vmem:[%s8280_s15 + $0xc64] sm:$0xf0]  ;;  %3875 = vmatpush.bf16.msrb.mxu3 %v5170_v27 }
 0x1bc   : > { %3960 = vmatpush.bf16.msrb.mxu1 %v6318_v38  ;;  %v6682_v3 = vor.u32 %v7438_v1, %v6679_v2  ;;  %v6474_v38 = vor.u32 %v7386_v33, %v6471_v35  ;;  %v6370_v1 = vor.u32 %v7360_v60, %v6367_v62  ;;  %v7243_v60 = vld [vmem:[%s8280_s15 + $0x61c] sm:$0xf] }
 0x1bd   : > { %3934 = vmatpush.bf16.msrb.mxu0 %v5486_v57  ;;  %v7496_v57 = vld [vmem:[%s8280_s15 + $0xe00] sm:$0xf0] }
 0x1bf   : > { %3910 = vmatpush.bf16.msra.mxu2 %v6626_v16  ;;  %v7126_v16 = vld [vmem:[%s8280_s15 + $0x274] sm:$0xf]  ;;  %3876 = vmatpush.bf16.msrb.mxu3 %v5118_v39 }
 0x1c0   : > { %3961 = vmatpush.bf16.msrb.mxu1 %v6266_v47  ;;  %v5434_v18 = vor.u32 %v7126_v16, %v5431_v17  ;;  %v6003_v47 = vld [vmem:[%s8280_s15 + $0x71c] sm:$0xf0]  ;;  %v639_v16 = vperm.slane %v8651_v12, 2  ;;  %v640_v17 = vperm.slane %v8651_v12, 3 }
 0x1c1   : > { %v6006_v49 = vor.u32 %v7269_v46, %v6003_v47  ;;  %v7458_v46 = vld [vmem:[%s8280_s15 + $0xcd0] sm:$0xf0] }
 0x1c2   : > { %3935 = vmatpush.bf16.msrb.mxu0 %v5434_v18 }
 0x1c3   : > { %3911 = vmatpush.bf16.msra.mxu2 %v6574_v30  ;;  %v5382_v30 = vor.u32 %v7113_v28, %v5379_v29  ;;  %3925 = vmatpush.bf16.msra.mxu3 %v6938_v45  ;;  %v6737_v45 = vld [vmem:[%s8280_s15 + $0xca0] sm:$0xf] }
 0x1c5   : > { %915 = vmatmul.bf16.vlgmr.msrb.gmra.mxu2 %v8546_v53  ;;  %v6214_v53 = vor.u32 %v7321_v50, %v6211_v51  ;;  %v6419_v50 = vld [vmem:[%s8280_s15 + $0xa5c] sm:$0xf0]  ;;  %v7087_v51 = vld [vmem:[%s8280_s15 + $0x13c] sm:$0xf] }
 0x1c6   : > { %3936 = vmatpush.bf16.msrb.mxu0 %v5382_v30  ;;  %v6422_v54 = vor.u32 %v7373_v48, %v6419_v50  ;;  %v6269_v50 = vld [vmem:[%s8280_s15 + $0x8f8] sm:$0xf] }
 0x1c7   : > { %3912 = vmatpush.bf16.msra.mxu2 %v6522_v41  ;;  %3962 = vmatpush.bf16.msrb.mxu1 %v6214_v53  ;;  %v5327_v41 = vld [vmem:[%s8280_s15 + $0x1d4] sm:$0xf0]  ;;  %v6886_v53 = vor.u32 %v7496_v57, %v6885_v56  ;;  %v7341_v56 = vld [vmem:[%s8280_s15 + $0x928] sm:$0xf0] }
 0x1c8   : > { %v5330_v43 = vor.u32 %v7100_v40, %v5327_v41  ;;  %v6321_v41 = vld [vmem:[%s8280_s15 + $0x960] sm:$0xf]  ;;  %v6685_v57 = vld [vmem:[%s8280_s15 + $0xc38] sm:$0xf] }
 0x1c9   : > { %3926 = vmatpush.bf16.msra.mxu3 %v6886_v53 }
 0x1ca   : > { %3937 = vmatpush.bf16.msrb.mxu0 %v5330_v43 }
 0x1cb   : > { %3913 = vmatpush.bf16.msra.mxu2 %v6470_v52  ;;  %3963 = vmatpush.bf16.msrb.mxu1 %v6162_v10  ;;  %v5275_v52 = vld [vmem:[%s8280_s15 + $0x16c] sm:$0xf0]  ;;  %v7470_v10 = vld [vmem:[%s8280_s15 + $0xd30] sm:$0xf0] }
 0x1cc   : > { %v5278_v55 = vor.u32 %v7087_v51, %v5275_v52  ;;  %v6782_v11 = vor.u32 %v7470_v10, %v6781_v9  ;;  %v7328_v9 = vld [vmem:[%s8280_s15 + $0x8c0] sm:$0xf0] }
 0x1ce   : > { %3938 = vmatpush.bf16.msrb.mxu0 %v5278_v55  ;;  %v641_v55 = vperm.slane %v8651_v12, 4 }
 0x1cf   : > { %3914 = vmatpush.bf16.msra.mxu2 %v6418_v58  ;;  %3964 = vmatpush.bf16.msrb.mxu1 %v6110_v22  ;;  %v7256_v58 = vld [vmem:[%s8280_s15 + $0x684] sm:$0xf]  ;;  %v637_v22 = vperm.slane %v8651_v12, 0 }
 0x1d0   : > { %v5954_v61 = vor.u32 %v7256_v58, %v5951_v59  ;;  %v7445_v59 = vld [vmem:[%s8280_s15 + $0xc68] sm:$0xf0] }
 0x1d3   : > { %3915 = vmatpush.bf16.msra.mxu2 %v6366_v63  ;;  %3965 = vmatpush.bf16.msrb.mxu1 %v6058_v34  ;;  %v7074_v63 = vld [vmem:[%s8280_s15 + $0xd4] sm:$0xf] }
 0x1d7   : > { %3973 = vmatpush.bf16.msrb.mxu2 %v6734_v0  ;;  %3966 = vmatpush.bf16.msrb.mxu1 %v6006_v49  ;;  %v5223_v0 = vld [vmem:[%s8280_s15 + $0x104] sm:$0xf0]  ;;  %v6322_v49 = vor.u32 %v7354_v42, %v6321_v41  ;;  %v6529_v41 = vld [vmem:[%s8280_s15 + $0xb00] sm:$0xf]  ;;  %v7406_v42 = vld [vmem:[%s8280_s15 + $0xb30] sm:$0xf0] }
 0x1d8   : > { %v5226_v2 = vor.u32 %v7074_v63, %v5223_v0  ;;  %v7503_v0 = vld [vmem:[%s8280_s15 + $0xe3c] sm:$0xf] }
 0x1da   : > { %3939 = vmatpush.bf16.msrb.mxu0 %v5226_v2 }
 0x1db   : > { %3974 = vmatpush.bf16.msrb.mxu2 %v6682_v3  ;;  %3967 = vmatpush.bf16.msrb.mxu1 %v5954_v61  ;;  %v6833_v3 = vld [vmem:[%s8280_s15 + $0xd68] sm:$0xf]  ;;  %v5899_v61 = vld [vmem:[%s8280_s15 + $0x64c] sm:$0xf0] }
 0x1dc   : > { %v6834_v5 = vor.u32 %v7483_v4, %v6833_v3  ;;  %v6270_v3 = vor.u32 %v7341_v56, %v6269_v50  ;;  %v6061_v50 = vld [vmem:[%s8280_s15 + $0x758] sm:$0xf] }
 0x1de   : > { %3927 = vmatpush.bf16.msra.mxu3 %v6834_v5 }
 0x1df   : > { %3975 = vmatpush.bf16.msrb.mxu2 %v6630_v6  ;;  %v7061_v6 = vld [vmem:[%s8280_s15 + $0x6c] sm:$0xf] }
 0x1e0   : > { %v5174_v8 = vor.u32 %v7061_v6, %v5171_v7  ;;  %v6686_v6 = vor.u32 %v7445_v59, %v6685_v57  ;;  %v5902_v7 = vor.u32 %v7243_v60, %v5899_v61  ;;  %v7393_v57 = vld [vmem:[%s8280_s15 + $0xac8] sm:$0xf0]  ;;  %v7191_v59 = vld [vmem:[%s8280_s15 + $0x47c] sm:$0xf]  ;;  %v5691_v60 = vld [vmem:[%s8280_s15 + $0x4ac] sm:$0xf0] }
 0x1e2   : > { %3940 = vmatpush.bf16.msrb.mxu0 %v5174_v8  ;;  %3928 = vmatpush.bf16.msra.mxu3 %v6782_v11  ;;  %v6217_v8 = vld [vmem:[%s8280_s15 + $0x890] sm:$0xf] }
 0x1e3   : > { %3976 = vmatpush.bf16.msrb.mxu2 %v6578_v14  ;;  %v5119_v14 = vld [vmem:[%s8280_s15 + $0x34] sm:$0xf0] }
 0x1e4   : > { %v5122_v15 = vor.u32 %v7048_v13, %v5119_v14  ;;  %v6633_v13 = vld [vmem:[%s8280_s15 + $0xbd0] sm:$0xf]  ;;  %v7432_v14 = vld [vmem:[%s8280_s15 + $0xc00] sm:$0xf0] }
 0x1e6   : > { %3941 = vmatpush.bf16.msrb.mxu0 %v5122_v15 }
 0x1e7   : > { %3977 = vmatpush.bf16.msrb.mxu2 %v6526_v26 }
 0x1eb   : > { %3978 = vmatpush.bf16.msrb.mxu2 %v6474_v38 }
 0x1ef   : > { %3979 = vmatpush.bf16.msrb.mxu2 %v6422_v54  ;;  %v6738_v54 = vor.u32 %v7458_v46, %v6737_v45  ;;  %v5743_v45 = vld [vmem:[%s8280_s15 + $0x514] sm:$0xf0]  ;;  %v7464_v46 = vld [vmem:[%s8280_s15 + $0xd04] sm:$0xf] }
 0x1f3   : > { %3980 = vmatpush.bf16.msrb.mxu2 %v6370_v1  ;;  %v6939_v1 = vld [vmem:[%s8280_s15 + $0xe6c] sm:$0xf0] }
 0x1f4   : > { %v6942_v15 = vor.u32 %v7503_v0, %v6939_v1 }
 0x233   : > { %v890_v18 = vpop.f32.mrf.mxu0  ;;  %v903_v19 = vpop.f32.mrf.mxu1 }
 0x234   : > { %v891_v20 = vadd.f32 %v890_v18, %v639_v16  ;;  %v904_v21 = vadd.f32 %v903_v19, %v640_v17  ;;  %v7230_v16 = vld [vmem:[%s8280_s15 + $0x5b4] sm:$0xf]  ;;  %v5847_v18 = vld [vmem:[%s8280_s15 + $0x5e4] sm:$0xf0] }
 0x235   : > { %v7490_v19 = vld [vmem:[%s8280_s15 + $0xdd4] sm:$0xf] }
 0x236   : > { %v927_v24 = vmin.f32 %v891_v20, 0.0  ;;  %v928_v25 = vmin.f32 %v904_v21, 0.0  ;;  %vm922_vm3 = vcmp.gt.f32.partialorder %v891_v20, 0.0  ;;  %vm923_vm4 = vcmp.gt.f32.partialorder %v904_v21, 0.0 }
 0x238   : > { %v934_v26 = vmul.f32 1.442695, %v927_v24  ;;  %v936_v27 = vmul.f32 1.442695, %v928_v25  ;;  %v864_v28 = vpop.f32.mrf.mxu2  ;;  %v877_v29 = vpop.f32.mrf.mxu3  ;;  %v6165_v24 = vld [vmem:[%s8280_s15 + $0x828] sm:$0xf] }
 0x239   : > { %v865_v30 = vadd.f32 %v864_v28, %v637_v22  ;;  %v878_v31 = vadd.f32 %v877_v29, %v638_v23  ;;  %v6218_v22 = vor.u32 %v7328_v9, %v6217_v8  ;;  %v6634_v23 = vor.u32 %v7432_v14, %v6633_v13  ;;  %v7315_v25 = vld [vmem:[%s8280_s15 + $0x858] sm:$0xf0]  ;;  %v6425_v8 = vld [vmem:[%s8280_s15 + $0xa30] sm:$0xf]  ;;  %v7380_v9 = vld [vmem:[%s8280_s15 + $0xa60] sm:$0xf0] }
 0x23a   : > { %7633 = vpow2.f32 %v934_v26  ;;  %v6581_v26 = vld [vmem:[%s8280_s15 + $0xb68] sm:$0xf]  ;;  %v5850_v28 = vor.u32 %v7230_v16, %v5847_v18  ;;  %v7419_v29 = vld [vmem:[%s8280_s15 + $0xb98] sm:$0xf0]  ;;  %v5853_v13 = vld [vmem:[%s8280_s15 + $0x5b8] sm:$0xf]  ;;  %v6426_v18 = vor.u32 %v7380_v9, %v6425_v8 }
 0x23b   : > { %7635 = vpow2.f32 %v936_v27  ;;  %v925_v32 = vmin.f32 %v865_v30, 0.0  ;;  %v892_v33 = vpop.f32.mrf.mxu0  ;;  %v905_v34 = vpop.f32.mrf.mxu1  ;;  %v926_v35 = vmin.f32 %v878_v31, 0.0  ;;  %vm920_vm5 = vcmp.gt.f32.partialorder %v865_v30, 0.0  ;;  %v7237_v14 = vld [vmem:[%s8280_s15 + $0x5e8] sm:$0xf0] }
 0x23c   : > { %vm921_vm6 = vcmp.gt.f32.partialorder %v878_v31, 0.0  ;;  %v7477_v33 = vld [vmem:[%s8280_s15 + $0xd6c] sm:$0xf]  ;;  %v6835_v34 = vld [vmem:[%s8280_s15 + $0xd9c] sm:$0xf0] }
 0x23d   : > { %v930_v36 = vmul.f32 1.442695, %v925_v32  ;;  %v932_v37 = vmul.f32 1.442695, %v926_v35  ;;  %v5795_v32 = vld [vmem:[%s8280_s15 + $0x57c] sm:$0xf0]  ;;  %v6166_v35 = vor.u32 %v7315_v25, %v6165_v24 }
 0x23e   : > { %v5957_v16 = vld [vmem:[%s8280_s15 + $0x688] sm:$0xf]  ;;  %v7244_v24 = vld [vmem:[%s8280_s15 + $0x624] sm:$0xf]  ;;  %v5907_v25 = vld [vmem:[%s8280_s15 + $0x654] sm:$0xf0] }
 0x23f   : > { %7637 = vpow2.f32 %v930_v36  ;;  %v5645_v8 = vld [vmem:[%s8280_s15 + $0x418] sm:$0xf]  ;;  %v7185_v9 = vld [vmem:[%s8280_s15 + $0x448] sm:$0xf0] }
 0x240   : > { %v7634_v38 = vpop.eup %7633  ;;  %7639 = vpow2.f32 %v932_v37  ;;  %v866_v39 = vpop.f32.mrf.mxu2  ;;  %v6582_v37 = vor.u32 %v7419_v29, %v6581_v26  ;;  %v7348_v26 = vld [vmem:[%s8280_s15 + $0x964] sm:$0xf]  ;;  %v5587_v29 = vld [vmem:[%s8280_s15 + $0x3dc] sm:$0xf0] }
 0x241   : > { %v879_v40 = vpop.f32.mrf.mxu3  ;;  %v7636_v43 = vpop.eup %7635  ;;  %v5112_v44 = vadd.f32 -1.0, %v7634_v38  ;;  %v6113_v38 = vld [vmem:[%s8280_s15 + $0x7c0] sm:$0xf]  ;;  %v7302_v39 = vld [vmem:[%s8280_s15 + $0x7f0] sm:$0xf0] }
 0x242   : > { %v5113_v47 = vadd.f32 -1.0, %v7636_v43  ;;  %v6838_v43 = vor.u32 %v7477_v33, %v6835_v34  ;;  %v5910_v34 = vor.u32 %v7244_v24, %v5907_v25  ;;  %v5333_v24 = vld [vmem:[%s8280_s15 + $0x1a8] sm:$0xf]  ;;  %v7107_v25 = vld [vmem:[%s8280_s15 + $0x1d8] sm:$0xf0] }
 0x243   : > { %v947_v48 = vsel %vm922_vm3, %v891_v20, %v5112_v44  ;;  %v6887_v20 = vld [vmem:[%s8280_s15 + $0xe04] sm:$0xf0]  ;;  %v7204_v44 = vld [vmem:[%s8280_s15 + $0x4e4] sm:$0xf] }
 0x244   : > { %v8664_v51 = vpack.c.bf16 %v947_v48, %v947_v48  ;;  %v948_v52 = vsel %vm923_vm4, %v904_v21, %v5113_v47  ;;  %v6783_v47 = vld [vmem:[%s8280_s15 + $0xd34] sm:$0xf0]  ;;  %v6114_v48 = vor.u32 %v7302_v39, %v6113_v38  ;;  %v5746_v56 = vor.u32 %v7204_v44, %v5743_v45  ;;  %v5855_v38 = vld [vmem:[%s8280_s15 + $0x5ec] sm:$0xf0]  ;;  %v7335_v39 = vld [vmem:[%s8280_s15 + $0x8fc] sm:$0xf] }
 0x245   : > { %v7638_v53 = vpop.eup %7637  ;;  %v8669_v58 = vpack.c.bf16 %v948_v52, %v948_v52  ;;  %v7289_v52 = vld [vmem:[%s8280_s15 + $0x788] sm:$0xf0]  ;;  %v5749_v44 = vld [vmem:[%s8280_s15 + $0x4e8] sm:$0xf]  ;;  %v7211_v45 = vld [vmem:[%s8280_s15 + $0x518] sm:$0xf0] }
 0x246   : > { %v7640_v62 = vpop.eup %7639  ;;  %v5110_v63 = vadd.f32 -1.0, %v7638_v53  ;;  %3903 = vmatmul.bf16.vlgmr.msra.gmra.mxu1 %v8664_v51  ;;  %v6786_v53 = vor.u32 %v7464_v46, %v6783_v47  ;;  %v6062_v0 = vor.u32 %v7289_v52, %v6061_v50  ;;  %v5489_v46 = vld [vmem:[%s8280_s15 + $0x2e0] sm:$0xf]  ;;  %v7146_v47 = vld [vmem:[%s8280_s15 + $0x310] sm:$0xf0] }
 0x247   : > { %v5111_v2 = vadd.f32 -1.0, %v7640_v62  ;;  %3916 = vmatmul.bf16.vlgmr.msra.gmra.mxu2 %v8669_v58  ;;  %4025 = vmatpush.bf16.msra.mxu1 %v6322_v49  ;;  %v6530_v49 = vor.u32 %v7406_v42, %v6529_v41  ;;  %v5905_v62 = vld [vmem:[%s8280_s15 + $0x620] sm:$0xf]  ;;  %v7152_v42 = vld [vmem:[%s8280_s15 + $0x344] sm:$0xf] }
 0x248   : > { %v945_v4 = vsel %vm920_vm5, %v865_v30, %v5110_v63  ;;  %4038 = vmatpush.bf16.msra.mxu2 %v6738_v54  ;;  %v916_v5 = vpop.f32.mrf.mxu2  ;;  %v6890_v30 = vor.u32 %v7490_v19, %v6887_v20  ;;  %v6477_v54 = vld [vmem:[%s8280_s15 + $0xa98] sm:$0xf]  ;;  %v7250_v63 = vld [vmem:[%s8280_s15 + $0x650] sm:$0xf0]  ;;  %v7263_v19 = vld [vmem:[%s8280_s15 + $0x6b8] sm:$0xf0] }
 0x249   : > { %v8680_v10 = vpack.c.bf16 %v945_v4, %v945_v4  ;;  %v946_v11 = vsel %vm921_vm6, %v878_v31, %v5111_v2  ;;  %v8682_v12 = vadd.f32 %v916_v5, %v641_v55  ;;  %v7217_v31 = vld [vmem:[%s8280_s15 + $0x54c] sm:$0xf]  ;;  %v6478_v2 = vor.u32 %v7393_v57, %v6477_v54  ;;  %v7276_v4 = vld [vmem:[%s8280_s15 + $0x720] sm:$0xf0]  ;;  %v6373_v20 = vld [vmem:[%s8280_s15 + $0x9c8] sm:$0xf] }
 0x24a   : > { %v8687_v17 = vpack.c.bf16 %v946_v11, %v946_v11  ;;  %v5798_v40 = vor.u32 %v7217_v31, %v5795_v32  ;;  %v7178_v11 = vld [vmem:[%s8280_s15 + $0x414] sm:$0xf]  ;;  %v5801_v31 = vld [vmem:[%s8280_s15 + $0x550] sm:$0xf]  ;;  %v7224_v32 = vld [vmem:[%s8280_s15 + $0x580] sm:$0xf0] }
 0x24b   : > { %v929_v21 = vmin.f32 %v8682_v12, 0.0  ;;  %4026 = vmatpush.bf16.msra.mxu1 %v6270_v3  ;;  %3877 = vmatmul.bf16.vlgmr.msrb.gmra.mxu3 %v8680_v10  ;;  %vm924_vm7 = vcmp.gt.f32.partialorder %v8682_v12, 0.0  ;;  %v6009_v3 = vld [vmem:[%s8280_s15 + $0x6f0] sm:$0xf]  ;;  %v5802_v41 = vor.u32 %v7224_v32, %v5801_v31  ;;  %v7218_v52 = vld [vmem:[%s8280_s15 + $0x554] sm:$0xf]  ;;  %v5334_v31 = vor.u32 %v7107_v25, %v5333_v24 }
 0x24c   : > { %4039 = vmatpush.bf16.msra.mxu2 %v6686_v6  ;;  %3890 = vmatmul.bf16.vlgmr.msra.gmra.mxu0 %v8687_v17  ;;  %v5694_v6 = vor.u32 %v7191_v59, %v5691_v60  ;;  %v5803_v54 = vld [vmem:[%s8280_s15 + $0x584] sm:$0xf0]  ;;  %v7322_v57 = vld [vmem:[%s8280_s15 + $0x894] sm:$0xf]  ;;  %v5697_v59 = vld [vmem:[%s8280_s15 + $0x480] sm:$0xf] }
 0x24d   : > { %v938_v27 = vmul.f32 1.442695, %v929_v21  ;;  %3947 = vmatpush.bf16.msrb.mxu3 %v5902_v7  ;;  %3990 = vmatpush.bf16.msra.mxu0 %v6942_v15  ;;  %v5906_v7 = vor.u32 %v7250_v63, %v5905_v62  ;;  %v6010_v15 = vor.u32 %v7276_v4, %v6009_v3  ;;  %v7367_v21 = vld [vmem:[%s8280_s15 + $0x9f8] sm:$0xf0]  ;;  %v7198_v60 = vld [vmem:[%s8280_s15 + $0x4b0] sm:$0xf0]  ;;  %v5806_v63 = vor.u32 %v7218_v52, %v5803_v54 }
 0x24e   : > { %v6374_v33 = vor.u32 %v7367_v21, %v6373_v20  ;;  %v7133_v62 = vld [vmem:[%s8280_s15 + $0x2a8] sm:$0xf0]  ;;  %v5698_v3 = vor.u32 %v7198_v60, %v5697_v59  ;;  %v7296_v20 = vld [vmem:[%s8280_s15 + $0x7c4] sm:$0xf]  ;;  %v6115_v21 = vld [vmem:[%s8280_s15 + $0x7f4] sm:$0xf0] }
 0x24f   : > { %7641 = vpow2.f32 %v938_v27  ;;  %4027 = vmatpush.bf16.msra.mxu1 %v6218_v22  ;;  %v6323_v27 = vld [vmem:[%s8280_s15 + $0x994] sm:$0xf0]  ;;  %v7283_v32 = vld [vmem:[%s8280_s15 + $0x75c] sm:$0xf]  ;;  %v7257_v59 = vld [vmem:[%s8280_s15 + $0x68c] sm:$0xf] }
 0x250   : > { %4040 = vmatpush.bf16.msra.mxu2 %v6634_v23  ;;  %v918_v36 = vpop.f32.mrf.mxu2  ;;  %v5854_v23 = vor.u32 %v7237_v14, %v5853_v13  ;;  %v7127_v54 = vld [vmem:[%s8280_s15 + $0x27c] sm:$0xf]  ;;  %v5959_v60 = vld [vmem:[%s8280_s15 + $0x6bc] sm:$0xf0]  ;;  %v7510_v25 = vld [vmem:[%s8280_s15 + $0xe70] sm:$0xf0] }
 0x251   : > { %3948 = vmatpush.bf16.msrb.mxu3 %v5850_v28  ;;  %3991 = vmatpush.bf16.msra.mxu0 %v6890_v30  ;;  %v7165_v28 = vld [vmem:[%s8280_s15 + $0x3ac] sm:$0xf]  ;;  %v5958_v30 = vor.u32 %v7263_v19, %v5957_v16  ;;  %v6326_v36 = vor.u32 %v7348_v26, %v6323_v27  ;;  %v5699_v16 = vld [vmem:[%s8280_s15 + $0x4b4] sm:$0xf0]  ;;  %v6118_v27 = vor.u32 %v7296_v20, %v6115_v21  ;;  %v5125_v20 = vld [vmem:[%s8280_s15 + $0x8] sm:$0xf] }
 0x252   : > { %v7055_v21 = vld [vmem:[%s8280_s15 + $0x38] sm:$0xf0]  ;;  %v6945_v24 = vld [vmem:[%s8280_s15 + $0xe40] sm:$0xf] }
 0x253   : > { %4028 = vmatpush.bf16.msra.mxu1 %v6166_v35  ;;  %v7231_v35 = vld [vmem:[%s8280_s15 + $0x5bc] sm:$0xf] }
 0x254   : > { %4041 = vmatpush.bf16.msra.mxu2 %v6582_v37  ;;  %v5590_v37 = vor.u32 %v7165_v28, %v5587_v29  ;;  %v7179_v28 = vld [vmem:[%s8280_s15 + $0x41c] sm:$0xf]  ;;  %v5647_v29 = vld [vmem:[%s8280_s15 + $0x44c] sm:$0xf0] }
 0x255   : > { %v7642_v55 = vpop.eup %7641  ;;  %3949 = vmatpush.bf16.msrb.mxu3 %v5798_v40  ;;  %3992 = vmatpush.bf16.msra.mxu0 %v6838_v43  ;;  %v6271_v40 = vld [vmem:[%s8280_s15 + $0x92c] sm:$0xf0]  ;;  %v5535_v43 = vld [vmem:[%s8280_s15 + $0x374] sm:$0xf0] }
 0x256   : > { %v5114_v61 = vadd.f32 -1.0, %v7642_v55  ;;  %3968 = vmatmul.bf16.vlgmr.msrb.gmra.mxu1 %v8664_v51  ;;  %v5538_v50 = vor.u32 %v7152_v42, %v5535_v43  ;;  %v5750_v55 = vor.u32 %v7211_v45, %v5749_v44  ;;  %v7166_v42 = vld [vmem:[%s8280_s15 + $0x3b4] sm:$0xf]  ;;  %v5595_v43 = vld [vmem:[%s8280_s15 + $0x3e4] sm:$0xf0] }
 0x257   : > { %3981 = vmatmul.bf16.vlgmr.msrb.gmra.mxu2 %v8669_v58  ;;  %4029 = vmatpush.bf16.msra.mxu1 %v6114_v48  ;;  %v5858_v48 = vor.u32 %v7231_v35, %v5855_v38  ;;  %v7159_v35 = vld [vmem:[%s8280_s15 + $0x378] sm:$0xf0]  ;;  %v5650_v38 = vor.u32 %v7179_v28, %v5647_v29  ;;  %v5598_v52 = vor.u32 %v7166_v42, %v5595_v43  ;;  %v5393_v29 = vld [vmem:[%s8280_s15 + $0x218] sm:$0xf]  ;;  %v7108_v42 = vld [vmem:[%s8280_s15 + $0x1e0] sm:$0xf0] }
 0x258   : > { %v949_v1 = vsel %vm924_vm7, %v8682_v12, %v5114_v61  ;;  %4042 = vmatpush.bf16.msra.mxu2 %v6530_v49  ;;  %v5639_v12 = vld [vmem:[%s8280_s15 + $0x444] sm:$0xf0]  ;;  %v6274_v49 = vor.u32 %v7335_v39, %v6271_v40  ;;  %v5437_v61 = vld [vmem:[%s8280_s15 + $0x278] sm:$0xf]  ;;  %v7140_v39 = vld [vmem:[%s8280_s15 + $0x2e4] sm:$0xf]  ;;  %v5126_v28 = vor.u32 %v7055_v21, %v5125_v20 }
 0x259   : > { %v8725_v5 = vpack.c.bf16 %v949_v1, %v949_v1  ;;  %3950 = vmatpush.bf16.msrb.mxu3 %v5746_v56  ;;  %3993 = vmatpush.bf16.msra.mxu0 %v6786_v53  ;;  %v5642_v22 = vor.u32 %v7178_v11, %v5639_v12  ;;  %v5490_v56 = vor.u32 %v7146_v47, %v5489_v46  ;;  %v6219_v53 = vld [vmem:[%s8280_s15 + $0x8c4] sm:$0xf0]  ;;  %v7205_v1 = vld [vmem:[%s8280_s15 + $0x4ec] sm:$0xf]  ;;  %v5385_v11 = vld [vmem:[%s8280_s15 + $0x210] sm:$0xf] }
 0x25a   : > { %v5438_v4 = vor.u32 %v7133_v62, %v5437_v61  ;;  %v7120_v12 = vld [vmem:[%s8280_s15 + $0x240] sm:$0xf0]  ;;  %v5491_v40 = vld [vmem:[%s8280_s15 + $0x314] sm:$0xf0]  ;;  %v7270_v46 = vld [vmem:[%s8280_s15 + $0x6f4] sm:$0xf] }
 0x25b   : > { %4030 = vmatpush.bf16.msra.mxu1 %v6062_v0  ;;  %6987 = vmatmul.msk.bf16.vlgmr.msra.gmra.mxu3 %vm3865_vm8, %v8725_v5  ;;  %v6222_v0 = vor.u32 %v7322_v57, %v6219_v53  ;;  %v5386_v19 = vor.u32 %v7120_v12, %v5385_v11  ;;  %v6011_v47 = vld [vmem:[%s8280_s15 + $0x724] sm:$0xf0]  ;;  %v5543_v53 = vld [vmem:[%s8280_s15 + $0x37c] sm:$0xf0]  ;;  %v7439_v20 = vld [vmem:[%s8280_s15 + $0xc3c] sm:$0xf] }
 0x25c   : > { %4043 = vmatpush.bf16.msra.mxu2 %v6478_v2  ;;  %3942 = vmatmul.bf16.vlgmr.msrb.gmra.mxu0 %v8680_v10  ;;  %v5751_v2 = vld [vmem:[%s8280_s15 + $0x51c] sm:$0xf0]  ;;  %v6014_v57 = vor.u32 %v7270_v46, %v6011_v47  ;;  %v5497_v62 = vld [vmem:[%s8280_s15 + $0x2e8] sm:$0xf]  ;;  %v7212_v46 = vld [vmem:[%s8280_s15 + $0x520] sm:$0xf0] }
 0x25d   : > { %3951 = vmatpush.bf16.msrb.mxu3 %v5694_v6  ;;  %4012 = vmatpush.bf16.msrb.mxu0 %v5906_v7  ;;  %v7309_v6 = vld [vmem:[%s8280_s15 + $0x82c] sm:$0xf]  ;;  %v6167_v7 = vld [vmem:[%s8280_s15 + $0x85c] sm:$0xf0]  ;;  %v5754_v13 = vor.u32 %v7205_v1, %v5751_v2  ;;  %v7251_v2 = vld [vmem:[%s8280_s15 + $0x658] sm:$0xf0] }
 0x25e   : > { %v6170_v14 = vor.u32 %v7309_v6, %v6167_v7  ;;  %v7114_v7 = vld [vmem:[%s8280_s15 + $0x214] sm:$0xf]  ;;  %v5445_v12 = vld [vmem:[%s8280_s15 + $0x280] sm:$0xf]  ;;  %v7075_v47 = vld [vmem:[%s8280_s15 + $0xdc] sm:$0xf] }
 0x25f   : > { %4031 = vmatpush.bf16.msra.mxu1 %v6010_v15  ;;  %v7192_v15 = vld [vmem:[%s8280_s15 + $0x484] sm:$0xf]  ;;  %v6687_v21 = vld [vmem:[%s8280_s15 + $0xc6c] sm:$0xf0] }
 0x260   : > { %4044 = vmatpush.bf16.msra.mxu2 %v6426_v18  ;;  %v5646_v18 = vor.u32 %v7185_v9, %v5645_v8  ;;  %v5702_v26 = vor.u32 %v7192_v15, %v5699_v16  ;;  %v5387_v8 = vld [vmem:[%s8280_s15 + $0x244] sm:$0xf0]  ;;  %v5962_v9 = vor.u32 %v7257_v59, %v5959_v60  ;;  %v7134_v15 = vld [vmem:[%s8280_s15 + $0x2b0] sm:$0xf0]  ;;  %v5861_v16 = vld [vmem:[%s8280_s15 + $0x5c0] sm:$0xf] }
 0x261   : > { %3952 = vmatpush.bf16.msrb.mxu3 %v5642_v22  ;;  %4013 = vmatpush.bf16.msrb.mxu0 %v5854_v23  ;;  %v5593_v22 = vld [vmem:[%s8280_s15 + $0x3b0] sm:$0xf]  ;;  %v7172_v23 = vld [vmem:[%s8280_s15 + $0x3e0] sm:$0xf0]  ;;  %v5705_v59 = vld [vmem:[%s8280_s15 + $0x488] sm:$0xf] }
 0x262   : > { %v7199_v60 = vld [vmem:[%s8280_s15 + $0x4b8] sm:$0xf0] }
 0x263   : > { %4032 = vmatpush.bf16.msra.mxu1 %v5958_v30  ;;  %v5594_v30 = vor.u32 %v7172_v23, %v5593_v22  ;;  %v7101_v22 = vld [vmem:[%s8280_s15 + $0x1ac] sm:$0xf]  ;;  %v5335_v23 = vld [vmem:[%s8280_s15 + $0x1dc] sm:$0xf0] }
 0x264   : > { %4045 = vmatpush.bf16.msra.mxu2 %v6374_v33  ;;  %v6063_v33 = vld [vmem:[%s8280_s15 + $0x78c] sm:$0xf0] }
 0x265   : > { %3953 = vmatpush.bf16.msrb.mxu3 %v5590_v37  ;;  %4014 = vmatpush.bf16.msrb.mxu0 %v5802_v41  ;;  %v7094_v37 = vld [vmem:[%s8280_s15 + $0x170] sm:$0xf0]  ;;  %v6066_v41 = vor.u32 %v7283_v32, %v6063_v33  ;;  %v6946_v32 = vor.u32 %v7510_v25, %v6945_v24  ;;  %v5809_v33 = vld [vmem:[%s8280_s15 + $0x558] sm:$0xf]  ;;  %v7069_v24 = vld [vmem:[%s8280_s15 + $0xa8] sm:$0xf0] }
 0x266   : > { %4033 = vmatmul.bf16.vlgmr.msra.gmra.mxu1 %v8664_v51 }
 0x267   : > { %4077 = vmatpush.bf16.msrb.mxu1 %v5910_v34  ;;  %4046 = vmatmul.bf16.vlgmr.msra.gmra.mxu2 %v8669_v58  ;;  %v5541_v34 = vld [vmem:[%s8280_s15 + $0x348] sm:$0xf] }
 0x268   : > { %4090 = vmatpush.bf16.msrb.mxu2 %v6326_v36  ;;  %v5281_v36 = vld [vmem:[%s8280_s15 + $0x140] sm:$0xf]  ;;  %v5542_v44 = vor.u32 %v7159_v35, %v5541_v34  ;;  %v7225_v34 = vld [vmem:[%s8280_s15 + $0x588] sm:$0xf0]  ;;  %v7088_v35 = vld [vmem:[%s8280_s15 + $0x144] sm:$0xf] }
 0x269   : > { %3954 = vmatpush.bf16.msrb.mxu3 %v5538_v50  ;;  %4015 = vmatpush.bf16.msrb.mxu0 %v5750_v55  ;;  %v5282_v45 = vor.u32 %v7094_v37, %v5281_v36  ;;  %v7081_v50 = vld [vmem:[%s8280_s15 + $0x108] sm:$0xf0]  ;;  %v5439_v55 = vld [vmem:[%s8280_s15 + $0x2ac] sm:$0xf0]  ;;  %v5283_v36 = vld [vmem:[%s8280_s15 + $0x174] sm:$0xf0] }
 0x26a   : > { %v5442_v1 = vor.u32 %v7127_v54, %v5439_v55  ;;  %v6893_v37 = vld [vmem:[%s8280_s15 + $0xdd8] sm:$0xf]  ;;  %v5286_v43 = vor.u32 %v7088_v35, %v5283_v36  ;;  %v5289_v55 = vld [vmem:[%s8280_s15 + $0x148] sm:$0xf]  ;;  %v5133_v36 = vld [vmem:[%s8280_s15 + $0x10] sm:$0xf] }
 0x26b   : > { %4078 = vmatpush.bf16.msrb.mxu1 %v5858_v48  ;;  %v5494_v48 = vor.u32 %v7140_v39, %v5491_v40  ;;  %v5810_v40 = vor.u32 %v7225_v34, %v5809_v33  ;;  %v7426_v33 = vld [vmem:[%s8280_s15 + $0xbd4] sm:$0xf]  ;;  %v6635_v34 = vld [vmem:[%s8280_s15 + $0xc04] sm:$0xf0] }
 0x26c   : > { %4091 = vmatpush.bf16.msrb.mxu2 %v6274_v49  ;;  %3955 = vmatmul.bf16.vlgmr.msrb.gmra.mxu3 %v8687_v17  ;;  %v5229_v49 = vld [vmem:[%s8280_s15 + $0xd8] sm:$0xf] }
 0x26d   : > { %3999 = vmatpush.bf16.msra.mxu3 %v5490_v56  ;;  %6988 = vmatmul.msk.bf16.vlgmr.msra.gmra.mxu0 %vm3865_vm8, %v8725_v5  ;;  %v7153_v56 = vld [vmem:[%s8280_s15 + $0x34c] sm:$0xf]  ;;  %v5230_v61 = vor.u32 %v7081_v50, %v5229_v49  ;;  %v6841_v49 = vld [vmem:[%s8280_s15 + $0xd70] sm:$0xf]  ;;  %v7484_v50 = vld [vmem:[%s8280_s15 + $0xda0] sm:$0xf0] }
 0x26e   : > { %4016 = vmatpush.bf16.msrb.mxu0 %v5698_v3  ;;  %v5177_v3 = vld [vmem:[%s8280_s15 + $0x70] sm:$0xf]  ;;  %v5546_v6 = vor.u32 %v7153_v56, %v5543_v53  ;;  %v7095_v56 = vld [vmem:[%s8280_s15 + $0x178] sm:$0xf0]  ;;  %v6842_v53 = vor.u32 %v7484_v50, %v6841_v49  ;;  %v7413_v49 = vld [vmem:[%s8280_s15 + $0xb6c] sm:$0xf] }
 0x26f   : > { %4079 = vmatpush.bf16.msrb.mxu1 %v5806_v63  ;;  %v7147_v63 = vld [vmem:[%s8280_s15 + $0x318] sm:$0xf0]  ;;  %v6583_v50 = vld [vmem:[%s8280_s15 + $0xb9c] sm:$0xf0] }
 0x270   : > { %4092 = vmatpush.bf16.msrb.mxu2 %v6222_v0  ;;  %v5913_v0 = vld [vmem:[%s8280_s15 + $0x628] sm:$0xf]  ;;  %v5498_v11 = vor.u32 %v7147_v63, %v5497_v62 }
 0x271   : > { %4000 = vmatpush.bf16.msra.mxu3 %v5438_v4  ;;  %v7068_v4 = vld [vmem:[%s8280_s15 + $0xa0] sm:$0xf0]  ;;  %v5179_v62 = vld [vmem:[%s8280_s15 + $0xa4] sm:$0xf0] }
 0x272   : > { %4017 = vmatpush.bf16.msrb.mxu0 %v5646_v18  ;;  %v7238_v18 = vld [vmem:[%s8280_s15 + $0x5f0] sm:$0xf0]  ;;  %v6789_v63 = vld [vmem:[%s8280_s15 + $0xd08] sm:$0xf] }
 0x273   : > { %4080 = vmatpush.bf16.msrb.mxu1 %v5754_v13  ;;  %v5914_v13 = vor.u32 %v7251_v2, %v5913_v0  ;;  %v7471_v0 = vld [vmem:[%s8280_s15 + $0xd38] sm:$0xf0]  ;;  %v7452_v2 = vld [vmem:[%s8280_s15 + $0xca4] sm:$0xf] }
 0x274   : > { %4093 = vmatpush.bf16.msrb.mxu2 %v6170_v14  ;;  %v5178_v14 = vor.u32 %v7068_v4, %v5177_v3  ;;  %v6739_v3 = vld [vmem:[%s8280_s15 + $0xcd4] sm:$0xf0]  ;;  %v5706_v4 = vor.u32 %v7199_v60, %v5705_v59  ;;  %v6586_v59 = vor.u32 %v7413_v49, %v6583_v50  ;;  %v7128_v60 = vld [vmem:[%s8280_s15 + $0x284] sm:$0xf]  ;;  %v6329_v49 = vld [vmem:[%s8280_s15 + $0x968] sm:$0xf] }
 0x275   : > { %4001 = vmatpush.bf16.msra.mxu3 %v5386_v19  ;;  %v5390_v19 = vor.u32 %v7114_v7, %v5387_v8  ;;  %v7082_v7 = vld [vmem:[%s8280_s15 + $0x110] sm:$0xf0]  ;;  %v7355_v50 = vld [vmem:[%s8280_s15 + $0x998] sm:$0xf0] }
 0x276   : > { %4018 = vmatpush.bf16.msrb.mxu0 %v5594_v30  ;;  %v7121_v30 = vld [vmem:[%s8280_s15 + $0x248] sm:$0xf0] }
 0x277   : > { %4081 = vmatpush.bf16.msrb.mxu1 %v5702_v26  ;;  %v5446_v26 = vor.u32 %v7134_v15, %v5445_v12  ;;  %v5394_v39 = vor.u32 %v7121_v30, %v5393_v29  ;;  %v7186_v12 = vld [vmem:[%s8280_s15 + $0x450] sm:$0xf0]  ;;  %v5127_v15 = vld [vmem:[%s8280_s15 + $0x3c] sm:$0xf0]  ;;  %v6690_v29 = vor.u32 %v7439_v20, %v6687_v21  ;;  %v7491_v30 = vld [vmem:[%s8280_s15 + $0xddc] sm:$0xf] }
 0x278   : > { %4094 = vmatpush.bf16.msrb.mxu2 %v6118_v27  ;;  %v5862_v27 = vor.u32 %v7238_v18, %v5861_v16  ;;  %v7504_v16 = vld [vmem:[%s8280_s15 + $0xe44] sm:$0xf]  ;;  %v7446_v20 = vld [vmem:[%s8280_s15 + $0xc70] sm:$0xf0] }
 0x279   : > { %4002 = vmatpush.bf16.msra.mxu3 %v5334_v31  ;;  %v5338_v31 = vor.u32 %v7101_v22, %v5335_v23  ;;  %v5185_v23 = vld [vmem:[%s8280_s15 + $0x78] sm:$0xf] }
 0x27a   : > { %4019 = vmatpush.bf16.msrb.mxu0 %v5542_v44 }
 0x27b   : > { %4082 = vmatpush.bf16.msrb.mxu1 %v5650_v38  ;;  %v7497_v38 = vld [vmem:[%s8280_s15 + $0xe08] sm:$0xf0] }
 0x27c   : > { %4095 = vmatpush.bf16.msrb.mxu2 %v6066_v41  ;;  %v5341_v41 = vld [vmem:[%s8280_s15 + $0x1b0] sm:$0xf]  ;;  %v6894_v44 = vor.u32 %v7497_v38, %v6893_v37  ;;  %v7056_v37 = vld [vmem:[%s8280_s15 + $0x40] sm:$0xf0] }
 0x27d   : > { %4003 = vmatpush.bf16.msra.mxu3 %v5282_v45  ;;  %4020 = vmatmul.bf16.vlgmr.msrb.gmra.mxu0 %v8687_v17  ;;  %v5757_v45 = vld [vmem:[%s8280_s15 + $0x4f0] sm:$0xf] }
 0x27e   : > { %4064 = vmatpush.bf16.msra.mxu0 %v5494_v48  ;;  %v5231_v48 = vld [vmem:[%s8280_s15 + $0x10c] sm:$0xf0]  ;;  %v5758_v54 = vor.u32 %v7212_v46, %v5757_v45  ;;  %v5499_v45 = vld [vmem:[%s8280_s15 + $0x31c] sm:$0xf0]  ;;  %v7478_v46 = vld [vmem:[%s8280_s15 + $0xd74] sm:$0xf] }
 0x27f   : > { %4083 = vmatpush.bf16.msrb.mxu1 %v5598_v52  ;;  %v5342_v52 = vor.u32 %v7108_v42, %v5341_v41  ;;  %v5549_v38 = vld [vmem:[%s8280_s15 + $0x350] sm:$0xf]  ;;  %v7511_v41 = vld [vmem:[%s8280_s15 + $0xe78] sm:$0xf0] }
 0x280   : > { %4096 = vmatpush.bf16.msrb.mxu2 %v6014_v57  ;;  %v5234_v57 = vor.u32 %v7075_v47, %v5231_v48  ;;  %v5134_v47 = vor.u32 %v7056_v37, %v5133_v36  ;;  %v6843_v48 = vld [vmem:[%s8280_s15 + $0xda4] sm:$0xf0]  ;;  %v7089_v37 = vld [vmem:[%s8280_s15 + $0x14c] sm:$0xf] }
 0x281   : > { %4004 = vmatpush.bf16.msra.mxu3 %v5230_v61  ;;  %v7062_v61 = vld [vmem:[%s8280_s15 + $0x74] sm:$0xf] }
 0x282   : > { %4065 = vmatpush.bf16.msra.mxu0 %v5442_v1  ;;  %v5290_v1 = vor.u32 %v7095_v56, %v5289_v55  ;;  %v5182_v8 = vor.u32 %v7062_v61, %v5179_v62  ;;  %v6901_v56 = vld [vmem:[%s8280_s15 + $0xde0] sm:$0xf]  ;;  %v5447_v61 = vld [vmem:[%s8280_s15 + $0x2b4] sm:$0xf0]  ;;  %v7465_v62 = vld [vmem:[%s8280_s15 + $0xd0c] sm:$0xf] }
 0x283   : > { %4084 = vmatpush.bf16.msrb.mxu1 %v5546_v6  ;;  %v5237_v6 = vld [vmem:[%s8280_s15 + $0xe0] sm:$0xf] }
 0x284   : > { %4097 = vmatpush.bf16.msrb.mxu2 %v5962_v9  ;;  %v6790_v9 = vor.u32 %v7471_v0, %v6789_v63  ;;  %v5238_v18 = vor.u32 %v7082_v7, %v5237_v6  ;;  %v6791_v63 = vld [vmem:[%s8280_s15 + $0xd3c] sm:$0xf0]  ;;  %v7400_v0 = vld [vmem:[%s8280_s15 + $0xb04] sm:$0xf]  ;;  %v5450_v6 = vor.u32 %v7128_v60, %v5447_v61  ;;  %v6849_v7 = vld [vmem:[%s8280_s15 + $0xd78] sm:$0xf] }
 0x285   : > { %4005 = vmatpush.bf16.msra.mxu3 %v5178_v14  ;;  %v7049_v14 = vld [vmem:[%s8280_s15 + $0xc] sm:$0xf]  ;;  %v6537_v60 = vld [vmem:[%s8280_s15 + $0xb08] sm:$0xf]  ;;  %v7407_v61 = vld [vmem:[%s8280_s15 + $0xb38] sm:$0xf0] }
 0x286   : > { %4066 = vmatpush.bf16.msra.mxu0 %v5390_v19  ;;  %4085 = vmatmul.bf16.vlgmr.msrb.gmra.mxu1 %v8687_v17  ;;  %v6947_v19 = vld [vmem:[%s8280_s15 + $0xe74] sm:$0xf0]  ;;  %v5130_v25 = vor.u32 %v7049_v14, %v5127_v15  ;;  %v7387_v15 = vld [vmem:[%s8280_s15 + $0xa9c] sm:$0xf] }
 0x287   : > { %4129 = vmatpush.bf16.msra.mxu1 %v5498_v11  ;;  %4098 = vmatmul.bf16.vlgmr.msrb.gmra.mxu2 %v8664_v51  ;;  %v5653_v11 = vld [vmem:[%s8280_s15 + $0x420] sm:$0xf] }
 0x288   : > { %4142 = vmatpush.bf16.msra.mxu2 %v5914_v13  ;;  %v6742_v13 = vor.u32 %v7452_v2, %v6739_v3  ;;  %v5654_v22 = vor.u32 %v7186_v12, %v5653_v11  ;;  %v6745_v3 = vld [vmem:[%s8280_s15 + $0xca8] sm:$0xf]  ;;  %v7115_v12 = vld [vmem:[%s8280_s15 + $0x21c] sm:$0xf] }
 0x289   : > { %4006 = vmatpush.bf16.msra.mxu3 %v5126_v28  ;;  %v6950_v28 = vor.u32 %v7504_v16, %v6947_v19  ;;  %v6479_v16 = vld [vmem:[%s8280_s15 + $0xacc] sm:$0xf0]  ;;  %v6693_v19 = vld [vmem:[%s8280_s15 + $0xc40] sm:$0xf] }
 0x28a   : > { %4067 = vmatpush.bf16.msra.mxu0 %v5338_v31  ;;  %v5186_v31 = vor.u32 %v7069_v24, %v5185_v23  ;;  %v7472_v23 = vld [vmem:[%s8280_s15 + $0xd40] sm:$0xf0]  ;;  %v7102_v24 = vld [vmem:[%s8280_s15 + $0x1b4] sm:$0xf] }
 0x28b   : > { %4130 = vmatpush.bf16.msra.mxu1 %v5446_v26  ;;  %v5601_v26 = vld [vmem:[%s8280_s15 + $0x3b8] sm:$0xf] }
 0x28c   : > { %4143 = vmatpush.bf16.msra.mxu2 %v5862_v27  ;;  %4007 = vmatmul.bf16.vlgmr.msra.gmra.mxu3 %v8680_v10  ;;  %v7173_v27 = vld [vmem:[%s8280_s15 + $0x3e8] sm:$0xf0] }
 0x28d   : > { %4055 = vmatpush.bf16.msrb.mxu3 %v6946_v32  ;;  %v6895_v32 = vld [vmem:[%s8280_s15 + $0xe0c] sm:$0xf0]  ;;  %v5602_v35 = vor.u32 %v7173_v27, %v5601_v26  ;;  %v5343_v26 = vld [vmem:[%s8280_s15 + $0x1e4] sm:$0xf0]  ;;  %v7453_v27 = vld [vmem:[%s8280_s15 + $0xcac] sm:$0xf] }
 0x28e   : > { %4068 = vmatpush.bf16.msra.mxu0 %v5286_v43  ;;  %v6898_v42 = vor.u32 %v7491_v30, %v6895_v32  ;;  %v6638_v43 = vor.u32 %v7426_v33, %v6635_v34  ;;  %v7374_v30 = vld [vmem:[%s8280_s15 + $0xa34] sm:$0xf]  ;;  %v6641_v33 = vld [vmem:[%s8280_s15 + $0xbd8] sm:$0xf]  ;;  %v7433_v34 = vld [vmem:[%s8280_s15 + $0xc08] sm:$0xf0] }
 0x28f   : > { %4131 = vmatpush.bf16.msra.mxu1 %v5394_v39  ;;  %v7160_v39 = vld [vmem:[%s8280_s15 + $0x380] sm:$0xf0] }
 0x290   : > { %4144 = vmatpush.bf16.msra.mxu2 %v5810_v40  ;;  %v6953_v40 = vld [vmem:[%s8280_s15 + $0xe48] sm:$0xf] }
 0x291   : > { %4056 = vmatpush.bf16.msrb.mxu3 %v6894_v44  ;;  %v7141_v44 = vld [vmem:[%s8280_s15 + $0x2ec] sm:$0xf] }
 0x292   : > { %4069 = vmatpush.bf16.msra.mxu0 %v5234_v57  ;;  %v5502_v55 = vor.u32 %v7141_v44, %v5499_v45  ;;  %v7498_v57 = vld [vmem:[%s8280_s15 + $0xe10] sm:$0xf0]  ;;  %v6375_v44 = vld [vmem:[%s8280_s15 + $0x9fc] sm:$0xf0]  ;;  %v6589_v45 = vld [vmem:[%s8280_s15 + $0xb70] sm:$0xf] }
 0x293   : > { %4132 = vmatpush.bf16.msra.mxu1 %v5342_v52  ;;  %v5550_v52 = vor.u32 %v7160_v39, %v5549_v38  ;;  %v6902_v2 = vor.u32 %v7498_v57, %v6901_v56  ;;  %v5291_v39 = vld [vmem:[%s8280_s15 + $0x17c] sm:$0xf0]  ;;  %v7427_v57 = vld [vmem:[%s8280_s15 + $0xbdc] sm:$0xf] }
 0x294   : > { %4145 = vmatpush.bf16.msra.mxu2 %v5758_v54  ;;  %v6954_v54 = vor.u32 %v7511_v41, %v6953_v40  ;;  %v7440_v40 = vld [vmem:[%s8280_s15 + $0xc44] sm:$0xf]  ;;  %v6695_v41 = vld [vmem:[%s8280_s15 + $0xc74] sm:$0xf0] }
 0x295   : > { %4057 = vmatpush.bf16.msrb.mxu3 %v6842_v53  ;;  %v6846_v53 = vor.u32 %v7478_v46, %v6843_v48  ;;  %v7420_v46 = vld [vmem:[%s8280_s15 + $0xba0] sm:$0xf0]  ;;  %v6698_v48 = vor.u32 %v7440_v40, %v6695_v41  ;;  %v6121_v40 = vld [vmem:[%s8280_s15 + $0x7c8] sm:$0xf]  ;;  %v7303_v41 = vld [vmem:[%s8280_s15 + $0x7f8] sm:$0xf0] }
 0x296   : > { %4070 = vmatpush.bf16.msra.mxu0 %v5182_v8  ;;  %v7485_v8 = vld [vmem:[%s8280_s15 + $0xda8] sm:$0xf0]  ;;  %v6590_v56 = vor.u32 %v7420_v46, %v6589_v45 }
 0x297   : > { %4133 = vmatpush.bf16.msra.mxu1 %v5290_v1  ;;  %v6531_v1 = vld [vmem:[%s8280_s15 + $0xb34] sm:$0xf0] }
 0x298   : > { %4146 = vmatpush.bf16.msra.mxu2 %v5706_v4  ;;  %v7459_v4 = vld [vmem:[%s8280_s15 + $0xcd8] sm:$0xf0]  ;;  %v6534_v11 = vor.u32 %v7400_v0, %v6531_v1  ;;  %v7342_v0 = vld [vmem:[%s8280_s15 + $0x930] sm:$0xf0] }
 0x299   : > { %4058 = vmatpush.bf16.msrb.mxu3 %v6790_v9  ;;  %v6794_v9 = vor.u32 %v7465_v62, %v6791_v63  ;;  %v6746_v14 = vor.u32 %v7459_v4, %v6745_v3  ;;  %v6277_v63 = vld [vmem:[%s8280_s15 + $0x900] sm:$0xf]  ;;  %v5187_v3 = vld [vmem:[%s8280_s15 + $0xac] sm:$0xf0]  ;;  %v6538_v4 = vor.u32 %v7407_v61, %v6537_v60  ;;  %v7362_v60 = vld [vmem:[%s8280_s15 + $0x9d4] sm:$0xf] }
 0x29a   : > { %4071 = vmatpush.bf16.msra.mxu0 %v5130_v25  ;;  %v6482_v25 = vor.u32 %v7387_v15, %v6479_v16  ;;  %v7050_v16 = vld [vmem:[%s8280_s15 + $0x14] sm:$0xf] }
 0x29b   : > { %4134 = vmatpush.bf16.msra.mxu1 %v5238_v18  ;;  %v6850_v18 = vor.u32 %v7485_v8, %v6849_v7  ;;  %v6591_v7 = vld [vmem:[%s8280_s15 + $0xba4] sm:$0xf0]  ;;  %v6278_v8 = vor.u32 %v7342_v0, %v6277_v63  ;;  %v7466_v63 = vld [vmem:[%s8280_s15 + $0xd14] sm:$0xf] }
 0x29c   : > { %4147 = vmatpush.bf16.msra.mxu2 %v5654_v22  ;;  %6989 = vmatmul.msk.bf16.vlgmr.msrb.gmra.mxu3 %vm3865_vm8, %v8725_v5  ;;  %v6797_v22 = vld [vmem:[%s8280_s15 + $0xd10] sm:$0xf]  ;;  %v6799_v0 = vld [vmem:[%s8280_s15 + $0xd44] sm:$0xf0] }
 0x29d   : > { %4103 = vmatpush.bf16.msra.mxu3 %v6742_v13  ;;  %4072 = vmatmul.bf16.vlgmr.msra.gmra.mxu0 %v8680_v10  ;;  %v5395_v13 = vld [vmem:[%s8280_s15 + $0x24c] sm:$0xf0]  ;;  %v6798_v32 = vor.u32 %v7472_v23, %v6797_v22  ;;  %v7505_v22 = vld [vmem:[%s8280_s15 + $0xe4c] sm:$0xf]  ;;  %v6955_v23 = vld [vmem:[%s8280_s15 + $0xe7c] sm:$0xf0] }
 0x29e   : > { %4120 = vmatpush.bf16.msrb.mxu0 %v6950_v28  ;;  %v5398_v21 = vor.u32 %v7115_v12, %v5395_v13  ;;  %v6747_v28 = vld [vmem:[%s8280_s15 + $0xcdc] sm:$0xf0]  ;;  %v6225_v13 = vld [vmem:[%s8280_s15 + $0x898] sm:$0xf] }
 0x29f   : > { %4135 = vmatpush.bf16.msra.mxu1 %v5186_v31  ;;  %v6427_v31 = vld [vmem:[%s8280_s15 + $0xa64] sm:$0xf0]  ;;  %v6750_v36 = vor.u32 %v7453_v27, %v6747_v28  ;;  %v6173_v28 = vld [vmem:[%s8280_s15 + $0x830] sm:$0xf] }
 0x2a0   : > { %4148 = vmatpush.bf16.msra.mxu2 %v5602_v35  ;;  %v5346_v35 = vor.u32 %v7102_v24, %v5343_v26  ;;  %v6430_v38 = vor.u32 %v7374_v30, %v6427_v31  ;;  %v7381_v26 = vld [vmem:[%s8280_s15 + $0xa68] sm:$0xf0]  ;;  %v6958_v31 = vor.u32 %v7505_v22, %v6955_v23  ;;  %v6701_v22 = vld [vmem:[%s8280_s15 + $0xc48] sm:$0xf] }
 0x2a1   : > { %4104 = vmatpush.bf16.msra.mxu3 %v6690_v29  ;;  %v6694_v29 = vor.u32 %v7446_v20, %v6693_v19  ;;  %v7401_v19 = vld [vmem:[%s8280_s15 + $0xb0c] sm:$0xf] }
 0x2a2   : > { %4121 = vmatpush.bf16.msrb.mxu0 %v6898_v42  ;;  %v6642_v42 = vor.u32 %v7433_v34, %v6641_v33  ;;  %v6487_v34 = vld [vmem:[%s8280_s15 + $0xad4] sm:$0xf0] }
 0x2a3   : > { %4136 = vmatpush.bf16.msra.mxu1 %v5134_v47  ;;  %v5294_v47 = vor.u32 %v7089_v37, %v5291_v39  ;;  %v7368_v39 = vld [vmem:[%s8280_s15 + $0xa00] sm:$0xf0] }
 0x2a4   : > { %4149 = vmatpush.bf16.msra.mxu2 %v5550_v52 }
 0x2a5   : > { %4105 = vmatpush.bf16.msra.mxu3 %v6638_v43  ;;  %v7361_v43 = vld [vmem:[%s8280_s15 + $0x9cc] sm:$0xf] }
 0x2a6   : > { %4122 = vmatpush.bf16.msrb.mxu0 %v6846_v53  ;;  %4137 = vmatmul.bf16.vlgmr.msra.gmra.mxu1 %v8680_v10  ;;  %v6378_v52 = vor.u32 %v7361_v43, %v6375_v44  ;;  %v6643_v53 = vld [vmem:[%s8280_s15 + $0xc0c] sm:$0xf0]  ;;  %v6331_v43 = vld [vmem:[%s8280_s15 + $0x99c] sm:$0xf0] }
 0x2a7   : > { %4185 = vmatpush.bf16.msrb.mxu1 %v6954_v54  ;;  %4150 = vmatmul.bf16.vlgmr.msra.gmra.mxu2 %v8687_v17  ;;  %v7076_v54 = vld [vmem:[%s8280_s15 + $0xe4] sm:$0xf]  ;;  %v6646_v1 = vor.u32 %v7427_v57, %v6643_v53  ;;  %v6279_v53 = vld [vmem:[%s8280_s15 + $0x934] sm:$0xf0] }
 0x2a8   : > { %4194 = vmatpush.bf16.msrb.mxu2 %v5502_v55  ;;  %v5239_v55 = vld [vmem:[%s8280_s15 + $0x114] sm:$0xf0]  ;;  %v7336_v57 = vld [vmem:[%s8280_s15 + $0x904] sm:$0xf] }
 0x2a9   : > { %4106 = vmatpush.bf16.msra.mxu3 %v6586_v59  ;;  %v6330_v59 = vor.u32 %v7355_v50, %v6329_v49  ;;  %v5242_v62 = vor.u32 %v7076_v54, %v5239_v55  ;;  %v6122_v49 = vor.u32 %v7303_v41, %v6121_v40  ;;  %v6851_v54 = vld [vmem:[%s8280_s15 + $0xdac] sm:$0xf0]  ;;  %v6069_v55 = vld [vmem:[%s8280_s15 + $0x760] sm:$0xf] }
 0x2aa   : > { %4123 = vmatpush.bf16.msrb.mxu0 %v6794_v9  ;;  %v6485_v9 = vld [vmem:[%s8280_s15 + $0xaa0] sm:$0xf] }
 0x2ab   : > { %4186 = vmatpush.bf16.msrb.mxu1 %v6902_v2  ;;  %v7063_v2 = vld [vmem:[%s8280_s15 + $0x7c] sm:$0xf] }
 0x2ac   : > { %4195 = vmatpush.bf16.msrb.mxu2 %v5450_v6  ;;  %v7414_v6 = vld [vmem:[%s8280_s15 + $0xb74] sm:$0xf]  ;;  %v5190_v12 = vor.u32 %v7063_v2, %v5187_v3  ;;  %v6282_v2 = vor.u32 %v7336_v57, %v6279_v53  ;;  %v6337_v3 = vld [vmem:[%s8280_s15 + $0x970] sm:$0xf]  ;;  %v6597_v53 = vld [vmem:[%s8280_s15 + $0xb78] sm:$0xf] }
 0x2ad   : > { %4107 = vmatpush.bf16.msra.mxu3 %v6534_v11  ;;  %6990 = vmatmul.msk.bf16.vlgmr.msrb.gmra.mxu0 %vm3865_vm8, %v8725_v5  ;;  %v7394_v11 = vld [vmem:[%s8280_s15 + $0xad0] sm:$0xf0]  ;;  %v6594_v15 = vor.u32 %v7414_v6, %v6591_v7  ;;  %v6753_v6 = vld [vmem:[%s8280_s15 + $0xcb0] sm:$0xf] }
 0x2ae   : > { %4168 = vmatpush.bf16.msra.mxu0 %v6746_v14  ;;  %v7329_v14 = vld [vmem:[%s8280_s15 + $0x8c8] sm:$0xf0]  ;;  %v6486_v20 = vor.u32 %v7394_v11, %v6485_v9  ;;  %v6017_v9 = vld [vmem:[%s8280_s15 + $0x6f8] sm:$0xf] }
 0x2af   : > { %4187 = vmatpush.bf16.msrb.mxu1 %v6850_v18  ;;  %v5135_v18 = vld [vmem:[%s8280_s15 + $0x44] sm:$0xf0]  ;;  %v6226_v24 = vor.u32 %v7329_v14, %v6225_v13  ;;  %v7277_v11 = vld [vmem:[%s8280_s15 + $0x728] sm:$0xf0]  ;;  %v7323_v13 = vld [vmem:[%s8280_s15 + $0x89c] sm:$0xf] }
 0x2b0   : > { %4196 = vmatpush.bf16.msrb.mxu2 %v5398_v21  ;;  %v6539_v21 = vld [vmem:[%s8280_s15 + $0xb3c] sm:$0xf0]  ;;  %v5138_v27 = vor.u32 %v7050_v16, %v5135_v18  ;;  %v6227_v14 = vld [vmem:[%s8280_s15 + $0x8cc] sm:$0xf0] }
 0x2b1   : > { %4108 = vmatpush.bf16.msra.mxu3 %v6482_v25  ;;  %v6433_v25 = vld [vmem:[%s8280_s15 + $0xa38] sm:$0xf]  ;;  %v6542_v30 = vor.u32 %v7401_v19, %v6539_v21  ;;  %v6018_v19 = vor.u32 %v7277_v11, %v6017_v9  ;;  %v7343_v21 = vld [vmem:[%s8280_s15 + $0x938] sm:$0xf0]  ;;  %v6230_v23 = vor.u32 %v7323_v13, %v6227_v14  ;;  %v7304_v9 = vld [vmem:[%s8280_s15 + $0x800] sm:$0xf0] }
 0x2b2   : > { %4169 = vmatpush.bf16.msra.mxu0 %v6694_v29  ;;  %v7316_v29 = vld [vmem:[%s8280_s15 + $0x860] sm:$0xf0]  ;;  %v6434_v33 = vor.u32 %v7381_v26, %v6433_v25  ;;  %v5965_v25 = vld [vmem:[%s8280_s15 + $0x690] sm:$0xf] }
 0x2b3   : > { %4188 = vmatpush.bf16.msrb.mxu1 %v6798_v32  ;;  %v7388_v32 = vld [vmem:[%s8280_s15 + $0xaa4] sm:$0xf]  ;;  %v6174_v37 = vor.u32 %v7316_v29, %v6173_v28  ;;  %v6175_v28 = vld [vmem:[%s8280_s15 + $0x864] sm:$0xf0]  ;;  %v6545_v13 = vld [vmem:[%s8280_s15 + $0xb10] sm:$0xf] }
 0x2b4   : > { %4197 = vmatpush.bf16.msrb.mxu2 %v5346_v35  ;;  %v7492_v35 = vld [vmem:[%s8280_s15 + $0xde4] sm:$0xf]  ;;  %v6490_v44 = vor.u32 %v7388_v32, %v6487_v34  ;;  %v7245_v32 = vld [vmem:[%s8280_s15 + $0x62c] sm:$0xf] }
 0x2b5   : > { %4109 = vmatpush.bf16.msra.mxu3 %v6430_v38  ;;  %v6381_v38 = vld [vmem:[%s8280_s15 + $0x9d0] sm:$0xf]  ;;  %v7264_v26 = vld [vmem:[%s8280_s15 + $0x6c0] sm:$0xf0] }
 0x2b6   : > { %4170 = vmatpush.bf16.msra.mxu0 %v6642_v42  ;;  %6991 = vmatmul.msk.bf16.vlgmr.msrb.gmra.mxu1 %vm3865_vm8, %v8725_v5  ;;  %v7349_v42 = vld [vmem:[%s8280_s15 + $0x96c] sm:$0xf]  ;;  %v6382_v46 = vor.u32 %v7368_v39, %v6381_v38  ;;  %v7330_v38 = vld [vmem:[%s8280_s15 + $0x8d0] sm:$0xf0]  ;;  %v7408_v14 = vld [vmem:[%s8280_s15 + $0xb40] sm:$0xf0] }
 0x2b7   : > { %4233 = vmatpush.bf16.msra.mxu1 %v6750_v36  ;;  %v6903_v36 = vld [vmem:[%s8280_s15 + $0xe14] sm:$0xf0]  ;;  %v6334_v50 = vor.u32 %v7349_v42, %v6331_v43  ;;  %v9009_v29 = vld [vmem:[%s9006_s18] sm:$0xff] }
 0x2b8   : > { %4198 = vmatpush.bf16.msrb.mxu2 %v5294_v47  ;;  %v6906_v45 = vor.u32 %v7492_v35, %v6903_v36  ;;  %v7375_v47 = vld [vmem:[%s8280_s15 + $0xa3c] sm:$0xf]  ;;  %v5966_v36 = vor.u32 %v7264_v26, %v5965_v25  ;;  %v1463_v41 = vperm.slane %v9009_v29, 0  ;;  %v6649_v42 = vld [vmem:[%s8280_s15 + $0xbe0] sm:$0xf]  ;;  %v6546_v25 = vor.u32 %v7408_v14, %v6545_v13 }
 0x2b9   : > { %4110 = vmatpush.bf16.msra.mxu3 %v6378_v52  ;;  %v7479_v52 = vld [vmem:[%s8280_s15 + $0xd7c] sm:$0xf]  ;;  %v7434_v43 = vld [vmem:[%s8280_s15 + $0xc10] sm:$0xf0]  ;;  %v5603_v13 = vld [vmem:[%s8280_s15 + $0x3ec] sm:$0xf0] }
 0x2ba   : > { %4171 = vmatpush.bf16.msra.mxu0 %v6590_v56  ;;  %v7290_v56 = vld [vmem:[%s8280_s15 + $0x790] sm:$0xf0]  ;;  %v6854_v61 = vor.u32 %v7479_v52, %v6851_v54  ;;  %v6650_v52 = vor.u32 %v7434_v43, %v6649_v42  ;;  %v6181_v54 = vld [vmem:[%s8280_s15 + $0x838] sm:$0xf]  ;;  %v7291_v26 = vld [vmem:[%s8280_s15 + $0x798] sm:$0xf0] }
 0x2bb   : > { %4234 = vmatpush.bf16.msra.mxu1 %v6698_v48  ;;  %v6435_v48 = vld [vmem:[%s8280_s15 + $0xa6c] sm:$0xf0]  ;;  %v6025_v42 = vld [vmem:[%s8280_s15 + $0x700] sm:$0xf]  ;;  %v7278_v43 = vld [vmem:[%s8280_s15 + $0x730] sm:$0xf0] }
 0x2bc   : > { %4199 = vmatpush.bf16.msrb.mxu2 %v5242_v62  ;;  %4111 = vmatmul.bf16.vlgmr.msra.gmra.mxu3 %v8669_v58  ;;  %v6383_v62 = vld [vmem:[%s8280_s15 + $0xa04] sm:$0xf0]  ;;  %v5817_v14 = vld [vmem:[%s8280_s15 + $0x560] sm:$0xf] }
 0x2bd   : > { %4155 = vmatpush.bf16.msrb.mxu3 %v6330_v59  ;;  %v6438_v59 = vor.u32 %v7375_v47, %v6435_v48  ;;  %v7232_v48 = vld [vmem:[%s8280_s15 + $0x5c4] sm:$0xf] }
 0x2be   : > { %4172 = vmatpush.bf16.msra.mxu0 %v6538_v4  ;;  %v7356_v4 = vld [vmem:[%s8280_s15 + $0x9a0] sm:$0xf0] }
 0x2bf   : > { %4235 = vmatpush.bf16.msra.mxu1 %v6646_v1  ;;  %v6070_v1 = vor.u32 %v7290_v56, %v6069_v55  ;;  %v6338_v16 = vor.u32 %v7356_v4, %v6337_v3  ;;  %v7317_v55 = vld [vmem:[%s8280_s15 + $0x868] sm:$0xf0]  ;;  %v5811_v3 = vld [vmem:[%s8280_s15 + $0x58c] sm:$0xf0] }
 0x2c0   : > { %4200 = vmatpush.bf16.msrb.mxu2 %v5190_v12  ;;  %v6386_v12 = vor.u32 %v7362_v60, %v6383_v62  ;;  %v6071_v62 = vld [vmem:[%s8280_s15 + $0x794] sm:$0xf0] }
 0x2c1   : > { %4156 = vmatpush.bf16.msrb.mxu3 %v6278_v8  ;;  %v7460_v8 = vld [vmem:[%s8280_s15 + $0xce0] sm:$0xf0] }
 0x2c2   : > { %4173 = vmatpush.bf16.msra.mxu0 %v6486_v20  ;;  %v6754_v18 = vor.u32 %v7460_v8, %v6753_v6  ;;  %v6285_v20 = vld [vmem:[%s8280_s15 + $0x908] sm:$0xf]  ;;  %v6129_v8 = vld [vmem:[%s8280_s15 + $0x7d0] sm:$0xf] }
 0x2c3   : > { %4236 = vmatpush.bf16.msra.mxu1 %v6594_v15  ;;  %v8988_v7 = vpop.f32.mrf.mxu1  ;;  %v6802_v15 = vor.u32 %v7466_v63, %v6799_v0 }
 0x2c4   : > { %4201 = vmatpush.bf16.msrb.mxu2 %v5138_v27  ;;  %v7310_v27 = vld [vmem:[%s8280_s15 + $0x834] sm:$0xf] }
 0x2c5   : > { %4157 = vmatpush.bf16.msrb.mxu3 %v6226_v24  ;;  %v7447_v24 = vld [vmem:[%s8280_s15 + $0xc78] sm:$0xf0]  ;;  %v6178_v40 = vor.u32 %v7310_v27, %v6175_v28  ;;  %v6493_v28 = vld [vmem:[%s8280_s15 + $0xaa8] sm:$0xf] }
 0x2c6   : > { %4174 = vmatpush.bf16.msra.mxu0 %v6434_v33  ;;  %v5915_v33 = vld [vmem:[%s8280_s15 + $0x65c] sm:$0xf0]  ;;  %v6702_v35 = vor.u32 %v7447_v24, %v6701_v22  ;;  %v5759_v22 = vld [vmem:[%s8280_s15 + $0x524] sm:$0xf0] }
 0x2c7   : > { %4237 = vmatpush.bf16.msra.mxu1 %v6542_v30  ;;  %4202 = vmatmul.bf16.vlgmr.msrb.gmra.mxu2 %v8680_v10 }
 0x2c8   : > { %4250 = vmatpush.bf16.msra.mxu2 %v6958_v31  ;;  %v6286_v31 = vor.u32 %v7343_v21, %v6285_v20  ;;  %v6130_v20 = vor.u32 %v7304_v9, %v6129_v8  ;;  %v7206_v21 = vld [vmem:[%s8280_s15 + $0x4f4] sm:$0xf]  ;;  %v7167_v8 = vld [vmem:[%s8280_s15 + $0x3bc] sm:$0xf] }
 0x2c9   : > { %4158 = vmatpush.bf16.msrb.mxu3 %v6174_v37  ;;  %v3891_v30 = vpop.f32.mrf.mxu0  ;;  %v6233_v37 = vld [vmem:[%s8280_s15 + $0x8a0] sm:$0xf] }
 0x2ca   : > { %4175 = vmatpush.bf16.msra.mxu0 %v6382_v46  ;;  %v3917_v34 = vpop.f32.mrf.mxu2  ;;  %v6123_v46 = vld [vmem:[%s8280_s15 + $0x7fc] sm:$0xf0]  ;;  %v6234_v47 = vor.u32 %v7330_v38, %v6233_v37  ;;  %v5921_v38 = vld [vmem:[%s8280_s15 + $0x630] sm:$0xf] }
 0x2cb   : > { %4238 = vmatpush.bf16.msra.mxu1 %v6490_v44  ;;  %v3906_v39 = vpop.f32.mrf.mxu1  ;;  %v5918_v44 = vor.u32 %v7245_v32, %v5915_v33  ;;  %v7258_v32 = vld [vmem:[%s8280_s15 + $0x694] sm:$0xf]  ;;  %v5967_v33 = vld [vmem:[%s8280_s15 + $0x6c4] sm:$0xf0]  ;;  %v5707_v37 = vld [vmem:[%s8280_s15 + $0x4bc] sm:$0xf0] }
 0x2cc   : > { %4251 = vmatpush.bf16.msra.mxu2 %v6906_v45  ;;  %v7297_v45 = vld [vmem:[%s8280_s15 + $0x7cc] sm:$0xf]  ;;  %v7252_v39 = vld [vmem:[%s8280_s15 + $0x660] sm:$0xf0] }
 0x2cd   : > { %4159 = vmatpush.bf16.msrb.mxu3 %v6122_v49  ;;  %4176 = vmatmul.bf16.vlgmr.msra.gmra.mxu0 %v8669_v58  ;;  %v5863_v49 = vld [vmem:[%s8280_s15 + $0x5f4] sm:$0xf0]  ;;  %v6126_v57 = vor.u32 %v7297_v45, %v6123_v46  ;;  %v5970_v45 = vor.u32 %v7258_v32, %v5967_v33  ;;  %v6441_v46 = vld [vmem:[%s8280_s15 + $0xa40] sm:$0xf] }
 0x2ce   : > { %4220 = vmatpush.bf16.msrb.mxu0 %v6334_v50  ;;  %v3878_v50 = vpop.f32.mrf.mxu3  ;;  %v5866_v60 = vor.u32 %v7232_v48, %v5863_v49  ;;  %v5922_v49 = vor.u32 %v7252_v39, %v5921_v38  ;;  %v7220_v38 = vld [vmem:[%s8280_s15 + $0x564] sm:$0xf]  ;;  %v5819_v39 = vld [vmem:[%s8280_s15 + $0x594] sm:$0xf0] }
 0x2cf   : > { %4239 = vmatpush.bf16.msra.mxu1 %v6438_v59  ;;  %v3879_v56 = vadd.f32 %v3878_v50, %v1463_v41  ;;  %v7421_v59 = vld [vmem:[%s8280_s15 + $0xba8] sm:$0xf0]  ;;  %v7180_v50 = vld [vmem:[%s8280_s15 + $0x424] sm:$0xf] }
 0x2d0   : > { %4252 = vmatpush.bf16.msra.mxu2 %v6854_v61  ;;  %v7284_v61 = vld [vmem:[%s8280_s15 + $0x764] sm:$0xf]  ;;  %v6598_v6 = vor.u32 %v7421_v59, %v6597_v53  ;;  %v5973_v59 = vld [vmem:[%s8280_s15 + $0x698] sm:$0xf] }
 0x2d1   : > { %4160 = vmatpush.bf16.msrb.mxu3 %v6070_v1  ;;  %v3892_v63 = vadd.f32 %v3891_v30, %v3879_v56  ;;  %v3893_v0 = vpop.f32.mrf.mxu0  ;;  %v6182_v1 = vor.u32 %v7317_v55, %v6181_v54  ;;  %v7395_v30 = vld [vmem:[%s8280_s15 + $0xad8] sm:$0xf0]  ;;  %v5655_v54 = vld [vmem:[%s8280_s15 + $0x454] sm:$0xf0]  ;;  %v5869_v55 = vld [vmem:[%s8280_s15 + $0x5c8] sm:$0xf] }
 0x2d2   : > { %4221 = vmatpush.bf16.msrb.mxu0 %v6282_v2  ;;  %v7219_v2 = vld [vmem:[%s8280_s15 + $0x55c] sm:$0xf]  ;;  %v3919_v4 = vpop.f32.mrf.mxu2  ;;  %v6494_v41 = vor.u32 %v7395_v30, %v6493_v28  ;;  %v7246_v0 = vld [vmem:[%s8280_s15 + $0x634] sm:$0xf]  ;;  %v5551_v28 = vld [vmem:[%s8280_s15 + $0x384] sm:$0xf0] }
 0x2d3   : > { %4240 = vmatpush.bf16.msra.mxu1 %v6386_v12  ;;  %v9036_v11 = vpop.f32.mrf.mxu1  ;;  %v6074_v12 = vor.u32 %v7284_v61, %v6071_v62  ;;  %v7239_v56 = vld [vmem:[%s8280_s15 + $0x5f8] sm:$0xf0]  ;;  %v6389_v61 = vld [vmem:[%s8280_s15 + $0x9d8] sm:$0xf]  ;;  %v7350_v4 = vld [vmem:[%s8280_s15 + $0x974] sm:$0xf] }
 0x2d4   : > { %4253 = vmatpush.bf16.msra.mxu2 %v6802_v15  ;;  %v3905_v15 = vadd.f32 %v8988_v7, %v3892_v63  ;;  %v6077_v7 = vld [vmem:[%s8280_s15 + $0x768] sm:$0xf]  ;;  %v7369_v63 = vld [vmem:[%s8280_s15 + $0xa08] sm:$0xf0]  ;;  %v5765_v30 = vld [vmem:[%s8280_s15 + $0x4f8] sm:$0xf] }
 0x2d5   : > { %4161 = vmatpush.bf16.msrb.mxu3 %v6018_v19  ;;  %v6019_v19 = vld [vmem:[%s8280_s15 + $0x72c] sm:$0xf0] }
 0x2d6   : > { %4222 = vmatpush.bf16.msrb.mxu0 %v6230_v23  ;;  %4241 = vmatmul.bf16.vlgmr.msra.gmra.mxu1 %v8669_v58  ;;  %v3918_v23 = vadd.f32 %v3917_v34, %v3905_v15  ;;  %v3880_v24 = vpop.f32.mrf.mxu3  ;;  %v7193_v34 = vld [vmem:[%s8280_s15 + $0x48c] sm:$0xf]  ;;  %v7226_v15 = vld [vmem:[%s8280_s15 + $0x590] sm:$0xf0] }
 0x2d7   : > { %4285 = vmatpush.bf16.msrb.mxu1 %v6338_v16  ;;  %6992 = vmatmul.msk.bf16.vlgmr.msra.gmra.mxu2 %vm3865_vm8, %v8725_v5  ;;  %v5814_v16 = vor.u32 %v7219_v2, %v5811_v3  ;;  %v5710_v48 = vor.u32 %v7193_v34, %v5707_v37  ;;  %v5658_v2 = vor.u32 %v7180_v50, %v5655_v54  ;;  %v5505_v34 = vld [vmem:[%s8280_s15 + $0x2f0] sm:$0xf]  ;;  %v5453_v54 = vld [vmem:[%s8280_s15 + $0x288] sm:$0xf] }
 0x2d8   : > { %4298 = vmatpush.bf16.msrb.mxu2 %v6754_v18  ;;  %v7271_v18 = vld [vmem:[%s8280_s15 + $0x6fc] sm:$0xf]  ;;  %v5870_v3 = vor.u32 %v7239_v56, %v5869_v55  ;;  %v5606_v24 = vor.u32 %v7167_v8, %v5603_v13  ;;  %v7122_v8 = vld [vmem:[%s8280_s15 + $0x250] sm:$0xf0] }
 0x2d9   : > { %4162 = vmatpush.bf16.msrb.mxu3 %v5966_v36  ;;  %v6022_v27 = vor.u32 %v7271_v18, %v6019_v19  ;;  %v6078_v36 = vor.u32 %v7291_v26, %v6077_v7  ;;  %v6390_v18 = vor.u32 %v7369_v63, %v6389_v61  ;;  %v7337_v7 = vld [vmem:[%s8280_s15 + $0x90c] sm:$0xf]  ;;  %v6287_v26 = vld [vmem:[%s8280_s15 + $0x93c] sm:$0xf0]  ;;  %v7135_v55 = vld [vmem:[%s8280_s15 + $0x2b8] sm:$0xf0] }
 0x2da   : > { %4223 = vmatpush.bf16.msrb.mxu0 %v6178_v40  ;;  %v9057_v40 = vpop.f32.mrf.mxu2  ;;  %v6290_v37 = vor.u32 %v7337_v7, %v6287_v26  ;;  %v7311_v61 = vld [vmem:[%s8280_s15 + $0x83c] sm:$0xf]  ;;  %v6183_v63 = vld [vmem:[%s8280_s15 + $0x86c] sm:$0xf0]  ;;  %v7194_v13 = vld [vmem:[%s8280_s15 + $0x494] sm:$0xf] }
 0x2db   : > { %4286 = vmatpush.bf16.msrb.mxu1 %v6286_v31  ;;  %v5762_v31 = vor.u32 %v7206_v21, %v5759_v22  ;;  %v7233_v22 = vld [vmem:[%s8280_s15 + $0x5cc] sm:$0xf]  ;;  %v5349_v26 = vld [vmem:[%s8280_s15 + $0x1b8] sm:$0xf] }
 0x2dc   : > { %4299 = vmatpush.bf16.msrb.mxu2 %v6702_v35  ;;  %4163 = vmatmul.bf16.vlgmr.msrb.gmra.mxu3 %v8664_v51  ;;  %v9052_v35 = vpop.f32.mrf.mxu0 }
 0x2dd   : > { %4207 = vmatpush.bf16.msra.mxu3 %v5918_v44  ;;  %v3971_v44 = vpop.f32.mrf.mxu1 }
 0x2de   : > { %4224 = vmatpush.bf16.msrb.mxu0 %v6126_v57  ;;  %v3930_v57 = vpop.f32.mrf.mxu3  ;;  %v6235_v44 = vld [vmem:[%s8280_s15 + $0x8d4] sm:$0xf0] }
 0x2df   : > { %4287 = vmatpush.bf16.msrb.mxu1 %v6234_v47  ;;  %v7382_v47 = vld [vmem:[%s8280_s15 + $0xa70] sm:$0xf0]  ;;  %v9070_v62 = vadd.f32 %v3930_v57, %v3918_v23  ;;  %v5871_v23 = vld [vmem:[%s8280_s15 + $0x5fc] sm:$0xf0] }
 0x2e0   : > { %4300 = vmatpush.bf16.msrb.mxu2 %v6650_v52  ;;  %v6026_v52 = vor.u32 %v7278_v43, %v6025_v42  ;;  %v6442_v53 = vor.u32 %v7382_v47, %v6441_v46  ;;  %v5874_v33 = vor.u32 %v7233_v22, %v5871_v23  ;;  %v7324_v43 = vld [vmem:[%s8280_s15 + $0x8a4] sm:$0xf]  ;;  %v5713_v46 = vld [vmem:[%s8280_s15 + $0x490] sm:$0xf]  ;;  %v7174_v22 = vld [vmem:[%s8280_s15 + $0x3f0] sm:$0xf0] }
 0x2e1   : > { %4208 = vmatpush.bf16.msra.mxu3 %v5866_v60  ;;  %v7265_v60 = vld [vmem:[%s8280_s15 + $0x6c8] sm:$0xf0]  ;;  %v7200_v47 = vld [vmem:[%s8280_s15 + $0x4c0] sm:$0xf0]  ;;  %v6238_v57 = vor.u32 %v7324_v43, %v6235_v44  ;;  %v7142_v44 = vld [vmem:[%s8280_s15 + $0x2f4] sm:$0xf] }
 0x2e2   : > { %4225 = vmatpush.bf16.msrb.mxu0 %v6074_v12  ;;  %v5974_v12 = vor.u32 %v7265_v60, %v5973_v59  ;;  %v5767_v59 = vld [vmem:[%s8280_s15 + $0x52c] sm:$0xf0]  ;;  %v5714_v60 = vor.u32 %v7200_v47, %v5713_v46  ;;  %v7096_v43 = vld [vmem:[%s8280_s15 + $0x180] sm:$0xf0] }
 0x2e3   : > { %4288 = vmatpush.bf16.msrb.mxu1 %v6182_v1  ;;  %v5923_v1 = vld [vmem:[%s8280_s15 + $0x664] sm:$0xf0]  ;;  %v7168_v47 = vld [vmem:[%s8280_s15 + $0x3c4] sm:$0xf] }
 0x2e4   : > { %4301 = vmatpush.bf16.msrb.mxu2 %v6598_v6  ;;  %v6339_v6 = vld [vmem:[%s8280_s15 + $0x9a4] sm:$0xf0]  ;;  %v3945_v9 = vpop.f32.mrf.mxu0  ;;  %v5926_v19 = vor.u32 %v7246_v0, %v5923_v1  ;;  %v5454_v0 = vor.u32 %v7135_v55, %v5453_v54  ;;  %v6027_v55 = vld [vmem:[%s8280_s15 + $0x734] sm:$0xf0] }
 0x2e5   : > { %4209 = vmatpush.bf16.msra.mxu3 %v5814_v16  ;;  %v3984_v16 = vpop.f32.mrf.mxu2  ;;  %v6342_v21 = vor.u32 %v7350_v4, %v6339_v6  ;;  %v5661_v1 = vld [vmem:[%s8280_s15 + $0x428] sm:$0xf]  ;;  %v5401_v6 = vld [vmem:[%s8280_s15 + $0x220] sm:$0xf] }
 0x2e6   : > { %4226 = vmatpush.bf16.msrb.mxu0 %v6022_v27  ;;  %v7154_v27 = vld [vmem:[%s8280_s15 + $0x354] sm:$0xf]  ;;  %v3932_v32 = vpop.f32.mrf.mxu3 }
 0x2e7   : > { %4289 = vmatpush.bf16.msrb.mxu1 %v6130_v20  ;;  %v9082_v20 = vpop.f32.mrf.mxu1 }
 0x2e8   : > { %4302 = vmatpush.bf16.msrb.mxu2 %v6546_v25  ;;  %v5818_v25 = vor.u32 %v7226_v15, %v5817_v14  ;;  %v5715_v14 = vld [vmem:[%s8280_s15 + $0x4c4] sm:$0xf0] }
 0x2e9   : > { %4210 = vmatpush.bf16.msra.mxu3 %v5762_v31  ;;  %v7213_v31 = vld [vmem:[%s8280_s15 + $0x528] sm:$0xf0]  ;;  %v5718_v7 = vor.u32 %v7194_v13, %v5715_v14  ;;  %v5929_v14 = vld [vmem:[%s8280_s15 + $0x638] sm:$0xf] }
 0x2ea   : > { %4227 = vmatpush.bf16.msrb.mxu0 %v5970_v45  ;;  %v5766_v42 = vor.u32 %v7213_v31, %v5765_v30  ;;  %v7181_v30 = vld [vmem:[%s8280_s15 + $0x42c] sm:$0xf]  ;;  %v5663_v31 = vld [vmem:[%s8280_s15 + $0x45c] sm:$0xf0] }
 0x2eb   : > { %4290 = vmatpush.bf16.msrb.mxu1 %v6078_v36  ;;  %v7148_v36 = vld [vmem:[%s8280_s15 + $0x320] sm:$0xf0] }
 0x2ec   : > { %4303 = vmatpush.bf16.msrb.mxu2 %v6494_v41  ;;  %v5554_v41 = vor.u32 %v7154_v27, %v5551_v28  ;;  %v5506_v45 = vor.u32 %v7148_v36, %v5505_v34  ;;  %v7109_v27 = vld [vmem:[%s8280_s15 + $0x1e8] sm:$0xf0]  ;;  %v6079_v34 = vld [vmem:[%s8280_s15 + $0x79c] sm:$0xf0] }
 0x2ed   : > { %4211 = vmatpush.bf16.msra.mxu3 %v5710_v48  ;;  %4228 = vmatmul.bf16.vlgmr.msrb.gmra.mxu0 %v8664_v51  ;;  %v1464_v48 = vperm.slane %v9009_v29, 1  ;;  %v9103_v50 = vpop.f32.mrf.mxu2  ;;  %v5350_v36 = vor.u32 %v7109_v27, %v5349_v26  ;;  %v7136_v26 = vld [vmem:[%s8280_s15 + $0x2c0] sm:$0xf0] }
 0x2ee   : > { %4272 = vmatpush.bf16.msra.mxu0 %v5922_v49  ;;  %v3995_v49 = vpop.f32.mrf.mxu0 }
 0x2ef   : > { %4291 = vmatpush.bf16.msrb.mxu1 %v6026_v52  ;;  %v5822_v52 = vor.u32 %v7220_v38, %v5819_v39  ;;  %v4036_v56 = vpop.f32.mrf.mxu1  ;;  %v3956_v9 = vpop.f32.mrf.mxu3  ;;  %v7161_v38 = vld [vmem:[%s8280_s15 + $0x388] sm:$0xf0]  ;;  %v5297_v39 = vld [vmem:[%s8280_s15 + $0x150] sm:$0xf] }
 0x2f0   : > { %4304 = vmatpush.bf16.msrb.mxu2 %v6442_v53  ;;  %v7207_v53 = vld [vmem:[%s8280_s15 + $0x4fc] sm:$0xf]  ;;  %v5298_v56 = vor.u32 %v7096_v43, %v5297_v39  ;;  %v7512_v39 = vld [vmem:[%s8280_s15 + $0xe80] sm:$0xf0] }
 0x2f1   : > { %4212 = vmatpush.bf16.msra.mxu3 %v5658_v2  ;;  %v7187_v2 = vld [vmem:[%s8280_s15 + $0x458] sm:$0xf0]  ;;  %v5770_v4 = vor.u32 %v7207_v53, %v5767_v59  ;;  %v5245_v53 = vld [vmem:[%s8280_s15 + $0xe8] sm:$0xf] }
 0x2f2   : > { %4273 = vmatpush.bf16.msra.mxu0 %v5870_v3  ;;  %v3944_v3 = vadd.f32 %v9052_v35, %v1464_v48  ;;  %v5662_v16 = vor.u32 %v7187_v2, %v5661_v1  ;;  %v7298_v35 = vld [vmem:[%s8280_s15 + $0x7d4] sm:$0xf]  ;;  %v5611_v48 = vld [vmem:[%s8280_s15 + $0x3f4] sm:$0xf0]  ;;  %v5455_v1 = vld [vmem:[%s8280_s15 + $0x2bc] sm:$0xf0] }
 0x2f3   : > { %4292 = vmatpush.bf16.msrb.mxu1 %v5974_v12  ;;  %v6186_v12 = vor.u32 %v7311_v61, %v6183_v63  ;;  %v5614_v61 = vor.u32 %v7168_v47, %v5611_v48  ;;  %v7083_v63 = vld [vmem:[%s8280_s15 + $0x118] sm:$0xf0]  ;;  %v7090_v48 = vld [vmem:[%s8280_s15 + $0x154] sm:$0xf] }
 0x2f4   : > { %4305 = vmatpush.bf16.msrb.mxu2 %v6390_v18  ;;  %v3957_v15 = vadd.f32 %v3956_v9, %v3944_v3  ;;  %v6131_v18 = vld [vmem:[%s8280_s15 + $0x804] sm:$0xf0]  ;;  %v7155_v3 = vld [vmem:[%s8280_s15 + $0x35c] sm:$0xf]  ;;  %v7149_v9 = vld [vmem:[%s8280_s15 + $0x328] sm:$0xf0] }
 0x2f5   : > { %4213 = vmatpush.bf16.msra.mxu3 %v5606_v24  ;;  %v6134_v28 = vor.u32 %v7298_v35, %v6131_v18  ;;  %v7070_v18 = vld [vmem:[%s8280_s15 + $0xb0] sm:$0xf0]  ;;  %v7123_v43 = vld [vmem:[%s8280_s15 + $0x258] sm:$0xf0] }
 0x2f6   : > { %4274 = vmatpush.bf16.msra.mxu0 %v5818_v25  ;;  %4293 = vmatmul.bf16.vlgmr.msrb.gmra.mxu1 %v8664_v51  ;;  %v3970_v23 = vadd.f32 %v9036_v11, %v3957_v15  ;;  %v3997_v24 = vpop.f32.mrf.mxu0  ;;  %v4049_v25 = vpop.f32.mrf.mxu2  ;;  %v7253_v15 = vld [vmem:[%s8280_s15 + $0x668] sm:$0xf0] }
 0x2f7   : > { %4337 = vmatpush.bf16.msra.mxu1 %v5926_v19  ;;  %4306 = vmatmul.bf16.vlgmr.msrb.gmra.mxu2 %v8669_v58  ;;  %v5402_v19 = vor.u32 %v7122_v8, %v5401_v6  ;;  %v7259_v6 = vld [vmem:[%s8280_s15 + $0x69c] sm:$0xf]  ;;  %v5513_v8 = vld [vmem:[%s8280_s15 + $0x2f8] sm:$0xf]  ;;  %v5930_v25 = vor.u32 %v7253_v15, %v5929_v14 }
 0x2f8   : > { %4350 = vmatpush.bf16.msra.mxu2 %v6342_v21  ;;  %v5609_v21 = vld [vmem:[%s8280_s15 + $0x3c0] sm:$0xf]  ;;  %v3983_v32 = vadd.f32 %v9057_v40, %v3970_v23  ;;  %v5507_v40 = vld [vmem:[%s8280_s15 + $0x324] sm:$0xf0]  ;;  %v5514_v23 = vor.u32 %v7149_v9, %v5513_v8  ;;  %v5305_v15 = vld [vmem:[%s8280_s15 + $0x158] sm:$0xf] }
 0x2f9   : > { %4214 = vmatpush.bf16.msra.mxu3 %v5554_v41  ;;  %v5610_v11 = vor.u32 %v7174_v22, %v5609_v21  ;;  %v5403_v21 = vld [vmem:[%s8280_s15 + $0x254] sm:$0xf0]  ;;  %v6857_v9 = vld [vmem:[%s8280_s15 + $0xd80] sm:$0xf] }
 0x2fa   : > { %4275 = vmatpush.bf16.msra.mxu0 %v5766_v42  ;;  %v3996_v41 = vadd.f32 %v3995_v49, %v3983_v32  ;;  %v5666_v42 = vor.u32 %v7181_v30, %v5663_v31  ;;  %v7272_v49 = vld [vmem:[%s8280_s15 + $0x704] sm:$0xf]  ;;  %v5877_v30 = vld [vmem:[%s8280_s15 + $0x5d0] sm:$0xf]  ;;  %v5141_v32 = vld [vmem:[%s8280_s15 + $0x18] sm:$0xf] }
 0x2fb   : > { %4338 = vmatpush.bf16.msra.mxu1 %v5874_v33  ;;  %v7285_v33 = vld [vmem:[%s8280_s15 + $0x76c] sm:$0xf]  ;;  %v6030_v2 = vor.u32 %v7272_v49, %v6027_v55  ;;  %v7240_v31 = vld [vmem:[%s8280_s15 + $0x600] sm:$0xf0]  ;;  %v6909_v55 = vld [vmem:[%s8280_s15 + $0xde8] sm:$0xf] }
 0x2fc   : > { %4351 = vmatpush.bf16.msra.mxu2 %v6290_v37  ;;  %4215 = vmatmul.bf16.vlgmr.msra.gmra.mxu3 %v8687_v17  ;;  %v5557_v37 = vld [vmem:[%s8280_s15 + $0x358] sm:$0xf]  ;;  %v6082_v46 = vor.u32 %v7285_v33, %v6079_v34  ;;  %v7057_v33 = vld [vmem:[%s8280_s15 + $0x48] sm:$0xf0]  ;;  %v7103_v34 = vld [vmem:[%s8280_s15 + $0x1bc] sm:$0xf] }
 0x2fd   : > { %4259 = vmatpush.bf16.msrb.mxu3 %v5506_v45  ;;  %v3958_v45 = vpop.f32.mrf.mxu3  ;;  %v5558_v54 = vor.u32 %v7161_v38, %v5557_v37  ;;  %v6961_v38 = vld [vmem:[%s8280_s15 + $0xe50] sm:$0xf] }
 0x2fe   : > { %4276 = vmatpush.bf16.msra.mxu0 %v5714_v60  ;;  %v9146_v60 = vpop.f32.mrf.mxu0  ;;  %v5825_v45 = vld [vmem:[%s8280_s15 + $0x568] sm:$0xf]  ;;  %v6962_v47 = vor.u32 %v7512_v39, %v6961_v38 }
 0x2ff   : > { %4339 = vmatpush.bf16.msra.mxu1 %v5822_v52  ;;  %v4726_v52 = vrot.slane %v3996_v41, 6  ;;  %v5878_v41 = vor.u32 %v7240_v31, %v5877_v30  ;;  %v7473_v30 = vld [vmem:[%s8280_s15 + $0xd48] sm:$0xf0]  ;;  %v7454_v31 = vld [vmem:[%s8280_s15 + $0xcb4] sm:$0xf] }
 0x300   : > { %4352 = vmatpush.bf16.msra.mxu2 %v6238_v57  ;;  %v5510_v57 = vor.u32 %v7142_v44, %v5507_v40  ;;  %v5142_v44 = vor.u32 %v7057_v33, %v5141_v32  ;;  %v5253_v33 = vld [vmem:[%s8280_s15 + $0xf0] sm:$0xf] }
 0x301   : > { %4260 = vmatpush.bf16.msrb.mxu3 %v5454_v0  ;;  %v9144_v59 = vsel %vm4735_vm9, %v9070_v62, %v4726_v52  ;;  %v7129_v0 = vld [vmem:[%s8280_s15 + $0x28c] sm:$0xf]  ;;  %v5975_v62 = vld [vmem:[%s8280_s15 + $0x6cc] sm:$0xf0]  ;;  %v5299_v52 = vld [vmem:[%s8280_s15 + $0x184] sm:$0xf0] }
 0x302   : > { %4277 = vmatpush.bf16.msra.mxu0 %v5662_v16  ;;  %v5458_v13 = vor.u32 %v7129_v0, %v5455_v1  ;;  %v5193_v16 = vld [vmem:[%s8280_s15 + $0x80] sm:$0xf]  ;;  %v5978_v22 = vor.u32 %v7259_v6, %v5975_v62  ;;  %v5302_v0 = vor.u32 %v7090_v48, %v5299_v52  ;;  %v1465_v1 = vperm.slane %v9009_v29, 2  ;;  %v7077_v6 = vld [vmem:[%s8280_s15 + $0xec] sm:$0xf] }
 0x303   : > { %4340 = vmatpush.bf16.msra.mxu1 %v5770_v4  ;;  %v5559_v4 = vld [vmem:[%s8280_s15 + $0x38c] sm:$0xf0]  ;;  %v9164_v24 = vpop.f32.mrf.mxu1  ;;  %v5194_v27 = vor.u32 %v7070_v18, %v5193_v16  ;;  %v5247_v62 = vld [vmem:[%s8280_s15 + $0x11c] sm:$0xf0]  ;;  %v7097_v16 = vld [vmem:[%s8280_s15 + $0x188] sm:$0xf0] }
 0x304   : > { %4353 = vmatpush.bf16.msra.mxu2 %v6186_v12  ;;  %v5246_v12 = vor.u32 %v7083_v63, %v5245_v53  ;;  %v5562_v35 = vor.u32 %v7155_v3, %v5559_v4  ;;  %v7110_v63 = vld [vmem:[%s8280_s15 + $0x1f0] sm:$0xf0]  ;;  %v5250_v18 = vor.u32 %v7077_v6, %v5247_v62  ;;  %v6703_v52 = vld [vmem:[%s8280_s15 + $0xc7c] sm:$0xf0] }
 0x305   : > { %4261 = vmatpush.bf16.msrb.mxu3 %v5402_v19  ;;  %v7116_v19 = vld [vmem:[%s8280_s15 + $0x224] sm:$0xf]  ;;  %v7214_v3 = vld [vmem:[%s8280_s15 + $0x530] sm:$0xf0]  ;;  %v5149_v6 = vld [vmem:[%s8280_s15 + $0x20] sm:$0xf] }
 0x306   : > { %4278 = vmatpush.bf16.msra.mxu0 %v5610_v11  ;;  %v4023_v11 = vpop.f32.mrf.mxu0  ;;  %v7058_v62 = vld [vmem:[%s8280_s15 + $0x50] sm:$0xf0] }
 0x307   : > { %4341 = vmatpush.bf16.msra.mxu1 %v5718_v7  ;;  %v5461_v7 = vld [vmem:[%s8280_s15 + $0x290] sm:$0xf]  ;;  %v6755_v11 = vld [vmem:[%s8280_s15 + $0xce4] sm:$0xf0] }
 0x308   : > { %4354 = vmatpush.bf16.msra.mxu2 %v6134_v28  ;;  %v5406_v28 = vor.u32 %v7116_v19, %v5403_v21  ;;  %v5462_v37 = vor.u32 %v7136_v26, %v5461_v7  ;;  %v5721_v19 = vld [vmem:[%s8280_s15 + $0x498] sm:$0xf]  ;;  %v7201_v21 = vld [vmem:[%s8280_s15 + $0x4c8] sm:$0xf0] }
 0x309   : > { %4262 = vmatpush.bf16.msrb.mxu3 %v5350_v36  ;;  %v5351_v36 = vld [vmem:[%s8280_s15 + $0x1ec] sm:$0xf0]  ;;  %v5722_v32 = vor.u32 %v7201_v21, %v5721_v19  ;;  %v7480_v21 = vld [vmem:[%s8280_s15 + $0xd84] sm:$0xf] }
 0x30a   : > { %4279 = vmatpush.bf16.msra.mxu0 %v5558_v54  ;;  %v5354_v40 = vor.u32 %v7103_v34, %v5351_v36  ;;  %v9184_v54 = vpop.f32.mrf.mxu2  ;;  %v7084_v34 = vld [vmem:[%s8280_s15 + $0x120] sm:$0xf0]  ;;  %v5515_v19 = vld [vmem:[%s8280_s15 + $0x32c] sm:$0xf0] }
 0x30b   : > { %4342 = vmatpush.bf16.msra.mxu1 %v5666_v42  ;;  %v5409_v42 = vld [vmem:[%s8280_s15 + $0x228] sm:$0xf] }
 0x30c   : > { %4355 = vmatpush.bf16.msra.mxu2 %v6082_v46  ;;  %v7227_v46 = vld [vmem:[%s8280_s15 + $0x598] sm:$0xf0]  ;;  %v5410_v49 = vor.u32 %v7123_v43, %v5409_v42  ;;  %v5143_v42 = vld [vmem:[%s8280_s15 + $0x4c] sm:$0xf0]  ;;  %v6758_v43 = vor.u32 %v7454_v31, %v6755_v11  ;;  %v1467_v31 = vperm.slane %v9009_v29, 4 }
 0x30d   : > { %4263 = vmatpush.bf16.msrb.mxu3 %v5298_v56  ;;  %4280 = vmatmul.bf16.vlgmr.msra.gmra.mxu0 %v8687_v17  ;;  %v7499_v56 = vld [vmem:[%s8280_s15 + $0xe18] sm:$0xf0]  ;;  %v5826_v53 = vor.u32 %v7227_v46, %v5825_v45  ;;  %v6963_v45 = vld [vmem:[%s8280_s15 + $0xe84] sm:$0xf0]  ;;  %v7441_v46 = vld [vmem:[%s8280_s15 + $0xc4c] sm:$0xf] }
 0x30e   : > { %4324 = vmatpush.bf16.msrb.mxu0 %v5510_v57  ;;  %v4088_v57 = vpop.f32.mrf.mxu1  ;;  %v6910_v4 = vor.u32 %v7499_v56, %v6909_v55  ;;  %v7071_v55 = vld [vmem:[%s8280_s15 + $0xb8] sm:$0xf0] }
 0x30f   : > { %4343 = vmatpush.bf16.msra.mxu1 %v5614_v61  ;;  %v5357_v61 = vld [vmem:[%s8280_s15 + $0x1c0] sm:$0xf] }
 0x310   : > { %4356 = vmatpush.bf16.msra.mxu2 %v6030_v2  ;;  %v5773_v2 = vld [vmem:[%s8280_s15 + $0x500] sm:$0xf]  ;;  %v5358_v8 = vor.u32 %v7110_v63, %v5357_v61  ;;  %v6706_v63 = vor.u32 %v7441_v46, %v6703_v52  ;;  %v7487_v46 = vld [vmem:[%s8280_s15 + $0xdb8] sm:$0xf0] }
 0x311   : > { %4264 = vmatpush.bf16.msrb.mxu3 %v5246_v12  ;;  %v7486_v12 = vld [vmem:[%s8280_s15 + $0xdb0] sm:$0xf0]  ;;  %v5774_v14 = vor.u32 %v7214_v3, %v5773_v2  ;;  %v6911_v2 = vld [vmem:[%s8280_s15 + $0xe1c] sm:$0xf0]  ;;  %v7428_v3 = vld [vmem:[%s8280_s15 + $0xbe4] sm:$0xf] }
 0x312   : > { %4325 = vmatpush.bf16.msrb.mxu0 %v5458_v13  ;;  %v4008_v13 = vpop.f32.mrf.mxu3  ;;  %v4101_v26 = vpop.f32.mrf.mxu2 }
 0x313   : > { %4344 = vmatpush.bf16.msra.mxu1 %v5562_v35  ;;  %v4009_v35 = vadd.f32 %v4008_v13, %v1465_v1  ;;  %v7493_v1 = vld [vmem:[%s8280_s15 + $0xdec] sm:$0xf]  ;;  %v6599_v26 = vld [vmem:[%s8280_s15 + $0xbac] sm:$0xf0] }
 0x314   : > { %4357 = vmatpush.bf16.msra.mxu2 %v5978_v22  ;;  %v6858_v22 = vor.u32 %v7486_v12, %v6857_v9  ;;  %v6969_v9 = vld [vmem:[%s8280_s15 + $0xe58] sm:$0xf]  ;;  %v7513_v12 = vld [vmem:[%s8280_s15 + $0xe88] sm:$0xf0]  ;;  %v6914_v13 = vor.u32 %v7493_v1, %v6911_v2  ;;  %v6495_v1 = vld [vmem:[%s8280_s15 + $0xadc] sm:$0xf0] }
 0x315   : > { %4265 = vmatpush.bf16.msrb.mxu3 %v5194_v27  ;;  %v4022_v7 = vadd.f32 %v9146_v60, %v4009_v35  ;;  %v5306_v27 = vor.u32 %v7097_v16, %v5305_v15  ;;  %v7188_v60 = vld [vmem:[%s8280_s15 + $0x460] sm:$0xf0]  ;;  %v7162_v15 = vld [vmem:[%s8280_s15 + $0x390] sm:$0xf0]  ;;  %v7143_v16 = vld [vmem:[%s8280_s15 + $0x2fc] sm:$0xf] }
 0x316   : > { %4326 = vmatpush.bf16.msrb.mxu0 %v5406_v28  ;;  %4345 = vmatmul.bf16.vlgmr.msra.gmra.mxu1 %v8687_v17  ;;  %v6805_v28 = vld [vmem:[%s8280_s15 + $0xd18] sm:$0xf]  ;;  %v5518_v11 = vor.u32 %v7143_v16, %v5515_v19  ;;  %v6709_v2 = vld [vmem:[%s8280_s15 + $0xc50] sm:$0xf]  ;;  %v7376_v19 = vld [vmem:[%s8280_s15 + $0xa44] sm:$0xf] }
 0x317   : > { %4389 = vmatpush.bf16.msrb.mxu1 %v5514_v23  ;;  %4358 = vmatmul.bf16.vlgmr.msra.gmra.mxu2 %v8664_v51  ;;  %v7064_v23 = vld [vmem:[%s8280_s15 + $0x84] sm:$0xf]  ;;  %v4035_v38 = vadd.f32 %v9082_v20, %v4022_v7  ;;  %v6806_v39 = vor.u32 %v7473_v30, %v6805_v28  ;;  %v7415_v7 = vld [vmem:[%s8280_s15 + $0xb7c] sm:$0xf]  ;;  %v6917_v28 = vld [vmem:[%s8280_s15 + $0xdf0] sm:$0xf] }
 0x318   : > { %4402 = vmatpush.bf16.msrb.mxu2 %v5930_v25  ;;  %v5195_v25 = vld [vmem:[%s8280_s15 + $0xb4] sm:$0xf0]  ;;  %v7500_v30 = vld [vmem:[%s8280_s15 + $0xe20] sm:$0xf0] }
 0x319   : > { %4266 = vmatpush.bf16.msrb.mxu3 %v5142_v44  ;;  %v5198_v36 = vor.u32 %v7064_v23, %v5195_v25  ;;  %v5254_v44 = vor.u32 %v7084_v34, %v5253_v33  ;;  %v6970_v25 = vor.u32 %v7513_v12, %v6969_v9  ;;  %v7130_v34 = vld [vmem:[%s8280_s15 + $0x294] sm:$0xf]  ;;  %v7455_v12 = vld [vmem:[%s8280_s15 + $0xcbc] sm:$0xf] }
 0x31a   : > { %4327 = vmatpush.bf16.msrb.mxu0 %v5354_v40  ;;  %v7506_v40 = vld [vmem:[%s8280_s15 + $0xe54] sm:$0xf]  ;;  %v4010_v48 = vpop.f32.mrf.mxu3  ;;  %v9227_v61 = vpop.f32.mrf.mxu0 }
 0x31b   : > { %4390 = vmatpush.bf16.msrb.mxu1 %v5462_v37  ;;  %v5669_v37 = vld [vmem:[%s8280_s15 + $0x430] sm:$0xf]  ;;  %v6966_v57 = vor.u32 %v7506_v40, %v6963_v45  ;;  %v7461_v40 = vld [vmem:[%s8280_s15 + $0xce8] sm:$0xf0]  ;;  %v6865_v45 = vld [vmem:[%s8280_s15 + $0xd88] sm:$0xf] }
 0x31c   : > { %4403 = vmatpush.bf16.msrb.mxu2 %v5878_v41  ;;  %4267 = vmatmul.bf16.vlgmr.msrb.gmra.mxu3 %v8680_v10  ;;  %v7051_v41 = vld [vmem:[%s8280_s15 + $0x1c] sm:$0xf]  ;;  %v5670_v20 = vor.u32 %v7188_v60, %v5669_v37  ;;  %v6602_v60 = vor.u32 %v7415_v7, %v6599_v26  ;;  %v1466_v26 = vperm.slane %v9009_v29, 3 }
 0x31d   : > { %4315 = vmatpush.bf16.msra.mxu3 %v6962_v47  ;;  %v9220_v47 = vadd.f32 %v9103_v50, %v4035_v38  ;;  %v5146_v56 = vor.u32 %v7051_v41, %v5143_v42  ;;  %v7175_v50 = vld [vmem:[%s8280_s15 + $0x3f8] sm:$0xf0]  ;;  %v7402_v41 = vld [vmem:[%s8280_s15 + $0xb14] sm:$0xf]  ;;  %v6918_v42 = vor.u32 %v7500_v30, %v6917_v28 }
 0x31e   : > { %4328 = vmatpush.bf16.msrb.mxu0 %v5302_v0  ;;  %v7467_v38 = vld [vmem:[%s8280_s15 + $0xd1c] sm:$0xf]  ;;  %v7442_v30 = vld [vmem:[%s8280_s15 + $0xc54] sm:$0xf] }
 0x31f   : > { %4391 = vmatpush.bf16.msrb.mxu1 %v5410_v49  ;;  %v5201_v49 = vld [vmem:[%s8280_s15 + $0x88] sm:$0xf]  ;;  %v7435_v7 = vld [vmem:[%s8280_s15 + $0xc18] sm:$0xf0] }
 0x320   : > { %4404 = vmatpush.bf16.msrb.mxu2 %v5826_v53  ;;  %v5617_v53 = vld [vmem:[%s8280_s15 + $0x3c8] sm:$0xf]  ;;  %v5202_v0 = vor.u32 %v7071_v55, %v5201_v49 }
 0x321   : > { %4316 = vmatpush.bf16.msra.mxu3 %v6910_v4  ;;  %v6651_v4 = vld [vmem:[%s8280_s15 + $0xc14] sm:$0xf0] }
 0x322   : > { %4329 = vmatpush.bf16.msrb.mxu0 %v5250_v18  ;;  %v6654_v35 = vor.u32 %v7428_v3, %v6651_v4  ;;  %v5150_v18 = vor.u32 %v7058_v62, %v5149_v6  ;;  %v9246_v23 = vpop.f32.mrf.mxu3  ;;  %v4075_v37 = vpop.f32.mrf.mxu0  ;;  %v7448_v3 = vld [vmem:[%s8280_s15 + $0xc80] sm:$0xf0]  ;;  %v6813_v6 = vld [vmem:[%s8280_s15 + $0xd20] sm:$0xf]  ;;  %v7474_v62 = vld [vmem:[%s8280_s15 + $0xd50] sm:$0xf0] }
 0x323   : > { %4392 = vmatpush.bf16.msrb.mxu1 %v5358_v8  ;;  %v5618_v8 = vor.u32 %v7175_v50, %v5617_v53  ;;  %v7389_v53 = vld [vmem:[%s8280_s15 + $0xaac] sm:$0xf]  ;;  %v6710_v16 = vor.u32 %v7448_v3, %v6709_v2  ;;  %v6391_v37 = vld [vmem:[%s8280_s15 + $0xa0c] sm:$0xf0]  ;;  %v7416_v2 = vld [vmem:[%s8280_s15 + $0xb84] sm:$0xf] }
 0x324   : > { %4405 = vmatpush.bf16.msrb.mxu2 %v5774_v14  ;;  %v5565_v14 = vld [vmem:[%s8280_s15 + $0x360] sm:$0xf]  ;;  %v6607_v3 = vld [vmem:[%s8280_s15 + $0xbb4] sm:$0xf0] }
 0x325   : > { %4317 = vmatpush.bf16.msra.mxu3 %v6858_v22  ;;  %v6859_v22 = vld [vmem:[%s8280_s15 + $0xdb4] sm:$0xf0] }
 0x326   : > { %4330 = vmatpush.bf16.msrb.mxu0 %v5198_v36  ;;  %v6862_v33 = vor.u32 %v7480_v21, %v6859_v22  ;;  %v5463_v36 = vld [vmem:[%s8280_s15 + $0x2c4] sm:$0xf0]  ;;  %v6814_v21 = vor.u32 %v7474_v62, %v6813_v6  ;;  %v6443_v22 = vld [vmem:[%s8280_s15 + $0xa74] sm:$0xf0]  ;;  %v7065_v62 = vld [vmem:[%s8280_s15 + $0x8c] sm:$0xf] }
 0x327   : > { %4393 = vmatpush.bf16.msrb.mxu1 %v5306_v27  ;;  %v5566_v27 = vor.u32 %v7162_v15, %v5565_v14  ;;  %v5466_v48 = vor.u32 %v7130_v34, %v5463_v36  ;;  %v6498_v15 = vor.u32 %v7389_v53, %v6495_v1  ;;  %v5307_v34 = vld [vmem:[%s8280_s15 + $0x18c] sm:$0xf0]  ;;  %v7363_v36 = vld [vmem:[%s8280_s15 + $0x9dc] sm:$0xf] }
 0x328   : > { %4406 = vmatpush.bf16.msrb.mxu2 %v5722_v32  ;;  %v4138_v32 = vpop.f32.mrf.mxu1 }
 0x329   : > { %4318 = vmatpush.bf16.msra.mxu3 %v6806_v39  ;;  %v6807_v39 = vld [vmem:[%s8280_s15 + $0xd4c] sm:$0xf0]  ;;  %v4139_v52 = vadd.f32 %v4138_v32, %v1467_v31  ;;  %v6711_v31 = vld [vmem:[%s8280_s15 + $0xc84] sm:$0xf0]  ;;  %v6446_v32 = vor.u32 %v7376_v19, %v6443_v22  ;;  %v7403_v22 = vld [vmem:[%s8280_s15 + $0xb1c] sm:$0xf] }
 0x32a   : > { %4331 = vmatpush.bf16.msrb.mxu0 %v5146_v56  ;;  %v7117_v56 = vld [vmem:[%s8280_s15 + $0x22c] sm:$0xf]  ;;  %v4151_v50 = vpop.f32.mrf.mxu2  ;;  %v9277_v14 = vpop.f32.mrf.mxu0 }
 0x32b   : > { %4394 = vmatpush.bf16.msrb.mxu1 %v5254_v44  ;;  %v6761_v44 = vld [vmem:[%s8280_s15 + $0xcb8] sm:$0xf]  ;;  %v9271_v4 = vadd.f32 %v4151_v50, %v4139_v52  ;;  %v7078_v52 = vld [vmem:[%s8280_s15 + $0xf4] sm:$0xf] }
 0x32c   : > { %4407 = vmatpush.bf16.msrb.mxu2 %v5670_v20  ;;  %6993 = vmatmul.msk.bf16.vlgmr.msra.gmra.mxu3 %vm3865_vm8, %v8725_v5  ;;  %v6810_v20 = vor.u32 %v7467_v38, %v6807_v39  ;;  %v6762_v55 = vor.u32 %v7461_v40, %v6761_v44  ;;  %v7422_v38 = vld [vmem:[%s8280_s15 + $0xbb0] sm:$0xf0]  ;;  %v4074_v39 = vadd.f32 %v9227_v61, %v1466_v26 }
 0x32d   : > { %4363 = vmatpush.bf16.msrb.mxu3 %v6758_v43  ;;  %4332 = vmatmul.bf16.vlgmr.msrb.gmra.mxu0 %v8680_v10  ;;  %v6547_v43 = vld [vmem:[%s8280_s15 + $0xb44] sm:$0xf0]  ;;  %v6394_v61 = vor.u32 %v7363_v36, %v6391_v37  ;;  %v7318_v36 = vld [vmem:[%s8280_s15 + $0x870] sm:$0xf0] }
 0x32e   : > { %4380 = vmatpush.bf16.msra.mxu0 %v6966_v57  ;;  %v6550_v49 = vor.u32 %v7402_v41, %v6547_v43  ;;  %v5411_v57 = vld [vmem:[%s8280_s15 + $0x25c] sm:$0xf0]  ;;  %v6714_v41 = vor.u32 %v7442_v30, %v6711_v31  ;;  %v7357_v43 = vld [vmem:[%s8280_s15 + $0x9a8] sm:$0xf0]  ;;  %v4087_v53 = vadd.f32 %v9164_v24, %v4074_v39  ;;  %v7507_v30 = vld [vmem:[%s8280_s15 + $0xe5c] sm:$0xf] }
 0x32f   : > { %4395 = vmatpush.bf16.msrb.mxu1 %v5202_v0  ;;  %v6866_v0 = vor.u32 %v7487_v46, %v6865_v45  ;;  %v5414_v9 = vor.u32 %v7117_v56, %v5411_v57  ;;  %v7429_v45 = vld [vmem:[%s8280_s15 + $0xbec] sm:$0xf]  ;;  %v6659_v46 = vld [vmem:[%s8280_s15 + $0xc1c] sm:$0xf0]  ;;  %v6553_v56 = vld [vmem:[%s8280_s15 + $0xb18] sm:$0xf] }
 0x330   : > { %4408 = vmatpush.bf16.msrb.mxu2 %v5618_v8  ;;  %v4140_v8 = vpop.f32.mrf.mxu1  ;;  %v7409_v57 = vld [vmem:[%s8280_s15 + $0xb48] sm:$0xf0]  ;;  %v6662_v50 = vor.u32 %v7429_v45, %v6659_v46  ;;  %v7390_v37 = vld [vmem:[%s8280_s15 + $0xab4] sm:$0xf]  ;;  %v6397_v45 = vld [vmem:[%s8280_s15 + $0x9e0] sm:$0xf] }
 0x331   : > { %4364 = vmatpush.bf16.msrb.mxu3 %v6706_v63  ;;  %v4062_v63 = vpop.f32.mrf.mxu3  ;;  %v6554_v6 = vor.u32 %v7409_v57, %v6553_v56  ;;  %v5203_v8 = vld [vmem:[%s8280_s15 + $0xbc] sm:$0xf0]  ;;  %v7370_v46 = vld [vmem:[%s8280_s15 + $0xa10] sm:$0xf0] }
 0x332   : > { %4381 = vmatpush.bf16.msra.mxu0 %v6914_v13  ;;  %v6763_v13 = vld [vmem:[%s8280_s15 + $0xcec] sm:$0xf0]  ;;  %v4153_v29 = vpop.f32.mrf.mxu2 }
 0x333   : > { %4396 = vmatpush.bf16.msrb.mxu1 %v5150_v18  ;;  %v5359_v18 = vld [vmem:[%s8280_s15 + $0x1f4] sm:$0xf0]  ;;  %v6293_v63 = vld [vmem:[%s8280_s15 + $0x910] sm:$0xf] }
 0x334   : > { %4409 = vmatpush.bf16.msrb.mxu2 %v5566_v27  ;;  %v6766_v27 = vor.u32 %v7455_v12, %v6763_v13  ;;  %v7396_v12 = vld [vmem:[%s8280_s15 + $0xae0] sm:$0xf0]  ;;  %v4100_v13 = vadd.f32 %v9184_v54, %v4087_v53  ;;  %v4061_v54 = vadd.f32 %v9246_v23, %v9220_v47  ;;  %v6189_v23 = vld [vmem:[%s8280_s15 + $0x840] sm:$0xf]  ;;  %v7377_v53 = vld [vmem:[%s8280_s15 + $0xa4c] sm:$0xf] }
 0x335   : > { %4365 = vmatpush.bf16.msrb.mxu3 %v6654_v35  ;;  %v7104_v35 = vld [vmem:[%s8280_s15 + $0x1c4] sm:$0xf] }
 0x336   : > { %4382 = vmatpush.bf16.msra.mxu0 %v6862_v33  ;;  %4397 = vmatmul.bf16.vlgmr.msrb.gmra.mxu1 %v8680_v10  ;;  %v5362_v28 = vor.u32 %v7104_v35, %v5359_v18  ;;  %v7091_v33 = vld [vmem:[%s8280_s15 + $0x15c] sm:$0xf] }
 0x337   : > { %4445 = vmatpush.bf16.msra.mxu1 %v6970_v25  ;;  %4410 = vmatmul.bf16.vlgmr.msrb.gmra.mxu2 %v8687_v17  ;;  %v6657_v25 = vld [vmem:[%s8280_s15 + $0xbe8] sm:$0xf]  ;;  %v5310_v40 = vor.u32 %v7091_v33, %v5307_v34  ;;  %v7331_v35 = vld [vmem:[%s8280_s15 + $0x8d8] sm:$0xf0] }
 0x338   : > { %4454 = vmatpush.bf16.msra.mxu2 %v5518_v11  ;;  %v6658_v11 = vor.u32 %v7435_v7, %v6657_v25  ;;  %v9299_v44 = vpop.f32.mrf.mxu1  ;;  %v6555_v25 = vld [vmem:[%s8280_s15 + $0xb4c] sm:$0xf0]  ;;  %v7383_v33 = vld [vmem:[%s8280_s15 + $0xa78] sm:$0xf0] }
 0x339   : > { %4366 = vmatpush.bf16.msrb.mxu3 %v6602_v60  ;;  %v6605_v60 = vld [vmem:[%s8280_s15 + $0xb80] sm:$0xf]  ;;  %v6558_v47 = vor.u32 %v7403_v22, %v6555_v25  ;;  %v7468_v25 = vld [vmem:[%s8280_s15 + $0xd24] sm:$0xf] }
 0x33a   : > { %4383 = vmatpush.bf16.msra.mxu0 %v6810_v20  ;;  %v6606_v20 = vor.u32 %v7422_v38, %v6605_v60  ;;  %v6503_v60 = vld [vmem:[%s8280_s15 + $0xae4] sm:$0xf0]  ;;  %v4727_v38 = vrot.slane %v4061_v54, 4  ;;  %v6815_v54 = vld [vmem:[%s8280_s15 + $0xd54] sm:$0xf0] }
 0x33b   : > { %4446 = vmatpush.bf16.msra.mxu1 %v6918_v42  ;;  %v6345_v42 = vld [vmem:[%s8280_s15 + $0x978] sm:$0xf] }
 0x33c   : > { %4455 = vmatpush.bf16.msra.mxu2 %v5466_v48  ;;  %v4127_v48 = vpop.f32.mrf.mxu0 }
 0x33d   : > { %4367 = vmatpush.bf16.msrb.mxu3 %v6550_v49  ;;  %6994 = vmatmul.msk.bf16.vlgmr.msra.gmra.mxu0 %vm3865_vm8, %v8725_v5  ;;  %v5255_v49 = vld [vmem:[%s8280_s15 + $0x124] sm:$0xf0]  ;;  %v6137_v48 = vld [vmem:[%s8280_s15 + $0x7d8] sm:$0xf] }
 0x33e   : > { %4428 = vmatpush.bf16.msrb.mxu0 %v6762_v55  ;;  %v6346_v55 = vor.u32 %v7357_v43, %v6345_v42  ;;  %v5258_v1 = vor.u32 %v7078_v52, %v5255_v49  ;;  %v7494_v42 = vld [vmem:[%s8280_s15 + $0xdf4] sm:$0xf]  ;;  %v6919_v43 = vld [vmem:[%s8280_s15 + $0xe24] sm:$0xf0]  ;;  %v7305_v52 = vld [vmem:[%s8280_s15 + $0x808] sm:$0xf0] }
 0x33f   : > { %4447 = vmatpush.bf16.msra.mxu1 %v6866_v0  ;;  %v7344_v0 = vld [vmem:[%s8280_s15 + $0x940] sm:$0xf0]  ;;  %v4112_v19 = vpop.f32.mrf.mxu3  ;;  %v7351_v49 = vld [vmem:[%s8280_s15 + $0x97c] sm:$0xf] }
 0x340   : > { %4456 = vmatpush.bf16.msra.mxu2 %v5414_v9  ;;  %v6294_v24 = vor.u32 %v7344_v0, %v6293_v63  ;;  %v6501_v9 = vld [vmem:[%s8280_s15 + $0xab0] sm:$0xf]  ;;  %v4192_v18 = vpop.f32.mrf.mxu1  ;;  %v4113_v7 = vadd.f32 %v4112_v19, %v4100_v13  ;;  %v6922_v63 = vor.u32 %v7494_v42, %v6919_v43  ;;  %v6398_v0 = vor.u32 %v7370_v46, %v6397_v45  ;;  %v6295_v13 = vld [vmem:[%s8280_s15 + $0x944] sm:$0xf0]  ;;  %v7358_v19 = vld [vmem:[%s8280_s15 + $0x9b0] sm:$0xf0] }
 0x341   : > { %4368 = vmatpush.bf16.msrb.mxu3 %v6498_v15  ;;  %v6610_v15 = vor.u32 %v7416_v2, %v6607_v3  ;;  %v6502_v26 = vor.u32 %v7396_v12, %v6501_v9  ;;  %v7481_v2 = vld [vmem:[%s8280_s15 + $0xd8c] sm:$0xf]  ;;  %v6867_v3 = vld [vmem:[%s8280_s15 + $0xdbc] sm:$0xf0]  ;;  %v7292_v9 = vld [vmem:[%s8280_s15 + $0x7a0] sm:$0xf0] }
 0x342   : > { %4429 = vmatpush.bf16.msrb.mxu0 %v6710_v16  ;;  %v6241_v16 = vld [vmem:[%s8280_s15 + $0x8a8] sm:$0xf]  ;;  %v4126_v34 = vadd.f32 %v9277_v14, %v4113_v7  ;;  %v7338_v12 = vld [vmem:[%s8280_s15 + $0x914] sm:$0xf]  ;;  %v6353_v18 = vld [vmem:[%s8280_s15 + $0x980] sm:$0xf] }
 0x343   : > { %4448 = vmatpush.bf16.msra.mxu1 %v6814_v21  ;;  %v5206_v21 = vor.u32 %v7065_v62, %v5203_v8  ;;  %v6242_v31 = vor.u32 %v7331_v35, %v6241_v16  ;;  %v6399_v16 = vld [vmem:[%s8280_s15 + $0xa14] sm:$0xf0]  ;;  %v6870_v35 = vor.u32 %v7481_v2, %v6867_v3  ;;  %v6298_v22 = vor.u32 %v7338_v12, %v6295_v13  ;;  %v6769_v7 = vld [vmem:[%s8280_s15 + $0xcc0] sm:$0xf]  ;;  %v7266_v42 = vld [vmem:[%s8280_s15 + $0x6d0] sm:$0xf0] }
 0x344   : > { %4457 = vmatpush.bf16.msra.mxu2 %v5362_v28  ;;  %v5151_v28 = vld [vmem:[%s8280_s15 + $0x54] sm:$0xf0]  ;;  %v4728_v39 = vrot.slane %v4126_v34, 2  ;;  %v7247_v46 = vld [vmem:[%s8280_s15 + $0x63c] sm:$0xf] }
 0x345   : > { %4369 = vmatpush.bf16.msrb.mxu3 %v6446_v32  ;;  %v6971_v32 = vld [vmem:[%s8280_s15 + $0xe8c] sm:$0xf0]  ;;  %v6301_v34 = vld [vmem:[%s8280_s15 + $0x918] sm:$0xf]  ;;  %v6197_v2 = vld [vmem:[%s8280_s15 + $0x848] sm:$0xf] }
 0x346   : > { %4430 = vmatpush.bf16.msrb.mxu0 %v6658_v11  ;;  %6995 = vmatmul.msk.bf16.vlgmr.msra.gmra.mxu1 %vm3865_vm8, %v8725_v5  ;;  %v6449_v11 = vld [vmem:[%s8280_s15 + $0xa48] sm:$0xf]  ;;  %v6974_v14 = vor.u32 %v7507_v30, %v6971_v32  ;;  %v7279_v30 = vld [vmem:[%s8280_s15 + $0x738] sm:$0xf0]  ;;  %v7325_v32 = vld [vmem:[%s8280_s15 + $0x8ac] sm:$0xf] }
 0x347   : > { %4493 = vmatpush.bf16.msrb.mxu1 %v6766_v27  ;;  %v7052_v27 = vld [vmem:[%s8280_s15 + $0x24] sm:$0xf]  ;;  %v4114_v57 = vpop.f32.mrf.mxu3  ;;  %v6191_v45 = vld [vmem:[%s8280_s15 + $0x874] sm:$0xf0]  ;;  %v7319_v3 = vld [vmem:[%s8280_s15 + $0x878] sm:$0xf0] }
 0x348   : > { %4458 = vmatpush.bf16.msra.mxu2 %v5310_v40  ;;  %v5154_v29 = vor.u32 %v7052_v27, %v5151_v28  ;;  %v6190_v40 = vor.u32 %v7318_v36, %v6189_v23  ;;  %v7462_v27 = vld [vmem:[%s8280_s15 + $0xcf0] sm:$0xf0]  ;;  %v6033_v28 = vld [vmem:[%s8280_s15 + $0x708] sm:$0xf]  ;;  %v7436_v57 = vld [vmem:[%s8280_s15 + $0xc20] sm:$0xf0] }
 0x349   : > { %4370 = vmatpush.bf16.msrb.mxu3 %v6394_v61  ;;  %v4738_v61 = vsel %vm4737_vm10, %v4727_v38, %v4728_v39  ;;  %v6770_v36 = vor.u32 %v7462_v27, %v6769_v7  ;;  %v6613_v12 = vld [vmem:[%s8280_s15 + $0xb88] sm:$0xf]  ;;  %v7423_v13 = vld [vmem:[%s8280_s15 + $0xbb8] sm:$0xf0] }
 0x34a   : > { %4431 = vmatpush.bf16.msrb.mxu0 %v6606_v20  ;;  %v6506_v20 = vor.u32 %v7390_v37, %v6503_v60  ;;  %v4740_v56 = vsel %vm4739_vm11, %v9144_v59, %v4738_v61  ;;  %v6138_v59 = vor.u32 %v7305_v52, %v6137_v48  ;;  %v9360_v62 = vpop.f32.mrf.mxu0  ;;  %v9362_v8 = vpop.f32.mrf.mxu2  ;;  %v6717_v37 = vld [vmem:[%s8280_s15 + $0xc58] sm:$0xf]  ;;  %v5931_v48 = vld [vmem:[%s8280_s15 + $0x66c] sm:$0xf0] }
 0x34b   : > { %4494 = vmatpush.bf16.msrb.mxu1 %v6714_v41  ;;  %v6450_v41 = vor.u32 %v7383_v33, %v6449_v11  ;;  %4750 = vst [vmem:[%s9353_s27] sm:$0xff] %v4740_v56  ;;  %v6243_v11 = vld [vmem:[%s8280_s15 + $0x8dc] sm:$0xf0]  ;;  %v6818_v33 = vor.u32 %v7468_v25, %v6815_v54  ;;  %v6249_v61 = vld [vmem:[%s8280_s15 + $0x8b0] sm:$0xf]  ;;  %v7306_v54 = vld [vmem:[%s8280_s15 + $0x810] sm:$0xf0] }
 0x34c   : > { %4459 = vmatpush.bf16.msra.mxu2 %v5258_v1  ;;  %4371 = vmatmul.bf16.vlgmr.msrb.gmra.mxu3 %v8669_v58  ;;  %v6246_v39 = vor.u32 %v7325_v32, %v6243_v11  ;;  %v6665_v56 = vld [vmem:[%s8280_s15 + $0xbf0] sm:$0xf]  ;;  %v6145_v25 = vld [vmem:[%s8280_s15 + $0x7e0] sm:$0xf] }
 0x34d   : > { %4415 = vmatpush.bf16.msra.mxu3 %v6346_v55  ;;  %v6347_v55 = vld [vmem:[%s8280_s15 + $0x9ac] sm:$0xf0]  ;;  %v6146_v11 = vor.u32 %v7306_v54, %v6145_v25  ;;  %v6355_v25 = vld [vmem:[%s8280_s15 + $0x9b4] sm:$0xf0]  ;;  %v7169_v54 = vld [vmem:[%s8280_s15 + $0x3cc] sm:$0xf] }
 0x34e   : > { %4432 = vmatpush.bf16.msrb.mxu0 %v6554_v6  ;;  %v6350_v1 = vor.u32 %v7351_v49, %v6347_v55  ;;  %v6085_v6 = vld [vmem:[%s8280_s15 + $0x770] sm:$0xf] }
 0x34f   : > { %4495 = vmatpush.bf16.msrb.mxu1 %v6662_v50  ;;  %v6451_v50 = vld [vmem:[%s8280_s15 + $0xa7c] sm:$0xf0] }
 0x350   : > { %4460 = vmatpush.bf16.msra.mxu2 %v5206_v21  ;;  %v6086_v21 = vor.u32 %v7292_v9, %v6085_v6 }
 0x351   : > { %4416 = vmatpush.bf16.msra.mxu3 %v6294_v24  ;;  %v6454_v24 = vor.u32 %v7377_v53, %v6451_v50  ;;  %v5934_v53 = vor.u32 %v7247_v46, %v5931_v48  ;;  %v7195_v46 = vld [vmem:[%s8280_s15 + $0x49c] sm:$0xf]  ;;  %v5723_v48 = vld [vmem:[%s8280_s15 + $0x4cc] sm:$0xf0] }
 0x352   : > { %4433 = vmatpush.bf16.msrb.mxu0 %v6502_v26  ;;  %v4179_v60 = vpop.f32.mrf.mxu0  ;;  %v4205_v38 = vpop.f32.mrf.mxu2 }
 0x353   : > { %4496 = vmatpush.bf16.msrb.mxu1 %v6610_v15  ;;  %v7364_v15 = vld [vmem:[%s8280_s15 + $0x9e4] sm:$0xf]  ;;  %v9382_v23 = vpop.f32.mrf.mxu1 }
 0x354   : > { %4461 = vmatpush.bf16.msra.mxu2 %v5154_v29  ;;  %v6402_v26 = vor.u32 %v7364_v15, %v6399_v16  ;;  %v6034_v29 = vor.u32 %v7279_v30, %v6033_v28  ;;  %v6561_v30 = vld [vmem:[%s8280_s15 + $0xb20] sm:$0xf] }
 0x355   : > { %4417 = vmatpush.bf16.msra.mxu3 %v6242_v31  ;;  %v6354_v31 = vor.u32 %v7358_v19, %v6353_v18  ;;  %v7286_v18 = vld [vmem:[%s8280_s15 + $0x774] sm:$0xf]  ;;  %v6087_v19 = vld [vmem:[%s8280_s15 + $0x7a4] sm:$0xf0] }
 0x356   : > { %4434 = vmatpush.bf16.msrb.mxu0 %v6450_v41  ;;  %v5981_v41 = vld [vmem:[%s8280_s15 + $0x6a0] sm:$0xf]  ;;  %v6090_v28 = vor.u32 %v7286_v18, %v6087_v19  ;;  %v5939_v18 = vld [vmem:[%s8280_s15 + $0x674] sm:$0xf0] }
 0x357   : > { %4497 = vmatpush.bf16.msrb.mxu1 %v6558_v47  ;;  %4462 = vmatmul.bf16.vlgmr.msra.gmra.mxu2 %v8680_v10  ;;  %v7345_v47 = vld [vmem:[%s8280_s15 + $0x948] sm:$0xf0]  ;;  %v5982_v49 = vor.u32 %v7266_v42, %v5981_v41 }
 0x358   : > { %4510 = vmatpush.bf16.msrb.mxu2 %v6974_v14  ;;  %v7449_v14 = vld [vmem:[%s8280_s15 + $0xc88] sm:$0xf0]  ;;  %v6302_v43 = vor.u32 %v7345_v47, %v6301_v34  ;;  %v6035_v34 = vld [vmem:[%s8280_s15 + $0x73c] sm:$0xf0]  ;;  %v7208_v47 = vld [vmem:[%s8280_s15 + $0x504] sm:$0xf] }
 0x359   : > { %4418 = vmatpush.bf16.msra.mxu3 %v6190_v40  ;;  %v7312_v40 = vld [vmem:[%s8280_s15 + $0x844] sm:$0xf]  ;;  %v6718_v52 = vor.u32 %v7449_v14, %v6717_v37  ;;  %v6093_v37 = vld [vmem:[%s8280_s15 + $0x778] sm:$0xf]  ;;  %v7397_v41 = vld [vmem:[%s8280_s15 + $0xae8] sm:$0xf0] }
 0x35a   : > { %4435 = vmatpush.bf16.msrb.mxu0 %v6398_v0  ;;  %v6194_v55 = vor.u32 %v7312_v40, %v6191_v45  ;;  %v6139_v0 = vld [vmem:[%s8280_s15 + $0x80c] sm:$0xf0]  ;;  %v9407_v15 = vpop.f32.mrf.mxu2  ;;  %v6509_v14 = vld [vmem:[%s8280_s15 + $0xab8] sm:$0xf]  ;;  %v7260_v40 = vld [vmem:[%s8280_s15 + $0x6a4] sm:$0xf] }
 0x35b   : > { %4498 = vmatpush.bf16.msrb.mxu1 %v6506_v20  ;;  %v7332_v20 = vld [vmem:[%s8280_s15 + $0x8e0] sm:$0xf0]  ;;  %v4244_v6 = vpop.f32.mrf.mxu1  ;;  %v5983_v45 = vld [vmem:[%s8280_s15 + $0x6d4] sm:$0xf0] }
 0x35c   : > { %4511 = vmatpush.bf16.msrb.mxu2 %v6922_v63  ;;  %v6250_v50 = vor.u32 %v7332_v20, %v6249_v61  ;;  %v7299_v63 = vld [vmem:[%s8280_s15 + $0x7dc] sm:$0xf]  ;;  %v7254_v61 = vld [vmem:[%s8280_s15 + $0x670] sm:$0xf0]  ;;  %v7241_v6 = vld [vmem:[%s8280_s15 + $0x608] sm:$0xf0] }
 0x35d   : > { %4419 = vmatpush.bf16.msra.mxu3 %v6138_v59  ;;  %4436 = vmatmul.bf16.vlgmr.msrb.gmra.mxu0 %v8669_v58  ;;  %v7234_v59 = vld [vmem:[%s8280_s15 + $0x5d4] sm:$0xf]  ;;  %v6142_v9 = vor.u32 %v7299_v63, %v6139_v0 }
 0x35e   : > { %4480 = vmatpush.bf16.msra.mxu0 %v6350_v1  ;;  %v5879_v1 = vld [vmem:[%s8280_s15 + $0x604] sm:$0xf0]  ;;  %v7182_v0 = vld [vmem:[%s8280_s15 + $0x434] sm:$0xf] }
 0x35f   : > { %4499 = vmatpush.bf16.msrb.mxu1 %v6454_v24  ;;  %v6666_v24 = vor.u32 %v7436_v57, %v6665_v56  ;;  %v5882_v16 = vor.u32 %v7234_v59, %v5879_v1  ;;  %v4164_v7 = vpop.f32.mrf.mxu3  ;;  %v5986_v56 = vor.u32 %v7260_v40, %v5983_v45  ;;  %v6457_v57 = vld [vmem:[%s8280_s15 + $0xa50] sm:$0xf]  ;;  %v7222_v45 = vld [vmem:[%s8280_s15 + $0x574] sm:$0xf] }
 0x360   : > { %4512 = vmatpush.bf16.msrb.mxu2 %v6870_v35  ;;  %v6198_v35 = vor.u32 %v7319_v3, %v6197_v2  ;;  %v4165_v27 = vadd.f32 %v4164_v7, %v9271_v4  ;;  %v7293_v4 = vld [vmem:[%s8280_s15 + $0x7a8] sm:$0xf0]  ;;  %v5671_v2 = vld [vmem:[%s8280_s15 + $0x464] sm:$0xf0]  ;;  %v5885_v3 = vld [vmem:[%s8280_s15 + $0x5d8] sm:$0xf] }
 0x361   : > { %4420 = vmatpush.bf16.msra.mxu3 %v6086_v21  ;;  %v7221_v21 = vld [vmem:[%s8280_s15 + $0x56c] sm:$0xf]  ;;  %v5674_v19 = vor.u32 %v7182_v0, %v5671_v2 }
 0x362   : > { %4481 = vmatpush.bf16.msra.mxu0 %v6298_v22  ;;  %v5827_v22 = vld [vmem:[%s8280_s15 + $0x59c] sm:$0xf0]  ;;  %v7209_v2 = vld [vmem:[%s8280_s15 + $0x50c] sm:$0xf] }
 0x363   : > { %4500 = vmatpush.bf16.msrb.mxu1 %v6402_v26  ;;  %v6614_v26 = vor.u32 %v7423_v13, %v6613_v12  ;;  %v5830_v32 = vor.u32 %v7221_v21, %v5827_v22  ;;  %v7267_v12 = vld [vmem:[%s8280_s15 + $0x6d8] sm:$0xf0]  ;;  %v6405_v13 = vld [vmem:[%s8280_s15 + $0x9e8] sm:$0xf]  ;;  %v5886_v21 = vor.u32 %v7241_v6, %v5885_v3  ;;  %v7352_v22 = vld [vmem:[%s8280_s15 + $0x984] sm:$0xf] }
 0x364   : > { %4513 = vmatpush.bf16.msrb.mxu2 %v6818_v33  ;;  %v7273_v33 = vld [vmem:[%s8280_s15 + $0x70c] sm:$0xf]  ;;  %v5783_v3 = vld [vmem:[%s8280_s15 + $0x53c] sm:$0xf0] }
 0x365   : > { %4421 = vmatpush.bf16.msra.mxu3 %v6034_v29  ;;  %v5775_v29 = vld [vmem:[%s8280_s15 + $0x534] sm:$0xf0] }
 0x366   : > { %4482 = vmatpush.bf16.msra.mxu0 %v6246_v39  ;;  %4501 = vmatmul.bf16.vlgmr.msrb.gmra.mxu1 %v8669_v58  ;;  %v6038_v39 = vor.u32 %v7273_v33, %v6035_v34  ;;  %v5778_v42 = vor.u32 %v7208_v47, %v5775_v29  ;;  %v5887_v33 = vld [vmem:[%s8280_s15 + $0x60c] sm:$0xf0]  ;;  %v7339_v29 = vld [vmem:[%s8280_s15 + $0x91c] sm:$0xf] }
 0x367   : > { %4545 = vmatpush.bf16.msra.mxu1 %v6354_v31  ;;  %6996 = vmatmul.msk.bf16.vlgmr.msrb.gmra.mxu2 %vm3865_vm8, %v8725_v5  ;;  %v7410_v31 = vld [vmem:[%s8280_s15 + $0xb50] sm:$0xf0]  ;;  %v4166_v20 = vpop.f32.mrf.mxu3 }
 0x368   : > { %4558 = vmatpush.bf16.msra.mxu2 %v6770_v36  ;;  %v4178_v36 = vadd.f32 %v9360_v62, %v4165_v27  ;;  %v6562_v60 = vor.u32 %v7410_v31, %v6561_v30  ;;  %v4257_v62 = vpop.f32.mrf.mxu2  ;;  %v5833_v27 = vld [vmem:[%s8280_s15 + $0x570] sm:$0xf]  ;;  %v6251_v20 = vld [vmem:[%s8280_s15 + $0x8e4] sm:$0xf0] }
 0x369   : > { %4422 = vmatpush.bf16.msra.mxu3 %v5982_v49  ;;  %v6041_v49 = vld [vmem:[%s8280_s15 + $0x710] sm:$0xf] }
 0x36a   : > { %4483 = vmatpush.bf16.msra.mxu0 %v6194_v55  ;;  %v9427_v38 = vadd.f32 %v9299_v44, %v4178_v36  ;;  %v5937_v44 = vld [vmem:[%s8280_s15 + $0x640] sm:$0xf]  ;;  %v7280_v55 = vld [vmem:[%s8280_s15 + $0x740] sm:$0xf0]  ;;  %v9442_v59 = vpop.f32.mrf.mxu0 }
 0x36b   : > { %4546 = vmatpush.bf16.msra.mxu1 %v6302_v43  ;;  %v6094_v43 = vor.u32 %v7293_v4, %v6093_v37  ;;  %v5938_v63 = vor.u32 %v7254_v61, %v5937_v44  ;;  %v6042_v1 = vor.u32 %v7280_v55, %v6041_v49  ;;  %v6303_v37 = vld [vmem:[%s8280_s15 + $0x94c] sm:$0xf0]  ;;  %v7156_v4 = vld [vmem:[%s8280_s15 + $0x364] sm:$0xf]  ;;  %v7326_v61 = vld [vmem:[%s8280_s15 + $0x8b4] sm:$0xf] }
 0x36c   : > { %4559 = vmatpush.bf16.msra.mxu2 %v6718_v52  ;;  %4423 = vmatmul.bf16.vlgmr.msra.gmra.mxu3 %v8664_v51  ;;  %v6510_v52 = vor.u32 %v7397_v41, %v6509_v14  ;;  %v5781_v14 = vld [vmem:[%s8280_s15 + $0x508] sm:$0xf]  ;;  %v7215_v41 = vld [vmem:[%s8280_s15 + $0x538] sm:$0xf0]  ;;  %v6306_v40 = vor.u32 %v7339_v29, %v6303_v37  ;;  %v5729_v49 = vld [vmem:[%s8280_s15 + $0x4a0] sm:$0xf] }
 0x36d   : > { %4467 = vmatpush.bf16.msrb.mxu3 %v5934_v53  ;;  %v7384_v53 = vld [vmem:[%s8280_s15 + $0xa80] sm:$0xf0]  ;;  %v5782_v44 = vor.u32 %v7215_v41, %v5781_v14  ;;  %v7202_v55 = vld [vmem:[%s8280_s15 + $0x4d0] sm:$0xf0]  ;;  %v7111_v29 = vld [vmem:[%s8280_s15 + $0x1f8] sm:$0xf0] }
 0x36e   : > { %4484 = vmatpush.bf16.msra.mxu0 %v6142_v9  ;;  %v5989_v9 = vld [vmem:[%s8280_s15 + $0x6a8] sm:$0xf]  ;;  %v7287_v41 = vld [vmem:[%s8280_s15 + $0x77c] sm:$0xf] }
 0x36f   : > { %4547 = vmatpush.bf16.msra.mxu1 %v6250_v50  ;;  %v5726_v50 = vor.u32 %v7195_v46, %v5723_v48  ;;  %v5990_v7 = vor.u32 %v7267_v12, %v5989_v9  ;;  %v5835_v46 = vld [vmem:[%s8280_s15 + $0x5a4] sm:$0xf0]  ;;  %v7313_v9 = vld [vmem:[%s8280_s15 + $0x84c] sm:$0xf]  ;;  %v6199_v12 = vld [vmem:[%s8280_s15 + $0x87c] sm:$0xf0] }
 0x370   : > { %4560 = vmatpush.bf16.msra.mxu2 %v6666_v24  ;;  %v6458_v24 = vor.u32 %v7384_v53, %v6457_v57  ;;  %v5838_v57 = vor.u32 %v7222_v45, %v5835_v46  ;;  %v5469_v53 = vld [vmem:[%s8280_s15 + $0x298] sm:$0xf]  ;;  %v5313_v45 = vld [vmem:[%s8280_s15 + $0x160] sm:$0xf] }
 0x371   : > { %4468 = vmatpush.bf16.msrb.mxu3 %v5882_v16  ;;  %v7371_v16 = vld [vmem:[%s8280_s15 + $0xa18] sm:$0xf0] }
 0x372   : > { %4485 = vmatpush.bf16.msra.mxu0 %v6090_v28  ;;  %v7228_v28 = vld [vmem:[%s8280_s15 + $0x5a0] sm:$0xf0]  ;;  %v6406_v30 = vor.u32 %v7371_v16, %v6405_v13  ;;  %v5677_v16 = vld [vmem:[%s8280_s15 + $0x438] sm:$0xf] }
 0x373   : > { %4548 = vmatpush.bf16.msra.mxu1 %v6198_v35  ;;  %v7248_v35 = vld [vmem:[%s8280_s15 + $0x644] sm:$0xf]  ;;  %v9462_v34 = vpop.f32.mrf.mxu1  ;;  %v5834_v36 = vor.u32 %v7228_v28, %v5833_v27 }
 0x374   : > { %4561 = vmatpush.bf16.msra.mxu2 %v6614_v26  ;;  %v5619_v26 = vld [vmem:[%s8280_s15 + $0x3fc] sm:$0xf0]  ;;  %v5942_v31 = vor.u32 %v7248_v35, %v5939_v18  ;;  %v7189_v35 = vld [vmem:[%s8280_s15 + $0x468] sm:$0xf0]  ;;  %v5786_v18 = vor.u32 %v7209_v2, %v5783_v3  ;;  %v7300_v28 = vld [vmem:[%s8280_s15 + $0x7e4] sm:$0xf] }
 0x375   : > { %4469 = vmatpush.bf16.msrb.mxu3 %v5830_v32  ;;  %v6358_v32 = vor.u32 %v7352_v22, %v6355_v25  ;;  %v5622_v47 = vor.u32 %v7169_v54, %v5619_v26  ;;  %v6202_v25 = vor.u32 %v7313_v9, %v6199_v12  ;;  %v7196_v54 = vld [vmem:[%s8280_s15 + $0x4a4] sm:$0xf]  ;;  %v5678_v27 = vor.u32 %v7189_v35, %v5677_v16  ;;  %v5261_v2 = vld [vmem:[%s8280_s15 + $0xf8] sm:$0xf]  ;;  %v7131_v9 = vld [vmem:[%s8280_s15 + $0x29c] sm:$0xf] }
 0x376   : > { %4486 = vmatpush.bf16.msra.mxu0 %v6038_v39  ;;  %v5567_v39 = vld [vmem:[%s8280_s15 + $0x394] sm:$0xf0]  ;;  %v5471_v12 = vld [vmem:[%s8280_s15 + $0x2cc] sm:$0xf0]  ;;  %v7157_v35 = vld [vmem:[%s8280_s15 + $0x36c] sm:$0xf] }
 0x377   : > { %4549 = vmatpush.bf16.msra.mxu1 %v6146_v11  ;;  %v7235_v11 = vld [vmem:[%s8280_s15 + $0x5dc] sm:$0xf]  ;;  %v5570_v48 = vor.u32 %v7156_v4, %v5567_v39  ;;  %v5679_v39 = vld [vmem:[%s8280_s15 + $0x46c] sm:$0xf0] }
 0x378   : > { %4562 = vmatpush.bf16.msra.mxu2 %v6562_v60  ;;  %v4231_v60 = vpop.f32.mrf.mxu0  ;;  %v5890_v62 = vor.u32 %v7235_v11, %v5887_v33  ;;  %v7176_v11 = vld [vmem:[%s8280_s15 + $0x400] sm:$0xf0] }
 0x379   : > { %4470 = vmatpush.bf16.msrb.mxu3 %v5778_v42  ;;  %v5521_v42 = vld [vmem:[%s8280_s15 + $0x300] sm:$0xf]  ;;  %v7183_v60 = vld [vmem:[%s8280_s15 + $0x43c] sm:$0xf] }
 0x37a   : > { %4487 = vmatpush.bf16.msra.mxu0 %v5986_v56  ;;  %v9480_v56 = vpop.f32.mrf.mxu2  ;;  %v5682_v46 = vor.u32 %v7183_v60, %v5679_v39  ;;  %v5893_v60 = vld [vmem:[%s8280_s15 + $0x5e0] sm:$0xf]  ;;  %v7242_v39 = vld [vmem:[%s8280_s15 + $0x610] sm:$0xf0] }
 0x37b   : > { %4550 = vmatpush.bf16.msra.mxu1 %v6094_v43  ;;  %v7150_v43 = vld [vmem:[%s8280_s15 + $0x330] sm:$0xf0]  ;;  %v4296_v6 = vpop.f32.mrf.mxu1 }
 0x37c   : > { %4563 = vmatpush.bf16.msra.mxu2 %v6510_v52  ;;  %v5522_v52 = vor.u32 %v7150_v43, %v5521_v42 }
 0x37d   : > { %4471 = vmatpush.bf16.msrb.mxu3 %v5726_v50  ;;  %4488 = vmatmul.bf16.vlgmr.msra.gmra.mxu0 %v8664_v51  ;;  %v7137_v50 = vld [vmem:[%s8280_s15 + $0x2c8] sm:$0xf0] }
 0x37e   : > { %4532 = vmatpush.bf16.msrb.mxu0 %v5938_v63  ;;  %v9485_v63 = vld [vmem:[%s9006_s18] sm:$0xff]  ;;  %v5470_v13 = vor.u32 %v7137_v50, %v5469_v53  ;;  %v6043_v50 = vld [vmem:[%s8280_s15 + $0x744] sm:$0xf0] }
 0x37f   : > { %4551 = vmatpush.bf16.msra.mxu1 %v6042_v1  ;;  %v1468_v0 = vperm.slane %v9485_v63, 5  ;;  %v6254_v1 = vor.u32 %v7326_v61, %v6251_v20  ;;  %v4216_v26 = vpop.f32.mrf.mxu3  ;;  %v5523_v61 = vld [vmem:[%s8280_s15 + $0x334] sm:$0xf0]  ;;  %v7274_v53 = vld [vmem:[%s8280_s15 + $0x714] sm:$0xf] }
 0x380   : > { %4564 = vmatpush.bf16.msra.mxu2 %v6458_v24  ;;  %v5730_v24 = vor.u32 %v7202_v55, %v5729_v49  ;;  %v7170_v49 = vld [vmem:[%s8280_s15 + $0x3d4] sm:$0xf]  ;;  %v6046_v16 = vor.u32 %v7274_v53, %v6043_v50 }
 0x381   : > { %4472 = vmatpush.bf16.msrb.mxu3 %v5674_v19  ;;  %v5417_v19 = vld [vmem:[%s8280_s15 + $0x230] sm:$0xf]  ;;  %v4204_v22 = vadd.f32 %v9362_v8, %v1468_v0 }
 0x382   : > { %4533 = vmatpush.bf16.msrb.mxu0 %v5886_v21  ;;  %v7124_v21 = vld [vmem:[%s8280_s15 + $0x260] sm:$0xf0]  ;;  %v5625_v8 = vld [vmem:[%s8280_s15 + $0x3d0] sm:$0xf]  ;;  %v4309_v33 = vpop.f32.mrf.mxu2 }
 0x383   : > { %4552 = vmatpush.bf16.msra.mxu1 %v5990_v7  ;;  %v5731_v7 = vld [vmem:[%s8280_s15 + $0x4d4] sm:$0xf0]  ;;  %v5626_v14 = vor.u32 %v7176_v11, %v5625_v8 }
 0x384   : > { %4565 = vmatpush.bf16.msra.mxu2 %v6406_v30  ;;  %v6147_v30 = vld [vmem:[%s8280_s15 + $0x814] sm:$0xf0] }
 0x385   : > { %4473 = vmatpush.bf16.msrb.mxu3 %v5622_v47  ;;  %v5734_v47 = vor.u32 %v7196_v54, %v5731_v7  ;;  %v6150_v4 = vor.u32 %v7300_v28, %v6147_v30  ;;  %v5945_v7 = vld [vmem:[%s8280_s15 + $0x648] sm:$0xf]  ;;  %v7072_v30 = vld [vmem:[%s8280_s15 + $0xc0] sm:$0xf0] }
 0x386   : > { %4534 = vmatpush.bf16.msrb.mxu0 %v5834_v36  ;;  %4553 = vmatmul.bf16.vlgmr.msra.gmra.mxu1 %v8664_v51  ;;  %v5365_v36 = vld [vmem:[%s8280_s15 + $0x1c8] sm:$0xf] }
 0x387   : > { %4597 = vmatpush.bf16.msrb.mxu1 %v5942_v31  ;;  %4566 = vmatmul.bf16.vlgmr.msra.gmra.mxu2 %v8669_v58  ;;  %v4217_v31 = vadd.f32 %v4216_v26, %v4204_v22  ;;  %v5366_v43 = vor.u32 %v7111_v29, %v5365_v36  ;;  %v4218_v55 = vpop.f32.mrf.mxu3  ;;  %v5529_v22 = vld [vmem:[%s8280_s15 + $0x308] sm:$0xf]  ;;  %v7255_v26 = vld [vmem:[%s8280_s15 + $0x678] sm:$0xf0]  ;;  %v7138_v36 = vld [vmem:[%s8280_s15 + $0x2d0] sm:$0xf0] }
 0x388   : > { %4610 = vmatpush.bf16.msrb.mxu2 %v6358_v32  ;;  %v5418_v32 = vor.u32 %v7124_v21, %v5417_v19  ;;  %v7261_v19 = vld [vmem:[%s8280_s15 + $0x6ac] sm:$0xf]  ;;  %v5991_v21 = vld [vmem:[%s8280_s15 + $0x6dc] sm:$0xf0]  ;;  %v5946_v33 = vor.u32 %v7255_v26, %v5945_v7  ;;  %v7092_v55 = vld [vmem:[%s8280_s15 + $0x164] sm:$0xf] }
 0x389   : > { %4474 = vmatpush.bf16.msrb.mxu3 %v5570_v48  ;;  %v4230_v37 = vadd.f32 %v9442_v59, %v4217_v31  ;;  %v7163_v59 = vld [vmem:[%s8280_s15 + $0x398] sm:$0xf0]  ;;  %v7098_v48 = vld [vmem:[%s8280_s15 + $0x190] sm:$0xf0]  ;;  %v5994_v8 = vor.u32 %v7261_v19, %v5991_v21  ;;  %v5263_v21 = vld [vmem:[%s8280_s15 + $0x12c] sm:$0xf0] }
 0x38a   : > { %4535 = vmatpush.bf16.msrb.mxu0 %v5782_v44  ;;  %v7144_v44 = vld [vmem:[%s8280_s15 + $0x304] sm:$0xf]  ;;  %v9524_v3 = vpop.f32.mrf.mxu0  ;;  %v7118_v31 = vld [vmem:[%s8280_s15 + $0x234] sm:$0xf]  ;;  %v7079_v19 = vld [vmem:[%s8280_s15 + $0xfc] sm:$0xf] }
 0x38b   : > { %4598 = vmatpush.bf16.msrb.mxu1 %v5890_v62  ;;  %v6095_v62 = vld [vmem:[%s8280_s15 + $0x7ac] sm:$0xf0]  ;;  %v4243_v42 = vadd.f32 %v9382_v23, %v4230_v37  ;;  %v5627_v23 = vld [vmem:[%s8280_s15 + $0x404] sm:$0xf0]  ;;  %v7099_v26 = vld [vmem:[%s8280_s15 + $0x198] sm:$0xf0] }
 0x38c   : > { %4611 = vmatpush.bf16.msrb.mxu2 %v6306_v40  ;;  %4475 = vmatmul.bf16.vlgmr.msrb.gmra.mxu3 %v8687_v17  ;;  %v5573_v40 = vld [vmem:[%s8280_s15 + $0x368] sm:$0xf]  ;;  %v5630_v6 = vor.u32 %v7170_v49, %v5627_v23  ;;  %v7229_v49 = vld [vmem:[%s8280_s15 + $0x5a8] sm:$0xf0] }
 0x38d   : > { %4519 = vmatpush.bf16.msra.mxu3 %v5522_v52  ;;  %v4256_v20 = vadd.f32 %v9407_v15, %v4243_v42  ;;  %v6098_v52 = vor.u32 %v7287_v41, %v6095_v62  ;;  %v5526_v15 = vor.u32 %v7144_v44, %v5523_v61  ;;  %v7059_v62 = vld [vmem:[%s8280_s15 + $0x58] sm:$0xf0]  ;;  %v7105_v42 = vld [vmem:[%s8280_s15 + $0x1cc] sm:$0xf]  ;;  %v5321_v7 = vld [vmem:[%s8280_s15 + $0x168] sm:$0xf] }
 0x38e   : > { %4536 = vmatpush.bf16.msrb.mxu0 %v5730_v24  ;;  %v7085_v24 = vld [vmem:[%s8280_s15 + $0x128] sm:$0xf0] }
 0x38f   : > { %4599 = vmatpush.bf16.msrb.mxu1 %v5838_v57  ;;  %v5574_v57 = vor.u32 %v7163_v59, %v5573_v40  ;;  %v4729_v0 = vrot.slane %v4256_v20, 6  ;;  %v5262_v54 = vor.u32 %v7085_v24, %v5261_v2  ;;  %v6977_v59 = vld [vmem:[%s8280_s15 + $0xe60] sm:$0xf]  ;;  %v7125_v44 = vld [vmem:[%s8280_s15 + $0x268] sm:$0xf0] }
 0x390   : > { %4612 = vmatpush.bf16.msrb.mxu2 %v6254_v1  ;;  %v5314_v1 = vor.u32 %v7098_v48, %v5313_v45  ;;  %v7514_v45 = vld [vmem:[%s8280_s15 + $0xe90] sm:$0xf0]  ;;  %v5425_v48 = vld [vmem:[%s8280_s15 + $0x238] sm:$0xf]  ;;  %v5373_v2 = vld [vmem:[%s8280_s15 + $0x1d0] sm:$0xf] }
 0x391   : > { %4520 = vmatpush.bf16.msra.mxu3 %v5470_v13  ;;  %v9531_v13 = vsel %vm4735_vm9, %v9427_v38, %v4729_v0  ;;  %v5474_v38 = vor.u32 %v7131_v9, %v5471_v12  ;;  %v6978_v23 = vor.u32 %v7514_v45, %v6977_v59  ;;  %v5426_v50 = vor.u32 %v7125_v44, %v5425_v48  ;;  %v6925_v0 = vld [vmem:[%s8280_s15 + $0xdf8] sm:$0xf]  ;;  %v5789_v12 = vld [vmem:[%s8280_s15 + $0x510] sm:$0xf]  ;;  %v7190_v59 = vld [vmem:[%s8280_s15 + $0x470] sm:$0xf0] }
 0x392   : > { %4537 = vmatpush.bf16.msrb.mxu0 %v5678_v27  ;;  %v5209_v27 = vld [vmem:[%s8280_s15 + $0x90] sm:$0xf]  ;;  %v4283_v41 = vpop.f32.mrf.mxu0  ;;  %v5159_v48 = vld [vmem:[%s8280_s15 + $0x5c] sm:$0xf0] }
 0x393   : > { %4600 = vmatpush.bf16.msrb.mxu1 %v5786_v18  ;;  %v5575_v18 = vld [vmem:[%s8280_s15 + $0x39c] sm:$0xf0]  ;;  %v9548_v29 = vpop.f32.mrf.mxu1  ;;  %v5210_v37 = vor.u32 %v7072_v30, %v5209_v27  ;;  %v5737_v30 = vld [vmem:[%s8280_s15 + $0x4a8] sm:$0xf]  ;;  %v6771_v41 = vld [vmem:[%s8280_s15 + $0xcf4] sm:$0xf0] }
 0x394   : > { %4613 = vmatpush.bf16.msrb.mxu2 %v6202_v25  ;;  %v7151_v25 = vld [vmem:[%s8280_s15 + $0x338] sm:$0xf0]  ;;  %v5578_v28 = vor.u32 %v7157_v35, %v5575_v18  ;;  %v1469_v35 = vperm.slane %v9485_v63, 6 }
 0x395   : > { %4521 = vmatpush.bf16.msra.mxu3 %v5418_v32  ;;  %v5419_v32 = vld [vmem:[%s8280_s15 + $0x264] sm:$0xf0]  ;;  %v5530_v11 = vor.u32 %v7151_v25, %v5529_v22  ;;  %v6873_v25 = vld [vmem:[%s8280_s15 + $0xd90] sm:$0xf] }
 0x396   : > { %4538 = vmatpush.bf16.msrb.mxu0 %v5626_v14  ;;  %v5157_v14 = vld [vmem:[%s8280_s15 + $0x28] sm:$0xf] }
 0x397   : > { %4601 = vmatpush.bf16.msrb.mxu1 %v5734_v47  ;;  %v5477_v47 = vld [vmem:[%s8280_s15 + $0x2a0] sm:$0xf]  ;;  %v5158_v61 = vor.u32 %v7059_v62, %v5157_v14 }
 0x398   : > { %4614 = vmatpush.bf16.msrb.mxu2 %v6150_v4  ;;  %v5422_v4 = vor.u32 %v7118_v31, %v5419_v32  ;;  %v5478_v40 = vor.u32 %v7138_v36, %v5477_v47  ;;  %v7203_v31 = vld [vmem:[%s8280_s15 + $0x4d8] sm:$0xf0]  ;;  %v5322_v36 = vor.u32 %v7099_v26, %v5321_v7  ;;  %v5269_v62 = vld [vmem:[%s8280_s15 + $0x100] sm:$0xf]  ;;  %v5581_v7 = vld [vmem:[%s8280_s15 + $0x370] sm:$0xf] }
 0x399   : > { %4522 = vmatpush.bf16.msra.mxu3 %v5366_v43  ;;  %v5367_v43 = vld [vmem:[%s8280_s15 + $0x1fc] sm:$0xf0]  ;;  %v5738_v14 = vor.u32 %v7203_v31, %v5737_v30  ;;  %v7164_v26 = vld [vmem:[%s8280_s15 + $0x3a0] sm:$0xf0]  ;;  %v7482_v31 = vld [vmem:[%s8280_s15 + $0xd94] sm:$0xf] }
 0x39a   : > { %4539 = vmatpush.bf16.msrb.mxu0 %v5574_v57  ;;  %v5370_v20 = vor.u32 %v7105_v42, %v5367_v43  ;;  %v5315_v57 = vld [vmem:[%s8280_s15 + $0x194] sm:$0xf0]  ;;  %v9566_v53 = vpop.f32.mrf.mxu2  ;;  %v7086_v42 = vld [vmem:[%s8280_s15 + $0x130] sm:$0xf0] }
 0x39b   : > { %4602 = vmatpush.bf16.msrb.mxu1 %v5682_v46  ;;  %v5894_v46 = vor.u32 %v7242_v39, %v5893_v60  ;;  %v4348_v24 = vpop.f32.mrf.mxu1  ;;  %v5318_v9 = vor.u32 %v7092_v55, %v5315_v57  ;;  %v7456_v60 = vld [vmem:[%s8280_s15 + $0xcc4] sm:$0xf]  ;;  %v6719_v55 = vld [vmem:[%s8280_s15 + $0xc8c] sm:$0xf0]  ;;  %v5217_v57 = vld [vmem:[%s8280_s15 + $0x98] sm:$0xf] }
 0x39c   : > { %4615 = vmatpush.bf16.msrb.mxu2 %v6098_v52  ;;  %v5841_v52 = vld [vmem:[%s8280_s15 + $0x578] sm:$0xf]  ;;  %v6774_v44 = vor.u32 %v7456_v60, %v6771_v41 }
 0x39d   : > { %4523 = vmatpush.bf16.msra.mxu3 %v5314_v1  ;;  %4540 = vmatmul.bf16.vlgmr.msrb.gmra.mxu0 %v8687_v17  ;;  %v7501_v1 = vld [vmem:[%s8280_s15 + $0xe28] sm:$0xf0] }
 0x39e   : > { %4584 = vmatpush.bf16.msra.mxu0 %v5526_v15  ;;  %v5842_v15 = vor.u32 %v7229_v49, %v5841_v52  ;;  %v6926_v18 = vor.u32 %v7501_v1, %v6925_v0  ;;  %v6979_v52 = vld [vmem:[%s8280_s15 + $0xe94] sm:$0xf0]  ;;  %v7443_v49 = vld [vmem:[%s8280_s15 + $0xc5c] sm:$0xf] }
 0x39f   : > { %4603 = vmatpush.bf16.msrb.mxu1 %v5630_v6  ;;  %v7112_v6 = vld [vmem:[%s8280_s15 + $0x200] sm:$0xf0]  ;;  %v4268_v27 = vpop.f32.mrf.mxu3 }
 0x3a0   : > { %4616 = vmatpush.bf16.msrb.mxu2 %v6046_v16  ;;  %v7216_v16 = vld [vmem:[%s8280_s15 + $0x540] sm:$0xf0]  ;;  %v5374_v22 = vor.u32 %v7112_v6, %v5373_v2  ;;  %v4269_v32 = vadd.f32 %v4268_v27, %v1469_v35  ;;  %v5633_v2 = vld [vmem:[%s8280_s15 + $0x3d8] sm:$0xf]  ;;  %v7177_v6 = vld [vmem:[%s8280_s15 + $0x408] sm:$0xf0] }
 0x3a1   : > { %4524 = vmatpush.bf16.msra.mxu3 %v5262_v54  ;;  %v7488_v54 = vld [vmem:[%s8280_s15 + $0xdc0] sm:$0xf0]  ;;  %v7430_v35 = vld [vmem:[%s8280_s15 + $0xbf4] sm:$0xf] }
 0x3a2   : > { %4585 = vmatpush.bf16.msra.mxu0 %v5474_v38  ;;  %v5790_v38 = vor.u32 %v7216_v16, %v5789_v12  ;;  %v4361_v47 = vpop.f32.mrf.mxu2  ;;  %v4282_v39 = vadd.f32 %v9524_v3, %v4269_v32  ;;  %v7495_v12 = vld [vmem:[%s8280_s15 + $0xdfc] sm:$0xf]  ;;  %v6927_v16 = vld [vmem:[%s8280_s15 + $0xe2c] sm:$0xf0]  ;;  %v9622_v27 = vld [vmem:[%s9006_s18 + $0x8] sm:$0x1f] }
 0x3a3   : > { %4604 = vmatpush.bf16.msrb.mxu1 %v5578_v28  ;;  %v5266_v28 = vor.u32 %v7079_v19, %v5263_v21  ;;  %v5165_v19 = vld [vmem:[%s8280_s15 + $0x30] sm:$0xf]  ;;  %v7060_v21 = vld [vmem:[%s8280_s15 + $0x60] sm:$0xf0]  ;;  %v6875_v32 = vld [vmem:[%s8280_s15 + $0xdc4] sm:$0xf0] }
 0x3a4   : > { %4617 = vmatpush.bf16.msrb.mxu2 %v5994_v8  ;;  %v6874_v8 = vor.u32 %v7488_v54, %v6873_v25  ;;  %v4295_v3 = vadd.f32 %v9462_v34, %v4282_v39  ;;  %v6985_v25 = vld [vmem:[%s8280_s15 + $0xe68] sm:$0xf]  ;;  %v7515_v54 = vld [vmem:[%s8280_s15 + $0xe98] sm:$0xf0]  ;;  %v5166_v30 = vor.u32 %v7060_v21, %v5165_v19  ;;  %v1471_v60 = vperm.slane %v9622_v27, 0 }
 0x3a5   : > { %4525 = vmatpush.bf16.msra.mxu3 %v5210_v37  ;;  %v6821_v37 = vld [vmem:[%s8280_s15 + $0xd28] sm:$0xf]  ;;  %v7437_v19 = vld [vmem:[%s8280_s15 + $0xc28] sm:$0xf0] }
 0x3a6   : > { %4586 = vmatpush.bf16.msra.mxu0 %v5422_v4  ;;  %4605 = vmatmul.bf16.vlgmr.msrb.gmra.mxu1 %v8687_v17  ;;  %v7475_v4 = vld [vmem:[%s8280_s15 + $0xd58] sm:$0xf0]  ;;  %v9605_v0 = vadd.f32 %v9480_v56, %v4295_v3  ;;  %v6881_v3 = vld [vmem:[%s8280_s15 + $0xd98] sm:$0xf] }
 0x3a7   : > { %4649 = vmatpush.bf16.msra.mxu1 %v5530_v11  ;;  %4618 = vmatmul.bf16.vlgmr.msrb.gmra.mxu2 %v8664_v51  ;;  %v7066_v11 = vld [vmem:[%s8280_s15 + $0x94] sm:$0xf]  ;;  %v6822_v45 = vor.u32 %v7475_v4, %v6821_v37  ;;  %v4270_v34 = vpop.f32.mrf.mxu3  ;;  %v6933_v37 = vld [vmem:[%s8280_s15 + $0xe00] sm:$0xf] }
 0x3a8   : > { %4662 = vmatpush.bf16.msra.mxu2 %v5946_v33  ;;  %v5211_v33 = vld [vmem:[%s8280_s15 + $0xc4] sm:$0xf0]  ;;  %v7502_v4 = vld [vmem:[%s8280_s15 + $0xe30] sm:$0xf0] }
 0x3a9   : > { %4526 = vmatpush.bf16.msra.mxu3 %v5158_v61  ;;  %v5214_v43 = vor.u32 %v7066_v11, %v5211_v33  ;;  %v5270_v61 = vor.u32 %v7086_v42, %v5269_v62  ;;  %v6615_v11 = vld [vmem:[%s8280_s15 + $0xbbc] sm:$0xf0]  ;;  %v6986_v33 = vor.u32 %v7515_v54, %v6985_v25  ;;  %v7469_v42 = vld [vmem:[%s8280_s15 + $0xd2c] sm:$0xf] }
 0x3aa   : > { %4587 = vmatpush.bf16.msra.mxu0 %v5370_v20  ;;  %v7508_v20 = vld [vmem:[%s8280_s15 + $0xe64] sm:$0xf]  ;;  %v9609_v24 = vpop.f32.mrf.mxu0 }
 0x3ab   : > { %4650 = vmatpush.bf16.msra.mxu1 %v5478_v40  ;;  %v5685_v40 = vld [vmem:[%s8280_s15 + $0x440] sm:$0xf] }
 0x3ac   : > { %4663 = vmatpush.bf16.msra.mxu2 %v5894_v46  ;;  %4527 = vmatmul.bf16.vlgmr.msra.gmra.mxu3 %v8680_v10  ;;  %v7053_v46 = vld [vmem:[%s8280_s15 + $0x2c] sm:$0xf] }
 0x3ad   : > { %4575 = vmatpush.bf16.msrb.mxu3 %v6978_v23  ;;  %v5686_v23 = vor.u32 %v7190_v59, %v5685_v40  ;;  %v5162_v1 = vor.u32 %v7053_v46, %v5159_v48  ;;  %v7404_v40 = vld [vmem:[%s8280_s15 + $0xb24] sm:$0xf]  ;;  %v6563_v59 = vld [vmem:[%s8280_s15 + $0xb54] sm:$0xf0]  ;;  %v7463_v46 = vld [vmem:[%s8280_s15 + $0xcf8] sm:$0xf0]  ;;  %v6934_v48 = vor.u32 %v7502_v4, %v6933_v37 }
 0x3ae   : > { %4588 = vmatpush.bf16.msra.mxu0 %v5318_v9  ;;  %v6722_v9 = vor.u32 %v7443_v49, %v6719_v55  ;;  %v7391_v49 = vld [vmem:[%s8280_s15 + $0xabc] sm:$0xf]  ;;  %v6511_v55 = vld [vmem:[%s8280_s15 + $0xaec] sm:$0xf0]  ;;  %v6569_v4 = vld [vmem:[%s8280_s15 + $0xb28] sm:$0xf] }
 0x3af   : > { %4651 = vmatpush.bf16.msra.mxu1 %v5426_v50  ;;  %v7073_v50 = vld [vmem:[%s8280_s15 + $0xc8] sm:$0xf0]  ;;  %v9631_v47 = vpop.f32.mrf.mxu3 }
 0x3b0   : > { %4664 = vmatpush.bf16.msra.mxu2 %v5842_v15  ;;  %v6982_v15 = vor.u32 %v7508_v20, %v6979_v52  ;;  %v5218_v56 = vor.u32 %v7073_v50, %v5217_v57  ;;  %v6566_v20 = vor.u32 %v7404_v40, %v6563_v59  ;;  %v6725_v57 = vld [vmem:[%s8280_s15 + $0xc60] sm:$0xf]  ;;  %v7450_v50 = vld [vmem:[%s8280_s15 + $0xc90] sm:$0xf0]  ;;  %v6257_v40 = vld [vmem:[%s8280_s15 + $0x8b8] sm:$0xf] }
 0x3b1   : > { %4576 = vmatpush.bf16.msrb.mxu3 %v6926_v18  ;;  %v6667_v18 = vld [vmem:[%s8280_s15 + $0xc24] sm:$0xf0]  ;;  %v7333_v59 = vld [vmem:[%s8280_s15 + $0x8e8] sm:$0xf0] }
 0x3b2   : > { %4589 = vmatpush.bf16.msra.mxu0 %v5266_v28  ;;  %v6670_v28 = vor.u32 %v7430_v35, %v6667_v18  ;;  %v4335_v41 = vpop.f32.mrf.mxu0  ;;  %v6459_v35 = vld [vmem:[%s8280_s15 + $0xa84] sm:$0xf0]  ;;  %v6673_v18 = vld [vmem:[%s8280_s15 + $0xbf8] sm:$0xf] }
 0x3b3   : > { %4652 = vmatpush.bf16.msra.mxu1 %v5374_v22  ;;  %v5634_v22 = vor.u32 %v7177_v6, %v5633_v2  ;;  %v4398_v39 = vpop.f32.mrf.mxu1  ;;  %v7476_v2 = vld [vmem:[%s8280_s15 + $0xd60] sm:$0xf0]  ;;  %v6674_v54 = vor.u32 %v7437_v19, %v6673_v18  ;;  %v6049_v19 = vld [vmem:[%s8280_s15 + $0x718] sm:$0xf] }
 0x3b4   : > { %4665 = vmatpush.bf16.msra.mxu2 %v5790_v38  ;;  %v6930_v38 = vor.u32 %v7495_v12, %v6927_v16  ;;  %v6726_v12 = vor.u32 %v7450_v50, %v6725_v57  ;;  %v7378_v16 = vld [vmem:[%s8280_s15 + $0xa54] sm:$0xf]  ;;  %v7372_v50 = vld [vmem:[%s8280_s15 + $0xa20] sm:$0xf0] }
 0x3b5   : > { %4577 = vmatpush.bf16.msrb.mxu3 %v6874_v8  ;;  %v7417_v8 = vld [vmem:[%s8280_s15 + $0xb8c] sm:$0xf]  ;;  %v6462_v25 = vor.u32 %v7378_v16, %v6459_v35  ;;  %v7294_v16 = vld [vmem:[%s8280_s15 + $0x7b0] sm:$0xf0] }
 0x3b6   : > { %4590 = vmatpush.bf16.msra.mxu0 %v5214_v43  ;;  %v6618_v62 = vor.u32 %v7417_v8, %v6615_v11  ;;  %v6823_v43 = vld [vmem:[%s8280_s15 + $0xd5c] sm:$0xf0] }
 0x3b7   : > { %4653 = vmatpush.bf16.msra.mxu1 %v5322_v36  ;;  %v5582_v36 = vor.u32 %v7164_v26, %v5581_v7  ;;  %v6407_v7 = vld [vmem:[%s8280_s15 + $0xa1c] sm:$0xf0]  ;;  %v6621_v26 = vld [vmem:[%s8280_s15 + $0xb90] sm:$0xf] }
 0x3b8   : > { %4666 = vmatpush.bf16.msra.mxu2 %v5738_v14  ;;  %v6878_v14 = vor.u32 %v7482_v31, %v6875_v32  ;;  %v6361_v31 = vld [vmem:[%s8280_s15 + $0x988] sm:$0xf]  ;;  %v7359_v32 = vld [vmem:[%s8280_s15 + $0x9b8] sm:$0xf0] }
 0x3b9   : > { %4578 = vmatpush.bf16.msrb.mxu3 %v6822_v45  ;;  %v6777_v45 = vld [vmem:[%s8280_s15 + $0xcc8] sm:$0xf]  ;;  %v6362_v37 = vor.u32 %v7359_v32, %v6361_v31 }
 0x3ba   : > { %4591 = vmatpush.bf16.msra.mxu0 %v5162_v1  ;;  %v6778_v52 = vor.u32 %v7463_v46, %v6777_v45  ;;  %v4411_v1 = vpop.f32.mrf.mxu2 }
 0x3bb   : > { %4654 = vmatpush.bf16.msra.mxu1 %v5270_v61  ;;  %v6826_v61 = vor.u32 %v7469_v42, %v6823_v43  ;;  %v6517_v42 = vld [vmem:[%s8280_s15 + $0xac0] sm:$0xf]  ;;  %v7398_v43 = vld [vmem:[%s8280_s15 + $0xaf0] sm:$0xf0] }
 0x3bc   : > { %4667 = vmatpush.bf16.msra.mxu2 %v5686_v23  ;;  %6997 = vmatmul.msk.bf16.vlgmr.msrb.gmra.mxu3 %vm3865_vm8, %v8725_v5  ;;  %v4399_v23 = vadd.f32 %v4398_v39, %v1471_v60  ;;  %v7411_v60 = vld [vmem:[%s8280_s15 + $0xb58] sm:$0xf0]  ;;  %v6309_v39 = vld [vmem:[%s8280_s15 + $0x920] sm:$0xf]  ;;  %v6518_v46 = vor.u32 %v7398_v43, %v6517_v42 }
 0x3bd   : > { %4623 = vmatpush.bf16.msra.mxu3 %v6774_v44  ;;  %4592 = vmatmul.bf16.vlgmr.msra.gmra.mxu0 %v8680_v10  ;;  %v7489_v44 = vld [vmem:[%s8280_s15 + $0xdc8] sm:$0xf0] }
 0x3be   : > { %4640 = vmatpush.bf16.msrb.mxu0 %v6982_v15  ;;  %v6882_v34 = vor.u32 %v7489_v44, %v6881_v3  ;;  %v6829_v15 = vld [vmem:[%s8280_s15 + $0xd30] sm:$0xf]  ;;  %v9652_v6 = vadd.f32 %v4411_v1, %v4399_v23  ;;  %v6258_v44 = vor.u32 %v7333_v59, %v6257_v40  ;;  %v7307_v1 = vld [vmem:[%s8280_s15 + $0x818] sm:$0xf0] }
 0x3bf   : > { %4655 = vmatpush.bf16.msra.mxu1 %v5218_v56  ;;  %v6514_v56 = vor.u32 %v7391_v49, %v6511_v55  ;;  %v6830_v21 = vor.u32 %v7476_v2, %v6829_v15  ;;  %v7320_v49 = vld [vmem:[%s8280_s15 + $0x880] sm:$0xf0] }
 0x3c0   : > { %4668 = vmatpush.bf16.msra.mxu2 %v5634_v22  ;;  %v1470_v22 = vperm.slane %v9485_v63, 7 }
 0x3c1   : > { %4624 = vmatpush.bf16.msra.mxu3 %v6722_v9  ;;  %v4400_v9 = vpop.f32.mrf.mxu1 }
 0x3c2   : > { %4641 = vmatpush.bf16.msrb.mxu0 %v6930_v38  ;;  %v7365_v38 = vld [vmem:[%s8280_s15 + $0x9ec] sm:$0xf]  ;;  %v4334_v63 = vadd.f32 %v9609_v24, %v1470_v22  ;;  %v6570_v24 = vor.u32 %v7411_v60, %v6569_v4 }
 0x3c3   : > { %4656 = vmatpush.bf16.msra.mxu1 %v5166_v30  ;;  %v4413_v30 = vpop.f32.mrf.mxu2 }
 0x3c4   : > { %4669 = vmatpush.bf16.msra.mxu2 %v5582_v36  ;;  %v4347_v41 = vadd.f32 %v9548_v29, %v4334_v63 }
 0x3c5   : > { %4625 = vmatpush.bf16.msra.mxu3 %v6670_v28  ;;  %v7424_v28 = vld [vmem:[%s8280_s15 + $0xbc0] sm:$0xf0] }
 0x3c6   : > { %4642 = vmatpush.bf16.msrb.mxu0 %v6878_v14  ;;  %4657 = vmatmul.bf16.vlgmr.msra.gmra.mxu1 %v8680_v10  ;;  %v4322_v10 = vpop.f32.mrf.mxu3  ;;  %v6622_v36 = vor.u32 %v7424_v28, %v6621_v26  ;;  %v7346_v14 = vld [vmem:[%s8280_s15 + $0x950] sm:$0xf0]  ;;  %v4360_v29 = vadd.f32 %v9566_v53, %v4347_v41 }
 0x3c7   : > { %4705 = vmatpush.bf16.msrb.mxu1 %v6986_v33  ;;  %4670 = vmatmul.bf16.vlgmr.msra.gmra.mxu2 %v8687_v17  ;;  %v4385_v17 = vpop.f32.mrf.mxu0  ;;  %v6410_v33 = vor.u32 %v7365_v38, %v6407_v7  ;;  %v7268_v38 = vld [vmem:[%s8280_s15 + $0x6e0] sm:$0xf0] }
 0x3c9   : > { %4626 = vmatpush.bf16.msra.mxu3 %v6618_v62  ;;  %v9668_v8 = vpop.f32.mrf.mxu1  ;;  %v6310_v62 = vor.u32 %v7346_v14, %v6309_v39  ;;  %v1472_v39 = vperm.slane %v9622_v27, 1 }
 0x3ca   : > { %4643 = vmatpush.bf16.msrb.mxu0 %v6826_v61  ;;  %v6465_v61 = vld [vmem:[%s8280_s15 + $0xa58] sm:$0xf] }
 0x3cb   : > { %4706 = vmatpush.bf16.msrb.mxu1 %v6934_v48  ;;  %v4321_v48 = vadd.f32 %v9631_v47, %v9605_v0  ;;  %v6413_v47 = vld [vmem:[%s8280_s15 + $0x9f0] sm:$0xf] }
 0x3cc   : > { %v6414_v9 = vor.u32 %v7372_v50, %v6413_v47 }
 0x3cd   : > { %4627 = vmatpush.bf16.msra.mxu3 %v6566_v20  ;;  %6998 = vmatmul.msk.bf16.vlgmr.msrb.gmra.mxu0 %vm3865_vm8, %v8725_v5  ;;  %v7385_v20 = vld [vmem:[%s8280_s15 + $0xa88] sm:$0xf0]  ;;  %v4730_v55 = vrot.slane %v4321_v48, 4 }
 0x3ce   : > { %4688 = vmatpush.bf16.msra.mxu0 %v6778_v52  ;;  %v6205_v52 = vld [vmem:[%s8280_s15 + $0x850] sm:$0xf]  ;;  %v6466_v53 = vor.u32 %v7385_v20, %v6465_v61 }
 0x3cf   : > { %4707 = vmatpush.bf16.msrb.mxu1 %v6882_v34  ;;  %v4387_v11 = vpop.f32.mrf.mxu0  ;;  %v6206_v0 = vor.u32 %v7320_v49, %v6205_v52  ;;  %v6153_v34 = vld [vmem:[%s8280_s15 + $0x7e8] sm:$0xf] }
 0x3d1   : > { %4628 = vmatpush.bf16.msra.mxu3 %v6514_v56  ;;  %v4452_v45 = vpop.f32.mrf.mxu1 }
 0x3d2   : > { %4689 = vmatpush.bf16.msra.mxu0 %v6726_v12  ;;  %v6101_v12 = vld [vmem:[%s8280_s15 + $0x780] sm:$0xf] }
 0x3d3   : > { %4708 = vmatpush.bf16.msrb.mxu1 %v6830_v21  ;;  %v6102_v18 = vor.u32 %v7294_v16, %v6101_v12  ;;  %v7281_v21 = vld [vmem:[%s8280_s15 + $0x748] sm:$0xf0] }
 0x3d4   : > { %v6050_v22 = vor.u32 %v7281_v21, %v6049_v19 }
 0x3d5   : > { %4629 = vmatpush.bf16.msra.mxu3 %v6462_v25 }
 0x3d6   : > { %4690 = vmatpush.bf16.msra.mxu0 %v6674_v54  ;;  %6999 = vmatmul.msk.bf16.vlgmr.msrb.gmra.mxu1 %vm3865_vm8, %v8725_v5  ;;  %v4372_v5 = vpop.f32.mrf.mxu3  ;;  %v5997_v54 = vld [vmem:[%s8280_s15 + $0x6b0] sm:$0xf]  ;;  %s4755_s15 = scalar_lea.sflag [#allocation4], %s8277_s1 }
 0x3d7   : > { %v4373_v3 = vadd.f32 %v4372_v5, %v4360_v29  ;;  %v5998_v26 = vor.u32 %v7268_v38, %v5997_v54 }
 0x3d9   : > { %4630 = vmatpush.bf16.msra.mxu3 %v6410_v33  ;;  %v4386_v23 = vadd.f32 %v4385_v17, %v4373_v3  ;;  %v6154_v17 = vor.u32 %v7307_v1, %v6153_v34  ;;  %v1473_v3 = vperm.slane %v9622_v27, 2 }
 0x3da   : > { %4691 = vmatpush.bf16.msra.mxu0 %v6622_v36  ;;  %v4437_v56 = vpop.f32.mrf.mxu0  ;;  %v4463_v35 = vpop.f32.mrf.mxu2 }
 0x3db   : > { %v4731_v57 = vrot.slane %v4386_v23, 2  ;;  %v4464_v41 = vadd.f32 %v4463_v35, %v1472_v39 }
 0x3dc   : > { %4631 = vmatmul.bf16.vlgmr.msra.gmra.mxu3 %v8669_v58 }
 0x3dd   : > { %4675 = vmatpush.bf16.msrb.mxu3 %v6362_v37  ;;  %v4742_v10 = vsel %vm4737_vm10, %v4730_v55, %v4731_v57 }
 0x3de   : > { %4692 = vmatpush.bf16.msra.mxu0 %v6570_v24  ;;  %v4743_v15 = vsel %vm4739_vm11, %v9531_v13, %v4742_v10  ;;  %v4374_v2 = vpop.f32.mrf.mxu3 }
 0x3df   : > { %4751 = vst [vmem:[%s9353_s27 + $0x8] sm:$0xff] %v4743_v15  ;;  %v1474_v15 = vperm.slane %v9622_v27, 3 }
 0x3e1   : > { %4676 = vmatpush.bf16.msrb.mxu3 %v6310_v62 }
 0x3e2   : > { %4693 = vmatpush.bf16.msra.mxu0 %v6518_v46  ;;  %v4439_v25 = vpop.f32.mrf.mxu0  ;;  %v4465_v7 = vpop.f32.mrf.mxu2 }
 0x3e3   : > { %v4502_v13 = vpop.f32.mrf.mxu1 }
 0x3e5   : > { %4677 = vmatpush.bf16.msrb.mxu3 %v6258_v44 }
 0x3e6   : > { %4694 = vmatpush.bf16.msra.mxu0 %v6466_v53 }
 0x3e9   : > { %4678 = vmatpush.bf16.msrb.mxu3 %v6206_v0 }
 0x3ea   : > { %4695 = vmatpush.bf16.msra.mxu0 %v6414_v9  ;;  %v4515_v30 = vpop.f32.mrf.mxu2 }
 0x3eb   : > { %v4504_v28 = vpop.f32.mrf.mxu1 }
 0x3ed   : > { %4679 = vmatpush.bf16.msrb.mxu3 %v6154_v17  ;;  %4696 = vmatmul.bf16.vlgmr.msra.gmra.mxu0 %v8669_v58 }
 0x3ef   : > { %v4424_v31 = vpop.f32.mrf.mxu3 }
 0x3f0   : > { %v4425_v32 = vadd.f32 %v4424_v31, %v9652_v6 }
 0x3f1   : > { %4680 = vmatpush.bf16.msrb.mxu3 %v6102_v18 }
 0x3f2   : > { %v4438_v63 = vadd.f32 %v4437_v56, %v4425_v32  ;;  %v4517_v11 = vpop.f32.mrf.mxu2 }
 0x3f4   : > { %v4451_v58 = vadd.f32 %v9668_v8, %v4438_v63 }
 0x3f5   : > { %4681 = vmatpush.bf16.msrb.mxu3 %v6050_v22 }
 0x3f7   : > { %v4426_v33 = vpop.f32.mrf.mxu3 }
 0x3f9   : > { %4682 = vmatpush.bf16.msrb.mxu3 %v5998_v26 }
 0x3fa   : > { %v4489_v36 = vpop.f32.mrf.mxu0 }
 0x3fc   : > { %4683 = vmatmul.bf16.vlgmr.msrb.gmra.mxu3 %v8664_v51 }
 0x402   : > { %v4491_v4 = vpop.f32.mrf.mxu0 }
 0x403   : > { %v4554_v37 = vpop.f32.mrf.mxu1 }
 0x40a   : > { %v4567_v60 = vpop.f32.mrf.mxu2 }
 0x40b   : > { %v4556_v14 = vpop.f32.mrf.mxu1 }
 0x40f   : > { %v4476_v24 = vpop.f32.mrf.mxu3 }
 0x410   : > { %v4477_v62 = vadd.f32 %v4476_v24, %v4464_v41 }
 0x412   : > { %v4569_v42 = vpop.f32.mrf.mxu2  ;;  %v4490_v51 = vadd.f32 %v4489_v36, %v4477_v62 }
 0x414   : > { %v4503_v43 = vadd.f32 %v4502_v13, %v4490_v51 }
 0x416   : > { %v4516_v40 = vadd.f32 %v4515_v30, %v4503_v43  ;;  %v1475_v30 = vperm.slane %v9622_v27, 4 }
 0x417   : > { %v4478_v6 = vpop.f32.mrf.mxu3 }
 0x418   : > { %v4732_v59 = vrot.slane %v4516_v40, 6 }
 0x41a   : > { %v4541_v29 = vpop.f32.mrf.mxu0  ;;  %v4744_v8 = vsel %vm4735_vm9, %v4451_v58, %v4732_v59 }
 0x422   : > { %v4543_v5 = vpop.f32.mrf.mxu0 }
 0x423   : > { %v4606_v45 = vpop.f32.mrf.mxu1 }
 0x42a   : > { %v4619_v46 = vpop.f32.mrf.mxu2 }
 0x42b   : > { %v4608_v48 = vpop.f32.mrf.mxu1 }
 0x42f   : > { %v4528_v44 = vpop.f32.mrf.mxu3 }
 0x430   : > { %v4529_v61 = vadd.f32 %v4528_v44, %v1473_v3 }
 0x432   : > { %v4621_v20 = vpop.f32.mrf.mxu2  ;;  %v4542_v52 = vadd.f32 %v4541_v29, %v4529_v61 }
 0x434   : > { %v4555_v49 = vadd.f32 %v4554_v37, %v4542_v52 }
 0x436   : > { %v4568_v23 = vadd.f32 %v4567_v60, %v4555_v49 }
 0x437   : > { %v4530_v53 = vpop.f32.mrf.mxu3 }
 0x43a   : > { %v4593_v55 = vpop.f32.mrf.mxu0 }
 0x43b   : > { %v4594_v9 = vadd.f32 %v4593_v55, %v1474_v15 }
 0x43d   : > { %v4607_v12 = vadd.f32 %v4606_v45, %v4594_v9 }
 0x43f   : > { %v4580_v57 = vpop.f32.mrf.mxu3  ;;  %v4620_v35 = vadd.f32 %v4619_v46, %v4607_v12 }
 0x440   : > { %v4581_v19 = vadd.f32 %v4580_v57, %v4568_v23 }
 0x442   : > { %v4595_v47 = vpop.f32.mrf.mxu0  ;;  %v4733_v22 = vrot.slane %v4581_v19, 4 }
 0x443   : > { %v4658_v0 = vpop.f32.mrf.mxu1 }
 0x444   : > { %v4659_v31 = vadd.f32 %v4658_v0, %v1475_v30 }
 0x447   : > { %v4582_v34 = vpop.f32.mrf.mxu3 }
 0x44a   : > { %v4671_v50 = vpop.f32.mrf.mxu2  ;;  %v4645_v10 = vpop.f32.mrf.mxu0 }
 0x44b   : > { %v4660_v1 = vpop.f32.mrf.mxu1  ;;  %v4672_v32 = vadd.f32 %v4671_v50, %v4659_v31 }
 0x452   : > { %v4673_v2 = vpop.f32.mrf.mxu2  ;;  %v4647_v56 = vpop.f32.mrf.mxu0 }
 0x453   : > { %v4710_v17 = vpop.f32.mrf.mxu1 }
 0x45b   : > { %v4712_v16 = vpop.f32.mrf.mxu1 }
 0x45f   : > { %v4632_v18 = vpop.f32.mrf.mxu3 }
 0x460   : > { %v4633_v21 = vadd.f32 %v4632_v18, %v4620_v35 }
 0x462   : > { %v4646_v13 = vadd.f32 %v4645_v10, %v4633_v21 }
 0x464   : > { %v4734_v25 = vrot.slane %v4646_v13, 2 }
 0x466   : > { %v4745_v54 = vsel %vm4737_vm10, %v4733_v22, %v4734_v25 }
 0x467   : > { %v4746_v38 = vsel %vm4739_vm11, %v4744_v8, %v4745_v54  ;;  %v4634_v7 = vpop.f32.mrf.mxu3 }
 0x468   : > { %4752 = vst [vmem:[%s9353_s27 + $0x10] sm:$0xff] %v4746_v38 }
 0x46a   : > { %v4697_v26 = vpop.f32.mrf.mxu0 }
 0x472   : > { %v4699_v28 = vpop.f32.mrf.mxu0 }
 0x47f   : > { %v4684_v63 = vpop.f32.mrf.mxu3 }
 0x480   : > { %v4685_v58 = vadd.f32 %v4684_v63, %v4672_v32 }
 0x482   : > { %v4698_v11 = vadd.f32 %v4697_v26, %v4685_v58 }
 0x483   : > { %4761 = sbr.rel (!%p9817_p6) target bundleno = 1190 (0x4a6), region = 92 }
 0x484   : > { %v4711_v33 = vadd.f32 %v4710_v17, %v4698_v11 }
 0x486   : > { %4753 = vst [vmem:[%s9353_s27 + $0x18] sm:$0x3] %v4711_v33 }
 0x487   : > { %v4686_v36 = vpop.f32.mrf.mxu3 }
 0x488   : > { %s9835_s22 = smov (!%p4764_p8, %s4763_s22), 13 }
 0x489   : > { %s7000_s29 = sshll.u32 %s9835_s22, 1 }
 0x48a   : > { %s4767_s23 = ssub.s32 26, %s7000_s29 }
 0x48b   : > { %s4768_s16 = sshll.u32 %s4767_s23, 4 }
 0x48c   : > { %4769 = vsyncadd %s4755_s15, %s4768_s16  ;;  %p9725_p9 = scmp.ne.s32.totalorder %s7000_s29, 0  ;;  %s7516_s14 = smul.u32 26, %s8081_s13 }
 0x48d   : > { %s7004_s20 = sshll.u32 %s9835_s22, 5  ;;  %s4775_s30 = sshll.u32 %s9353_s27, 4  ;;  %s9735_s30 = int_to_ptr.vmem [resolvable:$true] %s4775_s30 }
 0x48e   : > { %s4772_s28 = scalar_lea.hbm %s9784_s9, %s7516_s14  ;;  %s7902_s0 = sshra.s32 %s9735_s30, 4  ;;  %s7903_s0 = int_to_ptr.vmem [resolvable:$true] %s7902_s0 }
 0x48f   : > { %s4777_s25 = sshll.u32 %s4772_s28, 4  ;;  %s7904_s17 = sshrl.u32 %s7004_s20, 4  ;;  %s4778_s25 = int_to_ptr.hbm [resolvable:$true] %s4777_s25 }
 0x490   : > { %s7909_s18 = scalar_lea.vmem %s7903_s0, %s7904_s17  ;;  %s8009_s13 = smov [#allocation15]  }
 0x491   : > { %p7910_p10 = scmp.ne.s32.totalorder %s7903_s0, %s7909_s18  ;;  %s7913_s26 = scalar_lea.vmem %s8009_s13, 52 }
 0x492   : > { %p7915_p12 = scmp.lt.s32.totalorder %s7913_s26, %s7909_s18 }
 0x493   : > { %p7911_p4 = pnand %p7910_p10, %p9725_p9 }
 0x495   : > { %p7912_p11 = pneg %p7911_p4 }
 0x497   : > { %p7917_p2 = pnand %p7915_p12, %p7912_p11 }
 0x499   : > { %7920 = shalt.err (!%p7917_p2)
}
 0x49a   : > { %s7921_s27 = sshra.s32 %s4778_s25, 4  ;;  %s7932_s16 = scalar_lea.hbm %s9784_s9, 50  ;;  %s7922_s27 = int_to_ptr.hbm [resolvable:$true] %s7921_s27 }
 0x49b   : > { %s7928_s19 = scalar_lea.hbm %s7922_s27, %s7904_s17  ;;  %p7933_p5 = scmp.lt.s32.totalorder %s7922_s27, %s9784_s9 }
 0x49c   : > { %p7929_p7 = scmp.ne.s32.totalorder %s7922_s27, %s7928_s19  ;;  %p7934_p13 = scmp.lt.s32.totalorder %s7932_s16, %s7928_s19 }
 0x49e   : > { %p7930_p1 = pnand %p7929_p7, %p9725_p9  ;;  %p7935_p3 = por %p7934_p13, %p7933_p5 }
 0x4a0   : > { %p7931_p0 = pneg %p7930_p1 }
 0x4a2   : > { %p7936_p6 = pnand %p7935_p3, %p7931_p0 }
 0x4a4   : > { %7939 = shalt.err (!%p7936_p6)
}
 0x4a5   : > { %4780 = dma.vmem_to_hbm [thread:$0]  (%p9725_p9), %s9735_s30, %s7004_s20, %s4778_s25, %s4755_s15  }
 0x4a6 PF: > { %s9819_s3 = sld [smem:[#allocation22_spill]]  ;;  %p9822_p10 = scmp.ge.s32.totalorder %s7995_s12, 2 }
 0x4a7   : > { %s9820_s28 = sld [smem:[#allocation25_spill]] }
 0x4ac   : > { %s4789_s0 = sand.u32 1, %s9819_s3  }
 0x4ad   : > { %p9821_p8 = scmp.ne.s32.totalorder %s9820_s28, 0  ;;  %s4790_s17 = scalar_lea.sflag [#allocation4], %s4789_s0 }
 0x4af   : > { %p7569_p4 = pnand %p9822_p10, %p9821_p8 }
 0x4b1   : > { %p7570_p11 = pneg %p7569_p4 }
 0x4b3   : > { %7978 = dma.done.wait (%p7570_p11), %s4790_s17, 416  }
 0x4b4   : > { %7980 = vsyncadd (%p7570_p11), %s4790_s17, 4294966880  ;;  %s9823_s12 = sld [smem:[#allocation23_spill]]  ;;  %s9825_s30 = smov %s7987_s10 }
 0x4b5   : > { %s9824_s1 = sld [smem:[#allocation24_spill]]  ;;  %s9826_s10 = smov %s7991_s11 }
 0x4ba   : > { %p23_p12 = scmp.ge.s32.totalorder %s9823_s12, 4  }
 0x4bb   : > { %s9827_s11 = smov %s9824_s1 }
 0x4bc   :  { %25 = sbr.rel (!%p23_p12) target bundleno = 11 (0xb), region = 135 }
 0x4c1   :  { %4796 = vsyncpa [#allocation3], 1 }
 0x4c2   :  { %4798 = vsyncpa [#allocation3 + $0x1], 1 }
 0x4c3   :  { %4799 = vsyncpa [#allocation6], 1 }
 0x4c4   :  { %4800 = vsyncpa [#allocation9], 1 }
 0x4c5   :  { %4801 = vsyncpa [#allocation12], 1 }
 0x4c6   :  { %4802 = vsyncpa [#allocation4], 1 }
 0x4c7   :  { %4804 = vsyncpa [#allocation4 + $0x1], 1 }

</bundles_post_ra>
